<compile_context>
chip_gen: v7x
topology: tpu7x:2x2x1
jax: 0.10.0
libtpu: 0.0.40
codegen_flags: <defaults>
</compile_context>

<pallas_src>
import functools
import math

import jax
import jax.numpy as jnp
from jax.experimental import pallas as pl
from jax.experimental.pallas import tpu as pltpu

LN2 = math.log(2.0)
FP = 128   # padded feature dim (lane-dense)
KP = 128   # padded RBF / Gaussian-center dim (lane-dense)


def _ssplus(x):
    """Shifted softplus: softplus(x) - log(2)  (numerically stable, ssplus(0)=0)."""
    return jnp.maximum(x, 0.0) + jnp.log1p(jnp.exp(-jnp.abs(x))) - LN2


def _pad_to(a, shape):
    return jnp.pad(a, [(0, s - d) for d, s in zip(a.shape, shape)])


def _interaction_kernel(x_i_ref, x_j_ref, dist_ref, adj_ref, mu_ref,
                        w1_ref, b1_ref, wf1_ref, bf1_ref, wf2_ref, bf2_ref,
                        wm1_ref, bm1_ref, wm2_ref, bm2_ref,
                        out_ref, acc_ref, *, gamma):
    j_blk = pl.program_id(1)

    @pl.when(j_blk == 0)
    def _init():
        acc_ref[...] = jnp.zeros_like(acc_ref)

    ti, fp = x_i_ref.shape
    tj = x_j_ref.shape[0]
    bf16 = jnp.bfloat16

    # lin_1 on the sender block: m[j] = x[j] @ W1 + b1  (bf16 in, f32 accumulate).
    # Recomputed per receiver block; cost is ~FP/(TI*(KP+FP)) of the filter net (<2%).
    m_j = jnp.dot(x_j_ref[...].astype(bf16), w1_ref[...],
                  preferred_element_type=jnp.float32) + b1_ref[...]            # (TJ, FP)

    # Gaussian RBF expansion of pairwise distances: edges on sublanes, K on lanes.
    d = dist_ref[...].reshape(ti * tj, 1)                                      # (TI*TJ, 1)
    e = jnp.exp(-gamma * (d - mu_ref[...]) ** 2)                               # (TI*TJ, KP)

    # Filter-generating network: Dense -> SSPlus -> Dense (edge-heavy, bf16 MXU).
    h = _ssplus(jnp.dot(e.astype(bf16), wf1_ref[...],
                        preferred_element_type=jnp.float32) + bf1_ref[...])
    w_ij = (jnp.dot(h.astype(bf16), wf2_ref[...],
                    preferred_element_type=jnp.float32) + bf2_ref[...])        # (TI*TJ, FP)

    # "Gather" m[j]: broadcast the sender block over the receiver axis.
    # "Scatter-add" to node i: adjacency(count)-weighted sublane reduce over senders.
    msg = w_ij.reshape(ti, tj, fp) * m_j[None, :, :] * adj_ref[...]            # (TI,TJ,FP)
    acc_ref[...] += jnp.sum(msg, axis=1)                                       # (TI, FP)

    @pl.when(j_blk == pl.num_programs(1) - 1)
    def _finalize():
        # Node MLP (tiny, per-node): Dense -> SSPlus -> Dense in f32, then residual.
        v = acc_ref[...]
        v = _ssplus(jnp.dot(v, wm1_ref[...],
                            preferred_element_type=jnp.float32) + bm1_ref[...])
        v = jnp.dot(v, wm2_ref[...],
                    preferred_element_type=jnp.float32) + bm2_ref[...]
        out_ref[...] = x_i_ref[...] + v


def interaction_forward(params, x, edge_index, z, position, *, gamma, tile_nodes=32):
    """Pallas-backed forward of Interaction(x, edge_index, z, position)."""
    # TODO(synk): `z` (atomic numbers) is accepted for API parity with the reference
    # module but is not used by the SchNet-style continuous-filter convolution.
    del z
    N, F = x.shape
    K = params["mu"].shape[1]
    assert F <= FP and K <= KP, "feature / RBF dims exceed the padded lane width"

    # Node tile: multiple of 8 (sublane width), clamped to the (8-padded) node count
    # so tiny graphs don't pay for oversized tiles. Bigger tiles => bigger MXU
    # operands and fewer pipeline steps.
    t = int(tile_nodes)
    assert t % 8 == 0, "tile_nodes must be a multiple of 8 (sublane width)"
    n8 = ((N + 7) // 8) * 8
    t = min(t, n8)
    Np = ((N + t - 1) // t) * t            # pad node count to the tile size
    TI = TJ = t
    grid_i, grid_j = Np // TI, Np // TJ

    f32 = jnp.float32
    xp = _pad_to(x.astype(f32), (Np, FP))
    posp = _pad_to(position.astype(f32), (Np, 3))

    # O(N^2) glue in plain JAX (4 B/edge each, fully hidden behind compute):
    # pairwise distances + adjacency *counts* (so duplicate edges in edge_index are
    # accumulated exactly like the reference scatter-add), laid out (Np, Np, 1) so
    # edge blocks land on sublanes.
    diff = posp[:, None, :] - posp[None, :, :]
    dist = jnp.sqrt(jnp.sum(diff * diff, axis=-1))[..., None]                  # (Np, Np, 1)
    src, dst = edge_index[0], edge_index[1]
    adj = jnp.zeros((Np, Np), f32).at[dst, src].add(1.0)[..., None]            # (Np, Np, 1)

    # Zero-padded params. Edge-heavy weights (lin_1, filter net) in bf16 (MXU-native);
    # node-MLP weights, biases and RBF centers stay f32. Padding is exact: padded
    # columns remain identically 0 through the whole block (ssplus(0) == 0).
    bf16 = jnp.bfloat16
    w1 = _pad_to(params["w1"], (FP, FP)).astype(bf16)
    wf1 = _pad_to(params["wf1"], (KP, FP)).astype(bf16)
    wf2 = _pad_to(params["wf2"], (FP, FP)).astype(bf16)
    wm1 = _pad_to(params["wm1"], (FP, FP))             # f32
    wm2 = _pad_to(params["wm2"], (FP, FP))             # f32
    b1 = _pad_to(params["b1"], (1, FP))
    bf1 = _pad_to(params["bf1"], (1, FP))
    bf2 = _pad_to(params["bf2"], (1, FP))
    bm1 = _pad_to(params["bm1"], (1, FP))
    bm2 = _pad_to(params["bm2"], (1, FP))
    mu = _pad_to(params["mu"], (1, KP))    # padded centers are dead: wf1 pad rows are 0

    full = lambda i, j: (0, 0)
    in_specs = [
        pl.BlockSpec((TI, FP), lambda i, j: (i, 0)),          # x, receiver block (residual)
        pl.BlockSpec((TJ, FP), lambda i, j: (j, 0)),          # x, sender block (lin_1 input)
        pl.BlockSpec((TI, TJ, 1), lambda i, j: (i, j, 0)),    # pairwise distances
        pl.BlockSpec((TI, TJ, 1), lambda i, j: (i, j, 0)),    # adjacency counts
        pl.BlockSpec((1, KP), full),                          # mu
        pl.BlockSpec((FP, FP), full), pl.BlockSpec((1, FP), full),   # w1, b1
        pl.BlockSpec((KP, FP), full), pl.BlockSpec((1, FP), full),   # wf1, bf1
        pl.BlockSpec((FP, FP), full), pl.BlockSpec((1, FP), full),   # wf2, bf2
        pl.BlockSpec((FP, FP), full), pl.BlockSpec((1, FP), full),   # wm1, bm1
        pl.BlockSpec((FP, FP), full), pl.BlockSpec((1, FP), full),   # wm2, bm2
    ]
    out_specs = pl.BlockSpec((TI, FP), lambda i, j: (i, 0))

    n_edges = Np * Np
    operands = (xp, xp, dist, adj, mu, w1, b1, wf1, bf1, wf2, bf2, wm1, bm1, wm2, bm2)
    cost = pl.CostEstimate(
        flops=int(2 * n_edges * (KP * FP + FP * FP)      # filter-generating net
                  + 2 * grid_i * Np * FP * FP            # lin_1 (recomputed per i-block)
                  + 4 * Np * FP * FP                     # node MLP
                  + 3 * n_edges * FP),                   # modulate / weight / reduce
        transcendentals=int(n_edges * (KP + 2 * FP) + 2 * Np * FP),  # RBF exp + ssplus
        bytes_accessed=int(sum(a.size * a.dtype.itemsize for a in operands) + Np * FP * 4),
    )

    out = pl.pallas_call(
        functools.partial(_interaction_kernel, gamma=float(gamma)),
        out_shape=jax.ShapeDtypeStruct((Np, FP), f32),
        grid_spec=pltpu.PrefetchScalarGridSpec(
            num_scalar_prefetch=0,
            grid=(grid_i, grid_j),
            in_specs=in_specs,
            out_specs=out_specs,
            scratch_shapes=[pltpu.VMEM((TI, FP), f32)]),
        compiler_params=pltpu.CompilerParams(
            dimension_semantics=("parallel", "arbitrary"),
            vmem_limit_bytes=32 * 1024 * 1024),
        cost_estimate=cost,
    )(*operands)

    return out[:N, :F]


def interaction_ref(params, x, edge_index, z, position, *, gamma):
    """Pure-JAX f32 reference (sparse edge-list formulation)."""
    del z
    src, dst = edge_index[0], edge_index[1]
    m = x @ params["w1"] + params["b1"]
    d = jnp.linalg.norm(position[dst] - position[src], axis=-1, keepdims=True)
    e = jnp.exp(-gamma * (d - params["mu"]) ** 2)
    h = _ssplus(e @ params["wf1"] + params["bf1"])
    w_ij = h @ params["wf2"] + params["bf2"]
    msg = w_ij * m[src]
    v = jnp.zeros_like(x).at[dst].add(msg)
    v = _ssplus(v @ params["wm1"] + params["bm1"]) @ params["wm2"] + params["bm2"]
    return x + v


def init_params(key, n_filters, u_max, step):
    mu = jnp.arange(0.0, u_max, step, dtype=jnp.float32)[None, :]   # (1, K) RBF centers
    k_rbf = mu.shape[1]

    def lin(k, fan_in, fan_out):
        bound = 1.0 / math.sqrt(fan_in)
        kw, kb = jax.random.split(k)
        w = jax.random.uniform(kw, (fan_in, fan_out), jnp.float32, -bound, bound)
        b = jax.random.uniform(kb, (1, fan_out), jnp.float32, -bound, bound)
        return w, b

    keys = jax.random.split(key, 5)
    w1, b1 = lin(keys[0], n_filters, n_filters)       # lin_1
    wf1, bf1 = lin(keys[1], k_rbf, n_filters)         # cfconv filter net layer 1
    wf2, bf2 = lin(keys[2], n_filters, n_filters)     # cfconv filter net layer 2
    wm1, bm1 = lin(keys[3], n_filters, n_filters)     # mlp layer 1
    wm2, bm2 = lin(keys[4], n_filters, n_filters)     # mlp layer 2
    return dict(mu=mu, w1=w1, b1=b1, wf1=wf1, bf1=bf1, wf2=wf2, bf2=bf2,
                wm1=wm1, bm1=bm1, wm2=wm2, bm2=bm2)


if __name__ == "__main__":
    # N=28 with tile_nodes=16 -> node padding (28->32), a 2x2 grid (exercises the
    # multi-block accumulate / finalize path) plus F (32->128) and K (30->128) padding.
    N, F = 28, 32
    u_max, step, gamma = 3.0, 0.1, 10.0

    key = jax.random.PRNGKey(0)
    k_p, k_x, k_pos = jax.random.split(key, 3)
    params = init_params(k_p, F, u_max, step)

    x = jax.random.normal(k_x, (N, F), jnp.float32)
    position = jax.random.uniform(k_pos, (N, 3), jnp.float32) * 3.0
    z = (jnp.arange(N) % 5 + 1).astype(jnp.int32)

    # fully-connected graph without self-loops; rows = (source, target)
    ii, jj = jnp.meshgrid(jnp.arange(N), jnp.arange(N), indexing="ij")
    off_diag = ii != jj
    edge_index = jnp.stack([jj[off_diag], ii[off_diag]]).astype(jnp.int32)

    out = interaction_forward(params, x, edge_index, z, position,
                              gamma=gamma, tile_nodes=16)
    out = jax.block_until_ready(out)

    ref = interaction_ref(params, x, edge_index, z, position, gamma=gamma)
    assert out.shape == (N, F)
    max_err = float(jnp.max(jnp.abs(out - ref)))
    # tolerance accounts for bf16 MXU operands (f32 accumulation) in the per-edge
    # matmuls vs. the pure-f32 reference, summed over ~N neighbours per node
    assert jnp.allclose(out, ref, rtol=3e-2, atol=3e-2), \
        f"Pallas kernel mismatch vs JAX reference (max abs err {max_err})"

    print("KERNEL_OK")
</pallas_src>

<mosaic_0001>
module attributes {stable_mosaic.version = 11 : i64} {
  func.func @_interaction_kernel(%arg0: i32, %arg1: i32, %arg2: memref<16x128xf32, #tpu.memory_space<vmem>>, %arg3: memref<16x128xf32, #tpu.memory_space<vmem>>, %arg4: memref<16x16x1xf32, #tpu.memory_space<vmem>>, %arg5: memref<16x16x1xf32, #tpu.memory_space<vmem>>, %arg6: memref<1x128xf32, #tpu.memory_space<vmem>>, %arg7: memref<128x128xbf16, #tpu.memory_space<vmem>>, %arg8: memref<1x128xf32, #tpu.memory_space<vmem>>, %arg9: memref<128x128xbf16, #tpu.memory_space<vmem>>, %arg10: memref<1x128xf32, #tpu.memory_space<vmem>>, %arg11: memref<128x128xbf16, #tpu.memory_space<vmem>>, %arg12: memref<1x128xf32, #tpu.memory_space<vmem>>, %arg13: memref<128x128xf32, #tpu.memory_space<vmem>>, %arg14: memref<1x128xf32, #tpu.memory_space<vmem>>, %arg15: memref<128x128xf32, #tpu.memory_space<vmem>>, %arg16: memref<1x128xf32, #tpu.memory_space<vmem>>, %arg17: memref<16x128xf32, #tpu.memory_space<vmem>>, %arg18: memref<16x128xf32, #tpu.memory_space<vmem>>) attributes {dimension_semantics = [#tpu.dimension_semantics<parallel>, #tpu.dimension_semantics<arbitrary>], iteration_bounds = array<i64: 2, 2>, scalar_prefetch = 0 : i64, scratch_operands = 1 : i64, tpu.core_type = #tpu.core_type<tc>, window_params = [{transform_indices = @transform_0, window_bounds = array<i64: 16, 128>}, {transform_indices = @transform_1, window_bounds = array<i64: 16, 128>}, {transform_indices = @transform_2, window_bounds = array<i64: 16, 16, 1>}, {transform_indices = @transform_3, window_bounds = array<i64: 16, 16, 1>}, {pipeline_mode = #tpu.pipeline_mode<synchronous>, transform_indices = @transform_4, window_bounds = array<i64: 1, 128>}, {pipeline_mode = #tpu.pipeline_mode<synchronous>, transform_indices = @transform_5, window_bounds = array<i64: 128, 128>}, {pipeline_mode = #tpu.pipeline_mode<synchronous>, transform_indices = @transform_6, window_bounds = array<i64: 1, 128>}, {pipeline_mode = #tpu.pipeline_mode<synchronous>, transform_indices = @transform_7, window_bounds = array<i64: 128, 128>}, {pipeline_mode = #tpu.pipeline_mode<synchronous>, transform_indices = @transform_8, window_bounds = array<i64: 1, 128>}, {pipeline_mode = #tpu.pipeline_mode<synchronous>, transform_indices = @transform_9, window_bounds = array<i64: 128, 128>}, {pipeline_mode = #tpu.pipeline_mode<synchronous>, transform_indices = @transform_10, window_bounds = array<i64: 1, 128>}, {pipeline_mode = #tpu.pipeline_mode<synchronous>, transform_indices = @transform_11, window_bounds = array<i64: 128, 128>}, {pipeline_mode = #tpu.pipeline_mode<synchronous>, transform_indices = @transform_12, window_bounds = array<i64: 1, 128>}, {pipeline_mode = #tpu.pipeline_mode<synchronous>, transform_indices = @transform_13, window_bounds = array<i64: 128, 128>}, {pipeline_mode = #tpu.pipeline_mode<synchronous>, transform_indices = @transform_14, window_bounds = array<i64: 1, 128>}, {transform_indices = @transform_15, window_bounds = array<i64: 16, 128>}]} {
    %c0_i32 = arith.constant 0 : i32
    %0 = arith.cmpi eq, %arg1, %c0_i32 : i32
    %1 = arith.extui %0 : i1 to i32
    %c0_i32_0 = arith.constant 0 : i32
    %2 = arith.cmpi ne, %1, %c0_i32_0 : i32
    scf.if %2 {
      %cst_34 = arith.constant 0.000000e+00 : f32
      %56 = vector.broadcast %cst_34 : f32 to vector<16x128xf32>
      %c0_35 = arith.constant 0 : index
      %c0_36 = arith.constant 0 : index
      %57 = vector.load %arg18[%c0_35, %c0_36] : memref<16x128xf32, #tpu.memory_space<vmem>>, vector<16x128xf32>
      tpu.vector_store %arg18[%c0_35, %c0_36], %56 {strides = array<i32>} : memref<16x128xf32, #tpu.memory_space<vmem>>, vector<16x128xf32>,
    } else {
    }
    %c0 = arith.constant 0 : index
    %c0_1 = arith.constant 0 : index
    %3 = vector.load %arg3[%c0, %c0_1] : memref<16x128xf32, #tpu.memory_space<vmem>>, vector<16x128xf32>
    %4 = arith.truncf %3 : vector<16x128xf32> to vector<16x128xbf16>
    %c0_2 = arith.constant 0 : index
    %c0_3 = arith.constant 0 : index
    %5 = vector.load %arg7[%c0_2, %c0_3] : memref<128x128xbf16, #tpu.memory_space<vmem>>, vector<128x128xbf16>
    %cst = arith.constant dense<0.000000e+00> : vector<16x128xf32>
    %6 = tpu.matmul %4, %5, %cst {dimension_numbers = #tpu.dot_dimension_numbers<[1], [0], [0], [1], [0, 0, 1, 1], [], []>} : vector<16x128xbf16>, vector<128x128xbf16>, vector<16x128xf32> -> vector<16x128xf32>
    %c0_4 = arith.constant 0 : index
    %c0_5 = arith.constant 0 : index
    %7 = vector.load %arg8[%c0_4, %c0_5] : memref<1x128xf32, #tpu.memory_space<vmem>>, vector<1x128xf32>
    %8 = vector.broadcast %7 : vector<1x128xf32> to vector<16x128xf32>
    %9 = arith.addf %6, %8 : vector<16x128xf32>
    %c0_6 = arith.constant 0 : index
    %c0_7 = arith.constant 0 : index
    %c0_8 = arith.constant 0 : index
    %10 = vector.load %arg4[%c0_6, %c0_7, %c0_8] : memref<16x16x1xf32, #tpu.memory_space<vmem>>, vector<16x16x1xf32>
    %11 = vector.shape_cast %10 : vector<16x16x1xf32> to vector<256x1xf32>
    %c0_9 = arith.constant 0 : index
    %c0_10 = arith.constant 0 : index
    %12 = vector.load %arg6[%c0_9, %c0_10] : memref<1x128xf32, #tpu.memory_space<vmem>>, vector<1x128xf32>
    %13 = vector.broadcast %11 : vector<256x1xf32> to vector<256x128xf32>
    %14 = vector.broadcast %12 : vector<1x128xf32> to vector<256x128xf32>
    %15 = arith.subf %13, %14 : vector<256x128xf32>
    %16 = arith.mulf %15, %15 : vector<256x128xf32>
    %cst_11 = arith.constant -1.000000e+01 : f32
    %17 = vector.broadcast %cst_11 : f32 to vector<256x128xf32>
    %18 = arith.mulf %17, %16 : vector<256x128xf32>
    %19 = math.exp %18 : vector<256x128xf32>
    %20 = arith.truncf %19 : vector<256x128xf32> to vector<256x128xbf16>
    %c0_12 = arith.constant 0 : index
    %c0_13 = arith.constant 0 : index
    %21 = vector.load %arg9[%c0_12, %c0_13] : memref<128x128xbf16, #tpu.memory_space<vmem>>, vector<128x128xbf16>
    %cst_14 = arith.constant dense<0.000000e+00> : vector<256x128xf32>
    %22 = tpu.matmul %20, %21, %cst_14 {dimension_numbers = #tpu.dot_dimension_numbers<[1], [0], [0], [1], [0, 0, 1, 1], [], []>} : vector<256x128xbf16>, vector<128x128xbf16>, vector<256x128xf32> -> vector<256x128xf32>
    %c0_15 = arith.constant 0 : index
    %c0_16 = arith.constant 0 : index
    %23 = vector.load %arg10[%c0_15, %c0_16] : memref<1x128xf32, #tpu.memory_space<vmem>>, vector<1x128xf32>
    %24 = vector.broadcast %23 : vector<1x128xf32> to vector<256x128xf32>
    %25 = arith.addf %22, %24 : vector<256x128xf32>
    %cst_17 = arith.constant 0.000000e+00 : f32
    %26 = vector.broadcast %cst_17 : f32 to vector<256x128xf32>
    %27 = arith.maximumf %25, %26 : vector<256x128xf32>
    %28 = math.absf %25 : vector<256x128xf32>
    %cst_18 = arith.constant 0.000000e+00 : f32
    %29 = vector.broadcast %cst_18 : f32 to vector<256x128xf32>
    %30 = arith.subf %29, %28 : vector<256x128xf32>
    %31 = math.exp %30 : vector<256x128xf32>
    %32 = math.log1p %31 : vector<256x128xf32>
    %33 = arith.addf %27, %32 : vector<256x128xf32>
    %cst_19 = arith.constant 0.693147182 : f32
    %34 = vector.broadcast %cst_19 : f32 to vector<256x128xf32>
    %35 = arith.subf %33, %34 : vector<256x128xf32>
    %36 = arith.truncf %35 : vector<256x128xf32> to vector<256x128xbf16>
    %c0_20 = arith.constant 0 : index
    %c0_21 = arith.constant 0 : index
    %37 = vector.load %arg11[%c0_20, %c0_21] : memref<128x128xbf16, #tpu.memory_space<vmem>>, vector<128x128xbf16>
    %cst_22 = arith.constant dense<0.000000e+00> : vector<256x128xf32>
    %38 = tpu.matmul %36, %37, %cst_22 {dimension_numbers = #tpu.dot_dimension_numbers<[1], [0], [0], [1], [0, 0, 1, 1], [], []>} : vector<256x128xbf16>, vector<128x128xbf16>, vector<256x128xf32> -> vector<256x128xf32>
    %c0_23 = arith.constant 0 : index
    %c0_24 = arith.constant 0 : index
    %39 = vector.load %arg12[%c0_23, %c0_24] : memref<1x128xf32, #tpu.memory_space<vmem>>, vector<1x128xf32>
    %40 = vector.broadcast %39 : vector<1x128xf32> to vector<256x128xf32>
    %41 = arith.addf %38, %40 : vector<256x128xf32>
    %42 = vector.shape_cast %41 : vector<256x128xf32> to vector<16x16x128xf32>
    %43 = vector.shape_cast %9 : vector<16x128xf32> to vector<1x16x128xf32>
    %44 = vector.broadcast %43 : vector<1x16x128xf32> to vector<16x16x128xf32>
    %45 = arith.mulf %42, %44 : vector<16x16x128xf32>
    %c0_25 = arith.constant 0 : index
    %c0_26 = arith.constant 0 : index
    %c0_27 = arith.constant 0 : index
    %46 = vector.load %arg5[%c0_25, %c0_26, %c0_27] : memref<16x16x1xf32, #tpu.memory_space<vmem>>, vector<16x16x1xf32>
    %47 = vector.broadcast %46 : vector<16x16x1xf32> to vector<16x16x128xf32>
    %48 = arith.mulf %45, %47 : vector<16x16x128xf32>
    %c0_28 = arith.constant 0 : index
    %c0_29 = arith.constant 0 : index
    %49 = vector.load %arg18[%c0_28, %c0_29] : memref<16x128xf32, #tpu.memory_space<vmem>>, vector<16x128xf32>
    %cst_30 = arith.constant dense<0.000000e+00> : vector<16x128xf32>
    %50 = vector.multi_reduction <add>, %48, %cst_30 [1] : vector<16x16x128xf32> to vector<16x128xf32>
    %51 = arith.addf %49, %50 : vector<16x128xf32>
    %c0_31 = arith.constant 0 : index
    %c0_32 = arith.constant 0 : index
    %52 = vector.load %arg18[%c0_31, %c0_32] : memref<16x128xf32, #tpu.memory_space<vmem>>, vector<16x128xf32>
    tpu.vector_store %arg18[%c0_31, %c0_32], %51 {strides = array<i32>} : memref<16x128xf32, #tpu.memory_space<vmem>>, vector<16x128xf32>,
    %c1_i32 = arith.constant 1 : i32
    %53 = arith.cmpi eq, %arg1, %c1_i32 : i32
    %54 = arith.extui %53 : i1 to i32
    %c0_i32_33 = arith.constant 0 : i32
    %55 = arith.cmpi ne, %54, %c0_i32_33 : i32
    scf.if %55 {
      %c0_34 = arith.constant 0 : index
      %c0_35 = arith.constant 0 : index
      %56 = vector.load %arg18[%c0_34, %c0_35] : memref<16x128xf32, #tpu.memory_space<vmem>>, vector<16x128xf32>
      %c0_36 = arith.constant 0 : index
      %c0_37 = arith.constant 0 : index
      %57 = vector.load %arg13[%c0_36, %c0_37] : memref<128x128xf32, #tpu.memory_space<vmem>>, vector<128x128xf32>
      %cst_38 = arith.constant dense<0.000000e+00> : vector<16x128xf32>
      %58 = tpu.matmul %56, %57, %cst_38 {dimension_numbers = #tpu.dot_dimension_numbers<[1], [0], [0], [1], [0, 0, 1, 1], [], []>} : vector<16x128xf32>, vector<128x128xf32>, vector<16x128xf32> -> vector<16x128xf32>
      %c0_39 = arith.constant 0 : index
      %c0_40 = arith.constant 0 : index
      %59 = vector.load %arg14[%c0_39, %c0_40] : memref<1x128xf32, #tpu.memory_space<vmem>>, vector<1x128xf32>
      %60 = vector.broadcast %59 : vector<1x128xf32> to vector<16x128xf32>
      %61 = arith.addf %58, %60 : vector<16x128xf32>
      %cst_41 = arith.constant 0.000000e+00 : f32
      %62 = vector.broadcast %cst_41 : f32 to vector<16x128xf32>
      %63 = arith.maximumf %61, %62 : vector<16x128xf32>
      %64 = math.absf %61 : vector<16x128xf32>
      %cst_42 = arith.constant 0.000000e+00 : f32
      %65 = vector.broadcast %cst_42 : f32 to vector<16x128xf32>
      %66 = arith.subf %65, %64 : vector<16x128xf32>
      %67 = math.exp %66 : vector<16x128xf32>
      %68 = math.log1p %67 : vector<16x128xf32>
      %69 = arith.addf %63, %68 : vector<16x128xf32>
      %cst_43 = arith.constant 0.693147182 : f32
      %70 = vector.broadcast %cst_43 : f32 to vector<16x128xf32>
      %71 = arith.subf %69, %70 : vector<16x128xf32>
      %c0_44 = arith.constant 0 : index
      %c0_45 = arith.constant 0 : index
      %72 = vector.load %arg15[%c0_44, %c0_45] : memref<128x128xf32, #tpu.memory_space<vmem>>, vector<128x128xf32>
      %cst_46 = arith.constant dense<0.000000e+00> : vector<16x128xf32>
      %73 = tpu.matmul %71, %72, %cst_46 {dimension_numbers = #tpu.dot_dimension_numbers<[1], [0], [0], [1], [0, 0, 1, 1], [], []>} : vector<16x128xf32>, vector<128x128xf32>, vector<16x128xf32> -> vector<16x128xf32>
      %c0_47 = arith.constant 0 : index
      %c0_48 = arith.constant 0 : index
      %74 = vector.load %arg16[%c0_47, %c0_48] : memref<1x128xf32, #tpu.memory_space<vmem>>, vector<1x128xf32>
      %75 = vector.broadcast %74 : vector<1x128xf32> to vector<16x128xf32>
      %76 = arith.addf %73, %75 : vector<16x128xf32>
      %c0_49 = arith.constant 0 : index
      %c0_50 = arith.constant 0 : index
      %77 = vector.load %arg2[%c0_49, %c0_50] : memref<16x128xf32, #tpu.memory_space<vmem>>, vector<16x128xf32>
      %78 = arith.addf %77, %76 : vector<16x128xf32>
      %c0_51 = arith.constant 0 : index
      %c0_52 = arith.constant 0 : index
      %79 = vector.load %arg17[%c0_51, %c0_52] : memref<16x128xf32, #tpu.memory_space<vmem>>, vector<16x128xf32>
      tpu.vector_store %arg17[%c0_51, %c0_52], %78 {strides = array<i32>} : memref<16x128xf32, #tpu.memory_space<vmem>>, vector<16x128xf32>,
    } else {
    }
    return
  }
  func.func @transform_0(%arg0: i32, %arg1: i32) -> (i32, i32) {
    %c0_i32 = arith.constant 0 : i32
    %c0_i32_0 = arith.constant 0 : i32
    return %arg0, %c0_i32 : i32, i32
  }
  func.func @transform_1(%arg0: i32, %arg1: i32) -> (i32, i32) {
    %c0_i32 = arith.constant 0 : i32
    %c0_i32_0 = arith.constant 0 : i32
    return %arg1, %c0_i32 : i32, i32
  }
  func.func @transform_2(%arg0: i32, %arg1: i32) -> (i32, i32, i32) {
    %c0_i32 = arith.constant 0 : i32
    %c0_i32_0 = arith.constant 0 : i32
    return %arg0, %arg1, %c0_i32 : i32, i32, i32
  }
  func.func @transform_3(%arg0: i32, %arg1: i32) -> (i32, i32, i32) {
    %c0_i32 = arith.constant 0 : i32
    %c0_i32_0 = arith.constant 0 : i32
    return %arg0, %arg1, %c0_i32 : i32, i32, i32
  }
  func.func @transform_4(%arg0: i32, %arg1: i32) -> (i32, i32) {
    %c0_i32 = arith.constant 0 : i32
    %c0_i32_0 = arith.constant 0 : i32
    %c0_i32_1 = arith.constant 0 : i32
    return %c0_i32, %c0_i32_0 : i32, i32
  }
  func.func @transform_5(%arg0: i32, %arg1: i32) -> (i32, i32) {
    %c0_i32 = arith.constant 0 : i32
    %c0_i32_0 = arith.constant 0 : i32
    %c0_i32_1 = arith.constant 0 : i32
    return %c0_i32, %c0_i32_0 : i32, i32
  }
  func.func @transform_6(%arg0: i32, %arg1: i32) -> (i32, i32) {
    %c0_i32 = arith.constant 0 : i32
    %c0_i32_0 = arith.constant 0 : i32
    %c0_i32_1 = arith.constant 0 : i32
    return %c0_i32, %c0_i32_0 : i32, i32
  }
  func.func @transform_7(%arg0: i32, %arg1: i32) -> (i32, i32) {
    %c0_i32 = arith.constant 0 : i32
    %c0_i32_0 = arith.constant 0 : i32
    %c0_i32_1 = arith.constant 0 : i32
    return %c0_i32, %c0_i32_0 : i32, i32
  }
  func.func @transform_8(%arg0: i32, %arg1: i32) -> (i32, i32) {
    %c0_i32 = arith.constant 0 : i32
    %c0_i32_0 = arith.constant 0 : i32
    %c0_i32_1 = arith.constant 0 : i32
    return %c0_i32, %c0_i32_0 : i32, i32
  }
  func.func @transform_9(%arg0: i32, %arg1: i32) -> (i32, i32) {
    %c0_i32 = arith.constant 0 : i32
    %c0_i32_0 = arith.constant 0 : i32
    %c0_i32_1 = arith.constant 0 : i32
    return %c0_i32, %c0_i32_0 : i32, i32
  }
  func.func @transform_10(%arg0: i32, %arg1: i32) -> (i32, i32) {
    %c0_i32 = arith.constant 0 : i32
    %c0_i32_0 = arith.constant 0 : i32
    %c0_i32_1 = arith.constant 0 : i32
    return %c0_i32, %c0_i32_0 : i32, i32
  }
  func.func @transform_11(%arg0: i32, %arg1: i32) -> (i32, i32) {
    %c0_i32 = arith.constant 0 : i32
    %c0_i32_0 = arith.constant 0 : i32
    %c0_i32_1 = arith.constant 0 : i32
    return %c0_i32, %c0_i32_0 : i32, i32
  }
  func.func @transform_12(%arg0: i32, %arg1: i32) -> (i32, i32) {
    %c0_i32 = arith.constant 0 : i32
    %c0_i32_0 = arith.constant 0 : i32
    %c0_i32_1 = arith.constant 0 : i32
    return %c0_i32, %c0_i32_0 : i32, i32
  }
  func.func @transform_13(%arg0: i32, %arg1: i32) -> (i32, i32) {
    %c0_i32 = arith.constant 0 : i32
    %c0_i32_0 = arith.constant 0 : i32
    %c0_i32_1 = arith.constant 0 : i32
    return %c0_i32, %c0_i32_0 : i32, i32
  }
  func.func @transform_14(%arg0: i32, %arg1: i32) -> (i32, i32) {
    %c0_i32 = arith.constant 0 : i32
    %c0_i32_0 = arith.constant 0 : i32
    %c0_i32_1 = arith.constant 0 : i32
    return %c0_i32, %c0_i32_0 : i32, i32
  }
  func.func @transform_15(%arg0: i32, %arg1: i32) -> (i32, i32) {
    %c0_i32 = arith.constant 0 : i32
    %c0_i32_0 = arith.constant 0 : i32
    return %arg0, %c0_i32 : i32, i32
  }
}

</mosaic_0001>

<bundles_post_ra>
// kernel: tpu_custom_call.1
= control target key start
LH: loop header
LB: loop body
LE: loop exit
PB: predicated region body
PF: predicated region fallthrough
CT: control target
= control target key end

     0   :  { %s5582_s0 = inlined_call_operand.vmem [shape: f32[32,128], index: 0, kind: input, shape index: {}]   ;;  %s5583_s1 = inlined_call_operand.vmem [shape: f32[32,128], index: 1, kind: input, shape index: {}]   ;;  %s5584_s2 = inlined_call_operand.vmem [shape: f32[32,32,1], index: 2, kind: input, shape index: {}]   ;;  %s5585_s3 = inlined_call_operand.vmem [shape: f32[32,32,1], index: 3, kind: input, shape index: {}]   ;;  %s5586_s4 = inlined_call_operand.vmem [shape: f32[1,128], index: 4, kind: input, shape index: {}]   ;;  %s5587_s5 = inlined_call_operand.vmem [shape: bf16[128,128], index: 5, kind: input, shape index: {}]   ;;  %s5588_s6 = inlined_call_operand.vmem [shape: f32[1,128], index: 6, kind: input, shape index: {}]   ;;  %s5589_s7 = inlined_call_operand.vmem [shape: bf16[128,128], index: 7, kind: input, shape index: {}]   ;;  %s5590_s8 = inlined_call_operand.vmem [shape: f32[1,128], index: 8, kind: input, shape index: {}]   ;;  %s5591_s9 = inlined_call_operand.vmem [shape: bf16[128,128], index: 9, kind: input, shape index: {}]   ;;  %s5592_s10 = inlined_call_operand.vmem [shape: f32[1,128], index: 10, kind: input, shape index: {}]   ;;  %s5593_s11 = inlined_call_operand.vmem [shape: f32[128,128], index: 11, kind: input, shape index: {}]   ;;  %s5594_s12 = inlined_call_operand.vmem [shape: f32[1,128], index: 12, kind: input, shape index: {}]   ;;  %s5595_s13 = inlined_call_operand.vmem [shape: f32[128,128], index: 13, kind: input, shape index: {}]   ;;  %s5596_s14 = inlined_call_operand.vmem [shape: f32[1,128], index: 14, kind: input, shape index: {}]   ;;  %s5597_s15 = inlined_call_operand.hbm [shape: f32[32,128], index: 15, kind: output, shape index: {}]  }
   0x1   :  { %5607 = sst [smem:[#allocation14_spill]] %s5584_s2 }
   0x2   :  { %5608 = sst [smem:[#allocation15_spill]] %s5585_s3 }
   0x3   :  { %5609 = sst [smem:[#allocation16_spill]] %s5588_s6 }
   0x4   :  { %5610 = sst [smem:[#allocation17_spill]] %s5592_s10 }
   0x5   :  { %5611 = sst [smem:[#allocation18_spill]] %s5593_s11 }
   0x6   :  { %5612 = sst [smem:[#allocation19_spill]] %s5594_s12 }
   0x7   :  { %5613 = sst [smem:[#allocation20_spill]] %s5595_s13 }
   0x8   :  { %5614 = sst [smem:[#allocation21_spill]] %s5596_s14 }
   0x9   :  { %5615 = sst [smem:[#allocation22_spill]] %s5597_s15 }
   0xa   :  { %20 = vsyncpa [#allocation6], 0 }
   0xb   :  { %22 = vsyncpa [#allocation6 + $0x1], 0  ;;  %s4159_s18 = smov 0   ;;  %s4161_s19 = smov 0  }
   0xc   :  { %s4163_s20 = smov 0   ;;  %s4165_s21 = smov 0  }
   0xd   :  { %s4167_s22 = smov 0   ;;  %s4169_s23 = smov 0  }
   0xe   :  { %s4171_s24 = smov 0   ;;  %s4173_s25 = smov 0  }
   0xf   :  { %s4175_s26 = smov 0   ;;  %s4177_s27 = smov 0  }
  0x10 LB: > { %5616 = sst [smem:[#allocation8_spill]] %s4034_s18  ;;  %s3185_s28 = sadd.s32 4294967295, %s4070_s27   ;;  %s4070_s27 = sphi %s4177_s27, %s28_s27   ;;  %s4066_s26 = sphi %s4175_s26, %s5705_s26   ;;  %s4062_s25 = sphi %s4173_s25, %s5712_s25   ;;  %s4058_s24 = sphi %s4171_s24, %s5703_s24   ;;  %s4054_s23 = sphi %s4169_s23, %s5711_s23   ;;  %s4050_s22 = sphi %s4167_s22, %s5710_s22   ;;  %s4046_s21 = sphi %s4165_s21, %s5709_s21   ;;  %s4042_s20 = sphi %s4163_s20, %s5708_s20   ;;  %s4038_s19 = sphi %s4161_s19, %s5707_s19   ;;  %s4034_s18 = sphi %s4159_s18, %s5706_s18  }
  0x11   : > { %5617 = sst [smem:[#allocation9_spill]] %s4066_s26  ;;  %s3186_s29 = sadd.s32 4294967294, %s4070_s27  }
  0x12   : > { %s37_s30 = sadd.s32 1, %s4062_s25  ;;  %s40_s16 = sadd.s32 1, %s4066_s26 }
  0x13   : > { %p38_p0 = scmp.ge.s32.totalorder %s37_s30, 2  ;;  %s101_s17 = sadd.s32 1, %s4050_s22 }
  0x14   : > { %p108_p1 = scmp.ne.s32.totalorder %s4050_s22, %s4046_s21  ;;  %p109_p2 = scmp.eq.s32.totalorder %s4070_s27, 0 }
  0x15   : > { %s5714_s30 = smov (%p38_p0, %s37_s30), 0  ;;  %s5716_s16 = smov (!%p38_p0, %s40_s16), %s4066_s26 }
  0x16   : > { %5618 = sst [smem:[#allocation10_spill]] %s5714_s30  ;;  %s97_s15 = ssub.s32 %s4062_s25, %s5714_s30 }
  0x17   : > { %p4222_p3 = por %p109_p2, %p108_p1  ;;  %p42_p4 = scmp.ge.s32.totalorder %s5716_s16, 2 }
  0x18   : > { %s386_s12 = sadd.s32 1, %s4042_s20  ;;  %p396_p5 = scmp.ne.s32.totalorder %s4042_s20, %s4038_s19 }
  0x19   : > { %p397_p6 = scmp.eq.s32.totalorder %s3185_s28, 3  ;;  %s5718_s16 = smov (%p42_p4, %s5716_s16), 0 }
  0x1a   : > { %5620 = sst [smem:[#allocation11_spill]] %s5718_s16  ;;  %p402_p8 = scmp.ne.s32.totalorder %s4038_s19, %s4034_s18 }
  0x1b   : > { %p4231_p7 = por %p397_p6, %p396_p5  ;;  %s96_s11 = ssub.s32 %s4066_s26, %s5718_s16 }
  0x1c   : > { %p403_p9 = scmp.eq.s32.totalorder %s3186_s29, 3  ;;  %s98_s30 = sor.u32 %s97_s15, %s96_s11 }
  0x1d   : > { %p384_p10 = scmp.eq.s32.totalorder %s96_s11, 0  ;;  %p99_p11 = scmp.eq.s32.totalorder %s98_s30, 0 }
  0x1e   : > { %p4239_p12 = por %p403_p9, %p402_p8  ;;  %p3188_p13 = scmp.ge.s32.totalorder %s4070_s27, 4 }
  0x1f   : > { %s4244_s6 = scalar_select %p384_p10, %s4042_s20, %s386_s12  }
  0x20   : > { %s5622_s10 = scalar_select %p4239_p12, 1, 0 }
  0x21   : > { %s4247_s28 = scalar_select %p99_p11, %s4050_s22, %s101_s17  }
  0x22   : > { %5623 = sst [smem:[#allocation12_spill]] %s5622_s10  ;;  %452 = sbr.rel (%p3188_p13) target bundleno = 93 (0x5d), region = 60 }
  0x23   : > { %5624 = sst [smem:[#allocation13_spill]] %s4247_s28 }
  0x29   : > { %473 = sbr.rel (!%p4222_p3) target bundleno = 67 (0x43), region = 72  ;;  %s475_s15 = sand.u32 (%p4222_p3), 1, %s4050_s22  }
  0x2a   : > { %s3191_s11 = sshll.u32 (%p4222_p3), %s4062_s25, 1  ;;  %s3189_s29 = sshll.u32 (%p4222_p3), %s475_s15, 8 }
  0x2b   : > { %s3278_s30 = sshll.u32 (%p4222_p3), %s4066_s26, 6  ;;  %s5625_s2 = sld [smem:[#allocation14_spill]] (%p4222_p3) }
  0x2c   : > { %s481_s16 = sadd.s32 (%p4222_p3), %s3278_s30, %s3191_s11  ;;  %s4263_s15 = scalar_lea.vmem (%p4222_p3), [#allocation3], %s3189_s29 }
  0x2d   : > { %s3193_s18 = sshll.u32 (%p4222_p3), %s481_s16, 3 }
  0x31   : > { %s4258_s17 = scalar_lea.vmem %s5625_s2, %s3193_s18 }
  0x32   : > { %v573_v0 = vld [vmem:[%s4258_s17] sm:$0xff]  ;;  %v575_v1 = vld [vmem:[%s4258_s17 + $0x8] sm:$0xff] }
  0x33   : > { %v577_v2 = vld [vmem:[%s4258_s17 + $0x20] sm:$0xff]  ;;  %574 = vst [vmem:[%s4263_s15] sm:$0xff] %v573_v0  ;;  %576 = vst [vmem:[%s4263_s15 + $0x8] sm:$0xff] %v575_v1  ;;  %v579_v3 = vld [vmem:[%s4258_s17 + $0x28] sm:$0xff] }
  0x34   : > { %578 = vst [vmem:[%s4263_s15 + $0x10] sm:$0xff] %v577_v2  ;;  %v581_v4 = vld [vmem:[%s4258_s17 + $0x40] sm:$0xff]  ;;  %v583_v5 = vld [vmem:[%s4258_s17 + $0x48] sm:$0xff]  ;;  %580 = vst [vmem:[%s4263_s15 + $0x18] sm:$0xff] %v579_v3 }
  0x35   : > { %582 = vst [vmem:[%s4263_s15 + $0x20] sm:$0xff] %v581_v4  ;;  %584 = vst [vmem:[%s4263_s15 + $0x28] sm:$0xff] %v583_v5  ;;  %v585_v6 = vld [vmem:[%s4258_s17 + $0x60] sm:$0xff]  ;;  %v587_v7 = vld [vmem:[%s4258_s17 + $0x68] sm:$0xff] }
  0x36   : > { %v589_v8 = vld [vmem:[%s4258_s17 + $0x80] sm:$0xff]  ;;  %586 = vst [vmem:[%s4263_s15 + $0x30] sm:$0xff] %v585_v6  ;;  %588 = vst [vmem:[%s4263_s15 + $0x38] sm:$0xff] %v587_v7  ;;  %v591_v9 = vld [vmem:[%s4258_s17 + $0x88] sm:$0xff] }
  0x37   : > { %590 = vst [vmem:[%s4263_s15 + $0x40] sm:$0xff] %v589_v8  ;;  %v593_v10 = vld [vmem:[%s4258_s17 + $0xa0] sm:$0xff]  ;;  %v595_v11 = vld [vmem:[%s4258_s17 + $0xa8] sm:$0xff]  ;;  %592 = vst [vmem:[%s4263_s15 + $0x48] sm:$0xff] %v591_v9 }
  0x38   : > { %594 = vst [vmem:[%s4263_s15 + $0x50] sm:$0xff] %v593_v10  ;;  %596 = vst [vmem:[%s4263_s15 + $0x58] sm:$0xff] %v595_v11  ;;  %v597_v12 = vld [vmem:[%s4258_s17 + $0xc0] sm:$0xff]  ;;  %v599_v13 = vld [vmem:[%s4258_s17 + $0xc8] sm:$0xff] }
  0x39   : > { %v601_v14 = vld [vmem:[%s4258_s17 + $0xe0] sm:$0xff]  ;;  %598 = vst [vmem:[%s4263_s15 + $0x60] sm:$0xff] %v597_v12  ;;  %600 = vst [vmem:[%s4263_s15 + $0x68] sm:$0xff] %v599_v13  ;;  %v603_v15 = vld [vmem:[%s4258_s17 + $0xe8] sm:$0xff] }
  0x3a   : > { %602 = vst [vmem:[%s4263_s15 + $0x70] sm:$0xff] %v601_v14  ;;  %v605_v16 = vld [vmem:[%s4258_s17 + $0x100] sm:$0xff]  ;;  %v607_v17 = vld [vmem:[%s4258_s17 + $0x108] sm:$0xff]  ;;  %604 = vst [vmem:[%s4263_s15 + $0x78] sm:$0xff] %v603_v15 }
  0x3b   : > { %606 = vst [vmem:[%s4263_s15 + $0x80] sm:$0xff] %v605_v16  ;;  %608 = vst [vmem:[%s4263_s15 + $0x88] sm:$0xff] %v607_v17  ;;  %v609_v18 = vld [vmem:[%s4258_s17 + $0x120] sm:$0xff]  ;;  %v611_v19 = vld [vmem:[%s4258_s17 + $0x128] sm:$0xff] }
  0x3c   : > { %v613_v20 = vld [vmem:[%s4258_s17 + $0x140] sm:$0xff]  ;;  %610 = vst [vmem:[%s4263_s15 + $0x90] sm:$0xff] %v609_v18  ;;  %612 = vst [vmem:[%s4263_s15 + $0x98] sm:$0xff] %v611_v19  ;;  %v615_v21 = vld [vmem:[%s4258_s17 + $0x148] sm:$0xff] }
  0x3d   : > { %614 = vst [vmem:[%s4263_s15 + $0xa0] sm:$0xff] %v613_v20  ;;  %v617_v22 = vld [vmem:[%s4258_s17 + $0x160] sm:$0xff]  ;;  %v619_v23 = vld [vmem:[%s4258_s17 + $0x168] sm:$0xff]  ;;  %616 = vst [vmem:[%s4263_s15 + $0xa8] sm:$0xff] %v615_v21 }
  0x3e   : > { %618 = vst [vmem:[%s4263_s15 + $0xb0] sm:$0xff] %v617_v22  ;;  %620 = vst [vmem:[%s4263_s15 + $0xb8] sm:$0xff] %v619_v23  ;;  %v621_v24 = vld [vmem:[%s4258_s17 + $0x180] sm:$0xff]  ;;  %v623_v25 = vld [vmem:[%s4258_s17 + $0x188] sm:$0xff] }
  0x3f   : > { %v625_v26 = vld [vmem:[%s4258_s17 + $0x1a0] sm:$0xff]  ;;  %622 = vst [vmem:[%s4263_s15 + $0xc0] sm:$0xff] %v621_v24  ;;  %624 = vst [vmem:[%s4263_s15 + $0xc8] sm:$0xff] %v623_v25  ;;  %v627_v27 = vld [vmem:[%s4258_s17 + $0x1a8] sm:$0xff] }
  0x40   : > { %626 = vst [vmem:[%s4263_s15 + $0xd0] sm:$0xff] %v625_v26  ;;  %v629_v28 = vld [vmem:[%s4258_s17 + $0x1c0] sm:$0xff]  ;;  %v631_v29 = vld [vmem:[%s4258_s17 + $0x1c8] sm:$0xff]  ;;  %628 = vst [vmem:[%s4263_s15 + $0xd8] sm:$0xff] %v627_v27 }
  0x41   : > { %630 = vst [vmem:[%s4263_s15 + $0xe0] sm:$0xff] %v629_v28  ;;  %632 = vst [vmem:[%s4263_s15 + $0xe8] sm:$0xff] %v631_v29  ;;  %v633_v30 = vld [vmem:[%s4258_s17 + $0x1e0] sm:$0xff]  ;;  %v635_v31 = vld [vmem:[%s4258_s17 + $0x1e8] sm:$0xff] }
  0x42   : > { %634 = vst [vmem:[%s4263_s15 + $0xf0] sm:$0xff] %v633_v30  ;;  %636 = vst [vmem:[%s4263_s15 + $0xf8] sm:$0xff] %v635_v31 }
  0x43 PF: > { %642 = sbr.rel (!%p4222_p3) target bundleno = 93 (0x5d), region = 110  ;;  %s644_s10 = sand.u32 (%p4222_p3), 1, %s4050_s22  }
  0x44   : > { %s3196_s18 = sshll.u32 (%p4222_p3), %s4062_s25, 1  ;;  %s3194_s16 = sshll.u32 (%p4222_p3), %s644_s10, 8 }
  0x45   : > { %s3279_s11 = sshll.u32 (%p4222_p3), %s4066_s26, 6  ;;  %s5626_s3 = sld [smem:[#allocation15_spill]] (%p4222_p3) }
  0x46   : > { %s650_s29 = sadd.s32 (%p4222_p3), %s3279_s11, %s3196_s18  ;;  %s4339_s14 = scalar_lea.vmem (%p4222_p3), [#allocation4], %s3194_s16 }
  0x47   : > { %s3198_s30 = sshll.u32 (%p4222_p3), %s650_s29, 3 }
  0x4b   : > { %s4334_s28 = scalar_lea.vmem %s5626_s3, %s3198_s30 }
  0x4c   : > { %v742_v32 = vld [vmem:[%s4334_s28] sm:$0xff]  ;;  %v744_v33 = vld [vmem:[%s4334_s28 + $0x8] sm:$0xff] }
  0x4d   : > { %v746_v34 = vld [vmem:[%s4334_s28 + $0x20] sm:$0xff]  ;;  %743 = vst [vmem:[%s4339_s14] sm:$0xff] %v742_v32  ;;  %745 = vst [vmem:[%s4339_s14 + $0x8] sm:$0xff] %v744_v33  ;;  %v748_v35 = vld [vmem:[%s4334_s28 + $0x28] sm:$0xff] }
  0x4e   : > { %747 = vst [vmem:[%s4339_s14 + $0x10] sm:$0xff] %v746_v34  ;;  %v750_v36 = vld [vmem:[%s4334_s28 + $0x40] sm:$0xff]  ;;  %v752_v37 = vld [vmem:[%s4334_s28 + $0x48] sm:$0xff]  ;;  %749 = vst [vmem:[%s4339_s14 + $0x18] sm:$0xff] %v748_v35 }
  0x4f   : > { %751 = vst [vmem:[%s4339_s14 + $0x20] sm:$0xff] %v750_v36  ;;  %753 = vst [vmem:[%s4339_s14 + $0x28] sm:$0xff] %v752_v37  ;;  %v754_v38 = vld [vmem:[%s4334_s28 + $0x60] sm:$0xff]  ;;  %v756_v39 = vld [vmem:[%s4334_s28 + $0x68] sm:$0xff] }
  0x50   : > { %v758_v40 = vld [vmem:[%s4334_s28 + $0x80] sm:$0xff]  ;;  %755 = vst [vmem:[%s4339_s14 + $0x30] sm:$0xff] %v754_v38  ;;  %757 = vst [vmem:[%s4339_s14 + $0x38] sm:$0xff] %v756_v39  ;;  %v760_v41 = vld [vmem:[%s4334_s28 + $0x88] sm:$0xff] }
  0x51   : > { %759 = vst [vmem:[%s4339_s14 + $0x40] sm:$0xff] %v758_v40  ;;  %v762_v42 = vld [vmem:[%s4334_s28 + $0xa0] sm:$0xff]  ;;  %v764_v43 = vld [vmem:[%s4334_s28 + $0xa8] sm:$0xff]  ;;  %761 = vst [vmem:[%s4339_s14 + $0x48] sm:$0xff] %v760_v41 }
  0x52   : > { %763 = vst [vmem:[%s4339_s14 + $0x50] sm:$0xff] %v762_v42  ;;  %765 = vst [vmem:[%s4339_s14 + $0x58] sm:$0xff] %v764_v43  ;;  %v766_v44 = vld [vmem:[%s4334_s28 + $0xc0] sm:$0xff]  ;;  %v768_v45 = vld [vmem:[%s4334_s28 + $0xc8] sm:$0xff] }
  0x53   : > { %v770_v46 = vld [vmem:[%s4334_s28 + $0xe0] sm:$0xff]  ;;  %767 = vst [vmem:[%s4339_s14 + $0x60] sm:$0xff] %v766_v44  ;;  %769 = vst [vmem:[%s4339_s14 + $0x68] sm:$0xff] %v768_v45  ;;  %v772_v47 = vld [vmem:[%s4334_s28 + $0xe8] sm:$0xff] }
  0x54   : > { %771 = vst [vmem:[%s4339_s14 + $0x70] sm:$0xff] %v770_v46  ;;  %v774_v48 = vld [vmem:[%s4334_s28 + $0x100] sm:$0xff]  ;;  %v776_v49 = vld [vmem:[%s4334_s28 + $0x108] sm:$0xff]  ;;  %773 = vst [vmem:[%s4339_s14 + $0x78] sm:$0xff] %v772_v47 }
  0x55   : > { %775 = vst [vmem:[%s4339_s14 + $0x80] sm:$0xff] %v774_v48  ;;  %777 = vst [vmem:[%s4339_s14 + $0x88] sm:$0xff] %v776_v49  ;;  %v778_v50 = vld [vmem:[%s4334_s28 + $0x120] sm:$0xff]  ;;  %v780_v51 = vld [vmem:[%s4334_s28 + $0x128] sm:$0xff] }
  0x56   : > { %v782_v52 = vld [vmem:[%s4334_s28 + $0x140] sm:$0xff]  ;;  %779 = vst [vmem:[%s4339_s14 + $0x90] sm:$0xff] %v778_v50  ;;  %781 = vst [vmem:[%s4339_s14 + $0x98] sm:$0xff] %v780_v51  ;;  %v784_v53 = vld [vmem:[%s4334_s28 + $0x148] sm:$0xff] }
  0x57   : > { %783 = vst [vmem:[%s4339_s14 + $0xa0] sm:$0xff] %v782_v52  ;;  %v786_v54 = vld [vmem:[%s4334_s28 + $0x160] sm:$0xff]  ;;  %v788_v55 = vld [vmem:[%s4334_s28 + $0x168] sm:$0xff]  ;;  %785 = vst [vmem:[%s4339_s14 + $0xa8] sm:$0xff] %v784_v53 }
  0x58   : > { %787 = vst [vmem:[%s4339_s14 + $0xb0] sm:$0xff] %v786_v54  ;;  %789 = vst [vmem:[%s4339_s14 + $0xb8] sm:$0xff] %v788_v55  ;;  %v790_v56 = vld [vmem:[%s4334_s28 + $0x180] sm:$0xff]  ;;  %v792_v57 = vld [vmem:[%s4334_s28 + $0x188] sm:$0xff] }
  0x59   : > { %v794_v58 = vld [vmem:[%s4334_s28 + $0x1a0] sm:$0xff]  ;;  %791 = vst [vmem:[%s4339_s14 + $0xc0] sm:$0xff] %v790_v56  ;;  %793 = vst [vmem:[%s4339_s14 + $0xc8] sm:$0xff] %v792_v57  ;;  %v796_v59 = vld [vmem:[%s4334_s28 + $0x1a8] sm:$0xff] }
  0x5a   : > { %795 = vst [vmem:[%s4339_s14 + $0xd0] sm:$0xff] %v794_v58  ;;  %v798_v60 = vld [vmem:[%s4334_s28 + $0x1c0] sm:$0xff]  ;;  %v800_v61 = vld [vmem:[%s4334_s28 + $0x1c8] sm:$0xff]  ;;  %797 = vst [vmem:[%s4339_s14 + $0xd8] sm:$0xff] %v796_v59 }
  0x5b   : > { %799 = vst [vmem:[%s4339_s14 + $0xe0] sm:$0xff] %v798_v60  ;;  %801 = vst [vmem:[%s4339_s14 + $0xe8] sm:$0xff] %v800_v61  ;;  %v802_v62 = vld [vmem:[%s4334_s28 + $0x1e0] sm:$0xff]  ;;  %v804_v63 = vld [vmem:[%s4334_s28 + $0x1e8] sm:$0xff] }
  0x5c   : > { %803 = vst [vmem:[%s4339_s14 + $0xf0] sm:$0xff] %v802_v62  ;;  %805 = vst [vmem:[%s4339_s14 + $0xf8] sm:$0xff] %v804_v63 }
  0x5d PF: > { %p3199_p0 = scmp.ge.s32.totalorder %s4070_s27, 1  ;;  %p810_p1 = scmp.lt.s32.totalorder %s4070_s27, 5 }
  0x5f   : > { %p811_p2 = pnand %p3199_p0, %p810_p1 }
  0x60   : > { %s817_s2 = sand.u32 (!%p811_p2), 1, %s4046_s21   ;;  %s5605_s17 = sand.u32 (!%p811_p2), 1, %s4038_s19  }
  0x61   : > { %814 = sbr.rel (%p811_p2) target bundleno = 1398 (0x576), region = 148  ;;  %s3200_s15 = sshll.u32 (!%p811_p2), %s817_s2, 8 }
  0x62   : > { %s3202_s28 = sshll.u32 (!%p811_p2), %s5605_s17, 4  ;;  %s3203_s10 = sshll.u32 (!%p811_p2), %s4058_s24, 1 }
  0x63   : > { %p886_p3 = scmp.lt.s32.totalorder (!%p811_p2), %s3203_s10, 3  ;;  %s3205_s18 = sshll.u32 (!%p811_p2), %s4054_s23, 1 }
  0x64   : > { %p892_p4 = scmp.lt.s32.totalorder (!%p811_p2), %s3205_s18, 3  ;;  %s4420_s2 = scalar_lea.vmem (!%p811_p2), [#allocation3], %s3200_s15 }
  0x65   : > { %s4422_s17 = scalar_lea.vmem (!%p811_p2), [#allocation4], %s3200_s15  ;;  %s4424_s26 = scalar_lea.vmem (!%p811_p2), [#allocation5], %s3202_s28 }
  0x66   : > { %p3207_p5 = scmp.ne.s32.totalorder (!%p811_p2), %s4054_s23, 0 }
  0x68   : > { %s5720_s10 = smov (!%p886_p3, %s3203_s10), 3  ;;  %s5722_s18 = smov (!%p892_p4, %s3205_s18), 3 }
  0x69   : > { %s3204_s16 = sshll.u32 %s5720_s10, 3  ;;  %s3206_s12 = sshll.u32 %s5722_s18, 3  ;;  %v4072_v0 = vmov (!%p3207_p5), 0.0  }
  0x6a   : > { %s4413_s30 = scalar_lea.vmem %s5582_s0, %s3204_s16  ;;  %s4418_s21 = scalar_lea.vmem %s5583_s1, %s3206_s12  ;;  %907 = vst [vmem:[#allocation2] sm:$0xff] (!%p3207_p5), %v4072_v0  ;;  %908 = vst [vmem:[#allocation2 + $0x8] sm:$0xff] (!%p3207_p5), %v4072_v0 }
  0x6b   : > { %906 = sbr.rel (%p3207_p5) target bundleno = 114 (0x72), region = 160 }
  0x72 PF: > { %v1026_v1 = vld [vmem:[%s4420_s2 + $0x10] sm:$0xff]  ;;  %v1024_v2 = vld [vmem:[%s4420_s2] sm:$0xff]  ;;  %v4073_v3 = vmov 0   ;;  %v1027_v4 = vld [vmem:[%s4420_s2 + $0x18] sm:$0xff]  ;;  %vm4075_vm0 = vmmov 0   ;;  %s5691_s29 = sld [smem:[#allocation16_spill]] }
  0x73   : > { %3734 = vset.pattern.permute.xlu1 %v4073_v3  ;;  %3733 = vset.pattern.permute.xlu0 %v4073_v3  ;;  %v1025_v5 = vld [vmem:[%s4420_s2 + $0x8] sm:$0xff]  ;;  %v1028_v7 = vld [vmem:[%s4420_s2 + $0x20] sm:$0xff]  ;;  %v1031_v8 = vld [vmem:[%s4420_s2 + $0x38] sm:$0xff]  ;;  %s5692_s3 = sld [smem:[#allocation17_spill]]  ;;  %p3268_p6 = scmp.ne.s32.totalorder %s4054_s23, 1 }
  0x74   : > { %1069 = vperm.xlu1 %3734, %v1026_v1   ;;  %1059 = vperm.xlu0 %3733, %v1024_v2   ;;  %v1029_v6 = vld [vmem:[%s4420_s2 + $0x28] sm:$0xff]  ;;  %v1030_v9 = vld [vmem:[%s4420_s2 + $0x30] sm:$0xff]  ;;  %v1032_v11 = vld [vmem:[%s4420_s2 + $0x40] sm:$0xff]  ;;  %s5693_s28 = sld [smem:[#allocation18_spill]] (!%p3268_p6)  ;;  %s5694_s23 = sld [smem:[#allocation20_spill]] (!%p3268_p6) }
  0x75   : > { %v1033_v10 = vld [vmem:[%s4420_s2 + $0x48] sm:$0xff]  ;;  %v1035_v12 = vld [vmem:[%s4420_s2 + $0x58] sm:$0xff]  ;;  %v1034_v13 = vld [vmem:[%s4420_s2 + $0x50] sm:$0xff] }
  0x76   : > { %v3735_v14 = vld [vmem:[%s5589_s7] sm:$0xff]   ;;  %v1037_v15 = vld [vmem:[%s4420_s2 + $0x68] sm:$0xff]  ;;  %v1036_v16 = vld [vmem:[%s4420_s2 + $0x60] sm:$0xff] }
  0x77   : > { %3394 = vmatprep.subr.bf16.mxu1 %v3735_v14  ;;  %v3736_v17 = vld [vmem:[%s5589_s7 + $0x8] sm:$0xff]   ;;  %v3737_v18 = vld [vmem:[%s5589_s7 + $0x10] sm:$0xff]   ;;  %v1038_v20 = vld [vmem:[%s4420_s2 + $0x70] sm:$0xff] }
  0x78   : > { %1074 = vperm.xlu1 %3734, %v1027_v4   ;;  %1064 = vperm.xlu0 %3733, %v1025_v5   ;;  %v1039_v19 = vld [vmem:[%s4420_s2 + $0x78] sm:$0xff]  ;;  %v1041_v21 = vld [vmem:[%s4420_s2 + $0x88] sm:$0xff]  ;;  %v1040_v22 = vld [vmem:[%s4420_s2 + $0x80] sm:$0xff] }
  0x79   : > { %3395 = vmatpush3.bf16.msra.mxu1 %v3735_v14  ;;  %v3738_v23 = vld [vmem:[%s5589_s7 + $0x18] sm:$0xff]   ;;  %v3739_v24 = vld [vmem:[%s5589_s7 + $0x20] sm:$0xff]   ;;  %v1043_v25 = vld [vmem:[%s4420_s2 + $0x98] sm:$0xff] }
  0x7a   : > { %3396 = vmatprep.subr.bf16.mxu1 %v3736_v17  ;;  %v1042_v26 = vld [vmem:[%s4420_s2 + $0x90] sm:$0xff]  ;;  %v3740_v27 = vld [vmem:[%s5589_s7 + $0x28] sm:$0xff]   ;;  %v1045_v28 = vld [vmem:[%s4420_s2 + $0xa8] sm:$0xff] }
  0x7b   : > { %v1044_v29 = vld [vmem:[%s4420_s2 + $0xa0] sm:$0xff]  ;;  %v1047_v31 = vld [vmem:[%s4420_s2 + $0xb8] sm:$0xff]  ;;  %v1046_v32 = vld [vmem:[%s4420_s2 + $0xb0] sm:$0xff] }
  0x7c   : > { %1084 = vperm.xlu1 %3734, %v1029_v6   ;;  %1079 = vperm.xlu0 %3733, %v1028_v7   ;;  %v3741_v30 = vld [vmem:[%s5589_s7 + $0x30] sm:$0xff]   ;;  %v3742_v33 = vld [vmem:[%s5589_s7 + $0x38] sm:$0xff]   ;;  %v1051_v36 = vld [vmem:[%s4420_s2 + $0xd8] sm:$0xff] }
  0x7d   : > { %3397 = vmatpush3.bf16.msra.mxu1 %v3736_v17  ;;  %v1049_v34 = vld [vmem:[%s4420_s2 + $0xc8] sm:$0xff]  ;;  %v1048_v35 = vld [vmem:[%s4420_s2 + $0xc0] sm:$0xff]  ;;  %v1050_v37 = vld [vmem:[%s4420_s2 + $0xd0] sm:$0xff] }
  0x7e   : > { %3398 = vmatprep.subr.bf16.mxu1 %v3737_v18  ;;  %v1053_v38 = vld [vmem:[%s4420_s2 + $0xe8] sm:$0xff]  ;;  %v1052_v39 = vld [vmem:[%s4420_s2 + $0xe0] sm:$0xff]  ;;  %v1055_v40 = vld [vmem:[%s4420_s2 + $0xf8] sm:$0xff] }
  0x7f   : > { %v1054_v41 = vld [vmem:[%s4420_s2 + $0xf0] sm:$0xff]  ;;  %v2424_v42 = vld [vmem:[%s4422_s17 + $0x8] sm:$0xff]  ;;  %v2423_v43 = vld [vmem:[%s4422_s17] sm:$0xff] }
  0x80   : > { %1094 = vperm.xlu1 %3734, %v1031_v8   ;;  %1089 = vperm.xlu0 %3733, %v1030_v9   ;;  %v2426_v44 = vld [vmem:[%s4422_s17 + $0x18] sm:$0xff]  ;;  %v2425_v45 = vld [vmem:[%s4422_s17 + $0x10] sm:$0xff]  ;;  %v2428_v46 = vld [vmem:[%s4422_s17 + $0x28] sm:$0xff] }
  0x81   : > { %3399 = vmatpush3.bf16.msra.mxu1 %v3737_v18  ;;  %v2427_v47 = vld [vmem:[%s4422_s17 + $0x20] sm:$0xff]  ;;  %v2430_v48 = vld [vmem:[%s4422_s17 + $0x38] sm:$0xff]  ;;  %v2429_v49 = vld [vmem:[%s4422_s17 + $0x30] sm:$0xff] }
  0x82   : > { %3400 = vmatprep.subr.bf16.mxu1 %v3738_v23  ;;  %v2432_v50 = vld [vmem:[%s4422_s17 + $0x48] sm:$0xff]  ;;  %v2431_v51 = vld [vmem:[%s4422_s17 + $0x40] sm:$0xff]  ;;  %v2442_v54 = vld [vmem:[%s4422_s17 + $0x98] sm:$0xff] }
  0x83   : > { %v2440_v52 = vld [vmem:[%s4422_s17 + $0x88] sm:$0xff]  ;;  %v2439_v53 = vld [vmem:[%s4422_s17 + $0x80] sm:$0xff]  ;;  %v2441_v55 = vld [vmem:[%s4422_s17 + $0x90] sm:$0xff] }
  0x84   : > { %1104 = vperm.xlu1 %3734, %v1033_v10   ;;  %1099 = vperm.xlu0 %3733, %v1032_v11   ;;  %v2444_v56 = vld [vmem:[%s4422_s17 + $0xa8] sm:$0xff]  ;;  %v2443_v57 = vld [vmem:[%s4422_s17 + $0xa0] sm:$0xff]  ;;  %v2446_v58 = vld [vmem:[%s4422_s17 + $0xb8] sm:$0xff] }
  0x85   : > { %3401 = vmatpush3.bf16.msra.mxu1 %v3738_v23  ;;  %v2445_v59 = vld [vmem:[%s4422_s17 + $0xb0] sm:$0xff]  ;;  %v2448_v60 = vld [vmem:[%s4422_s17 + $0xc8] sm:$0xff]  ;;  %v2447_v61 = vld [vmem:[%s4422_s17 + $0xc0] sm:$0xff] }
  0x86   : > { %3402 = vmatprep.subr.bf16.mxu1 %v3739_v24  ;;  %v2434_v62 = vld [vmem:[%s4422_s17 + $0x58] sm:$0xff]  ;;  %v2433_v63 = vld [vmem:[%s4422_s17 + $0x50] sm:$0xff]  ;;  %v2436_v2 = vld [vmem:[%s4422_s17 + $0x68] sm:$0xff] }
  0x87   : > { %v2450_v0 = vld [vmem:[%s4422_s17 + $0xd8] sm:$0xff]  ;;  %v2449_v1 = vld [vmem:[%s4422_s17 + $0xd0] sm:$0xff]  ;;  %v2435_v3 = vld [vmem:[%s4422_s17 + $0x60] sm:$0xff] }
  0x88   : > { %1114 = vperm.xlu1 %3734, %v1035_v12   ;;  %1109 = vperm.xlu0 %3733, %v1034_v13   ;;  %v2452_v4 = vld [vmem:[%s4422_s17 + $0xe8] sm:$0xff]  ;;  %v2451_v5 = vld [vmem:[%s4422_s17 + $0xe0] sm:$0xff]  ;;  %v2438_v6 = vld [vmem:[%s4422_s17 + $0x78] sm:$0xff]  ;;  %v4074_v12 = vmov 0.0  }
  0x89   : > { %3403 = vmatpush3.bf16.msra.mxu1 %v3739_v24  ;;  %v2437_v7 = vld [vmem:[%s4422_s17 + $0x70] sm:$0xff]  ;;  %v2454_v8 = vld [vmem:[%s4422_s17 + $0xf8] sm:$0xff]  ;;  %3374 = vmatprep.subr.bf16.mxu0 %v4074_v12 }
  0x8a   : > { %3404 = vmatprep.subr.bf16.mxu1 %v3740_v27  ;;  %v2453_v9 = vld [vmem:[%s4422_s17 + $0xf0] sm:$0xff]  ;;  %v3744_v13 = vld [vmem:[%s5587_s5 + $0x8] sm:$0xff]   ;;  %3390 = vmatprep.mubr.msk.bf16.mxu0 %vm4075_vm0, %v4074_v12 }
  0x8b   : > { %v3743_v10 = vld [vmem:[%s5587_s5] sm:$0xff]  }
  0x8c   : > { %1124 = vperm.xlu1 %3734, %v1037_v15   ;;  %1119 = vperm.xlu0 %3733, %v1036_v16   ;;  %v4521_v11 = vld [vmem:[%s5586_s4] ss:$0 sm:$0xff] }
  0x8d   : > { %3405 = vmatpush3.bf16.msra.mxu1 %v3740_v27  ;;  %3375 = vmatpush3.bf16.msra.mxu0 %v3743_v10 }
  0x8e   : > { %3406 = vmatprep.subr.bf16.mxu1 %v3741_v30  ;;  %3376 = vmatprep.subr.bf16.mxu0 %v4074_v12 }
  0x90   : > { %1134 = vperm.xlu1 %3734, %v1039_v19   ;;  %1129 = vperm.xlu0 %3733, %v1038_v20   ;;  %v3745_v20 = vld [vmem:[%s5587_s5 + $0x10] sm:$0xff]  }
  0x91   : > { %3407 = vmatpush3.bf16.msra.mxu1 %v3741_v30  ;;  %3377 = vmatpush3.bf16.msra.mxu0 %v3744_v13 }
  0x92   : > { %3408 = vmatprep.subr.bf16.mxu1 %v3742_v33  ;;  %3378 = vmatprep.subr.bf16.mxu0 %v4074_v12 }
  0x94   : > { %1144 = vperm.xlu1 %3734, %v1041_v21   ;;  %1139 = vperm.xlu0 %3733, %v1040_v22  }
  0x95   : > { %3409 = vmatpush3.bf16.msra.mxu1 %v3742_v33  ;;  %3379 = vmatpush3.bf16.msra.mxu0 %v3745_v20 }
  0x96   : > { %3380 = vmatprep.subr.bf16.mxu0 %v4074_v12 }
  0x98   : > { %1154 = vperm.xlu1 %3734, %v1043_v25   ;;  %1149 = vperm.xlu0 %3733, %v1042_v26  }
  0x9c   : > { %1164 = vperm.xlu1 %3734, %v1045_v28   ;;  %1159 = vperm.xlu0 %3733, %v1044_v29   ;;  %v3746_v29 = vld [vmem:[%s5587_s5 + $0x18] sm:$0xff]  }
  0x9d   : > { %3381 = vmatpush3.bf16.msra.mxu0 %v3746_v29 }
  0x9e   : > { %3382 = vmatprep.subr.bf16.mxu0 %v4074_v12 }
  0xa0   : > { %1174 = vperm.xlu1 %3734, %v1047_v31   ;;  %1169 = vperm.xlu0 %3733, %v1046_v32  }
  0xa4   : > { %1184 = vperm.xlu1 %3734, %v1049_v34   ;;  %1179 = vperm.xlu0 %3733, %v1048_v35  }
  0xa8   : > { %1194 = vperm.xlu1 %3734, %v1051_v36   ;;  %1189 = vperm.xlu0 %3733, %v1050_v37   ;;  %v3747_v37 = vld [vmem:[%s5587_s5 + $0x20] sm:$0xff]  }
  0xa9   : > { %3383 = vmatpush3.bf16.msra.mxu0 %v3747_v37 }
  0xaa   : > { %3384 = vmatprep.subr.bf16.mxu0 %v4074_v12 }
  0xac   : > { %1204 = vperm.xlu1 %3734, %v1053_v38   ;;  %1199 = vperm.xlu0 %3733, %v1052_v39  }
  0xb0   : > { %1214 = vperm.xlu1 %3734, %v1055_v40   ;;  %1209 = vperm.xlu0 %3733, %v1054_v41  }
  0xb4   : > { %2462 = vperm.xlu1 %3734, %v2424_v42   ;;  %2457 = vperm.xlu0 %3733, %v2423_v43  }
  0xb8   : > { %2472 = vperm.xlu1 %3734, %v2426_v44   ;;  %2467 = vperm.xlu0 %3733, %v2425_v45  }
  0xbc   : > { %2482 = vperm.xlu1 %3734, %v2428_v46   ;;  %2477 = vperm.xlu0 %3733, %v2427_v47  }
  0xc0   : > { %2492 = vperm.xlu1 %3734, %v2430_v48   ;;  %2487 = vperm.xlu0 %3733, %v2429_v49  }
  0xc4   : > { %2502 = vperm.xlu1 %3734, %v2432_v50   ;;  %2497 = vperm.xlu0 %3733, %v2431_v51  }
  0xc8   : > { %2542 = vperm.xlu1 %3734, %v2440_v52   ;;  %2537 = vperm.xlu0 %3733, %v2439_v53  }
  0xcc   : > { %2552 = vperm.xlu1 %3734, %v2442_v54   ;;  %2547 = vperm.xlu0 %3733, %v2441_v55  }
  0xd0   : > { %2562 = vperm.xlu1 %3734, %v2444_v56   ;;  %2557 = vperm.xlu0 %3733, %v2443_v57  }
  0xd4   : > { %2572 = vperm.xlu1 %3734, %v2446_v58   ;;  %2567 = vperm.xlu0 %3733, %v2445_v59  }
  0xd8   : > { %2582 = vperm.xlu1 %3734, %v2448_v60   ;;  %2577 = vperm.xlu0 %3733, %v2447_v61  }
  0xdc   : > { %2512 = vperm.xlu1 %3734, %v2434_v62   ;;  %2507 = vperm.xlu0 %3733, %v2433_v63  }
  0xe0   : > { %2592 = vperm.xlu1 %3734, %v2450_v0   ;;  %2587 = vperm.xlu0 %3733, %v2449_v1  }
  0xe4   : > { %2522 = vperm.xlu1 %3734, %v2436_v2   ;;  %2517 = vperm.xlu0 %3733, %v2435_v3  }
  0xe8   : > { %2602 = vperm.xlu1 %3734, %v2452_v4   ;;  %2597 = vperm.xlu0 %3733, %v2451_v5  }
  0xec   : > { %2532 = vperm.xlu1 %3734, %v2438_v6   ;;  %2527 = vperm.xlu0 %3733, %v2437_v7  }
  0xf0   : > { %2612 = vperm.xlu1 %3734, %v2454_v8   ;;  %2607 = vperm.xlu0 %3733, %v2453_v9  }
  0xf3   : > { %v1070_v14 = vpop.permute.xlu1 %1069  ;;  %v1060_v15 = vpop.permute.xlu0 %1059 }
  0xf4   : > { %v1225_v16 = vsub.f32 %v1070_v14, %v4521_v11  ;;  %v1223_v17 = vsub.f32 %v1060_v15, %v4521_v11 }
  0xf6   : > { %v1257_v18 = vmul.f32 %v1225_v16, %v1225_v16  ;;  %v1255_v19 = vmul.f32 %v1223_v17, %v1223_v17 }
  0xf7   : > { %v1075_v21 = vpop.permute.xlu1 %1074  ;;  %v1065_v22 = vpop.permute.xlu0 %1064 }
  0xf8   : > { %v1289_v23 = vmul.f32 -10.0, %v1257_v18  ;;  %v1226_v24 = vsub.f32 %v1075_v21, %v4521_v11  ;;  %v1224_v25 = vsub.f32 %v1065_v22, %v4521_v11  ;;  %v1287_v26 = vmul.f32 -10.0, %v1255_v19 }
  0xfa   : > { %v1258_v27 = vmul.f32 %v1226_v24, %v1226_v24  ;;  %v1256_v28 = vmul.f32 %v1224_v25, %v1224_v25  ;;  %v1323_v30 = vmul.f32 1.442695, %v1289_v23  ;;  %v1319_v38 = vmul.f32 1.442695, %v1287_v26 }
  0xfb   : > { %v1085_v31 = vpop.permute.xlu1 %1084  ;;  %v1080_v32 = vpop.permute.xlu0 %1079 }
  0xfc   : > { %v1290_v33 = vmul.f32 -10.0, %v1258_v27  ;;  %v1288_v34 = vmul.f32 -10.0, %v1256_v28  ;;  %v1228_v35 = vsub.f32 %v1085_v31, %v4521_v11  ;;  %v1227_v36 = vsub.f32 %v1080_v32, %v4521_v11 }
  0xfd   : > { %3759 = vpow2.f32 %v1323_v30 }
  0xfe   : > { %v1325_v39 = vmul.f32 1.442695, %v1290_v33  ;;  %v1321_v40 = vmul.f32 1.442695, %v1288_v34  ;;  %v1260_v41 = vmul.f32 %v1228_v35, %v1228_v35  ;;  %v1259_v42 = vmul.f32 %v1227_v36, %v1227_v36 }
  0xff   : > { %v1095_v43 = vpop.permute.xlu1 %1094  ;;  %v1090_v44 = vpop.permute.xlu0 %1089 }
 0x100   : > { %3761 = vpow2.f32 %v1325_v39  ;;  %v1292_v45 = vmul.f32 -10.0, %v1260_v41  ;;  %v1230_v46 = vsub.f32 %v1095_v43, %v4521_v11  ;;  %v1229_v47 = vsub.f32 %v1090_v44, %v4521_v11 }
 0x101   : > { %3763 = vpow2.f32 %v1321_v40  ;;  %v1291_v48 = vmul.f32 -10.0, %v1259_v42 }
 0x102   : > { %3765 = vpow2.f32 %v1319_v38  ;;  %v1329_v49 = vmul.f32 1.442695, %v1292_v45  ;;  %v1262_v50 = vmul.f32 %v1230_v46, %v1230_v46  ;;  %v1261_v51 = vmul.f32 %v1229_v47, %v1229_v47 }
 0x103   : > { %v1327_v52 = vmul.f32 1.442695, %v1291_v48  ;;  %v1105_v53 = vpop.permute.xlu1 %1104  ;;  %v1100_v54 = vpop.permute.xlu0 %1099 }
 0x104   : > { %3767 = vpow2.f32 %v1329_v49  ;;  %v1294_v55 = vmul.f32 -10.0, %v1262_v50  ;;  %v1293_v56 = vmul.f32 -10.0, %v1261_v51  ;;  %v1232_v57 = vsub.f32 %v1105_v53, %v4521_v11 }
 0x105   : > { %3769 = vpow2.f32 %v1327_v52  ;;  %v1231_v58 = vsub.f32 %v1100_v54, %v4521_v11 }
 0x106   : > { %v1333_v59 = vmul.f32 1.442695, %v1294_v55  ;;  %v1331_v60 = vmul.f32 1.442695, %v1293_v56  ;;  %v1264_v61 = vmul.f32 %v1232_v57, %v1232_v57 }
 0x107   : > { %v1263_v62 = vmul.f32 %v1231_v58, %v1231_v58  ;;  %v1115_v63 = vpop.permute.xlu1 %1114  ;;  %v1110_v0 = vpop.permute.xlu0 %1109 }
 0x108   : > { %3771 = vpow2.f32 %v1333_v59  ;;  %v1296_v1 = vmul.f32 -10.0, %v1264_v61  ;;  %v1234_v2 = vsub.f32 %v1115_v63, %v4521_v11  ;;  %v1233_v3 = vsub.f32 %v1110_v0, %v4521_v11  ;;  %v3760_v4 = vpop.eup %3759 }
 0x109   : > { %3773 = vpow2.f32 %v1331_v60  ;;  %v1295_v5 = vmul.f32 -10.0, %v1263_v62 }
 0x10a   : > { %v3762_v6 = vpop.eup %3761  ;;  %v1337_v7 = vmul.f32 1.442695, %v1296_v1  ;;  %v1266_v8 = vmul.f32 %v1234_v2, %v1234_v2  ;;  %v1265_v9 = vmul.f32 %v1233_v3, %v1233_v3 }
 0x10b   : > { %v3764_v10 = vpop.eup %3763  ;;  %v1335_v13 = vmul.f32 1.442695, %v1295_v5  ;;  %v1125_v14 = vpop.permute.xlu1 %1124  ;;  %v1384_v16 = vpack.c.bf16 %v3762_v6, %v3760_v4 }
 0x10c   : > { %v1120_v15 = vpop.permute.xlu0 %1119  ;;  %v3766_v17 = vpop.eup %3765  ;;  %3775 = vpow2.f32 %v1337_v7  ;;  %v1298_v18 = vmul.f32 -10.0, %v1266_v8  ;;  %v1297_v19 = vmul.f32 -10.0, %v1265_v9  ;;  %v1236_v20 = vsub.f32 %v1125_v14, %v4521_v11 }
 0x10d   : > { %3777 = vpow2.f32 %v1335_v13  ;;  %v1235_v21 = vsub.f32 %v1120_v15, %v4521_v11  ;;  %v1383_v22 = vpack.c.bf16 %v3764_v10, %v3766_v17 }
 0x10e   : > { %v3768_v23 = vpop.eup %3767  ;;  %v1341_v24 = vmul.f32 1.442695, %v1298_v18  ;;  %v1339_v25 = vmul.f32 1.442695, %v1297_v19  ;;  %v1268_v26 = vmul.f32 %v1236_v20, %v1236_v20 }
 0x10f   : > { %v3770_v27 = vpop.eup %3769  ;;  %v1267_v28 = vmul.f32 %v1235_v21, %v1235_v21  ;;  %3410 = vmatprep.mubr.bf16.mxu1 %v1383_v22  ;;  %v1135_v29 = vpop.permute.xlu1 %1134 }
 0x110   : > { %v1130_v30 = vpop.permute.xlu0 %1129  ;;  %3779 = vpow2.f32 %v1341_v24  ;;  %v1300_v31 = vmul.f32 -10.0, %v1268_v26  ;;  %3411 = vmatmul.mubr.bf16.vlgmr.msra.gmra.mrb[0].mxu1 %v1384_v16  ;;  %v1238_v32 = vsub.f32 %v1135_v29, %v4521_v11  ;;  %v1385_v35 = vpack.c.bf16 %v3768_v23, %v3770_v27 }
 0x111   : > { %v1237_v33 = vsub.f32 %v1130_v30, %v4521_v11  ;;  %3781 = vpow2.f32 %v1339_v25  ;;  %v1299_v34 = vmul.f32 -10.0, %v1267_v28 }
 0x112   : > { %v3772_v36 = vpop.eup %3771  ;;  %v1345_v37 = vmul.f32 1.442695, %v1300_v31  ;;  %v1270_v38 = vmul.f32 %v1238_v32, %v1238_v32  ;;  %3414 = vmatprep.mubr.bf16.mxu1 %v1385_v35 }
 0x113   : > { %v1269_v39 = vmul.f32 %v1237_v33, %v1237_v33  ;;  %v3774_v40 = vpop.eup %3773  ;;  %v1343_v41 = vmul.f32 1.442695, %v1299_v34  ;;  %v1145_v42 = vpop.permute.xlu1 %1144 }
 0x114   : > { %v1140_v43 = vpop.permute.xlu0 %1139  ;;  %3783 = vpow2.f32 %v1345_v37  ;;  %v1302_v44 = vmul.f32 -10.0, %v1270_v38  ;;  %v1240_v46 = vsub.f32 %v1145_v42, %v4521_v11  ;;  %v1386_v48 = vpack.c.bf16 %v3772_v36, %v3774_v40 }
 0x115   : > { %v1301_v45 = vmul.f32 -10.0, %v1269_v39  ;;  %3785 = vpow2.f32 %v1343_v41  ;;  %v1239_v47 = vsub.f32 %v1140_v43, %v4521_v11 }
 0x116   : > { %v3776_v49 = vpop.eup %3775  ;;  %v1349_v50 = vmul.f32 1.442695, %v1302_v44  ;;  %v1272_v52 = vmul.f32 %v1240_v46, %v1240_v46 }
 0x117   : > { %v1347_v51 = vmul.f32 1.442695, %v1301_v45  ;;  %v3778_v53 = vpop.eup %3777  ;;  %v1271_v54 = vmul.f32 %v1239_v47, %v1239_v47  ;;  %v1155_v55 = vpop.permute.xlu1 %1154 }
 0x118   : > { %v1150_v56 = vpop.permute.xlu0 %1149  ;;  %3787 = vpow2.f32 %v1349_v50  ;;  %v1304_v57 = vmul.f32 -10.0, %v1272_v52  ;;  %3415 = vmatmul.mubr.bf16.gmra.mrb[4].mxu1 %v1386_v48  ;;  %v1242_v58 = vsub.f32 %v1155_v55, %v4521_v11  ;;  %v1387_v61 = vpack.c.bf16 %v3776_v49, %v3778_v53 }
 0x119   : > { %v1241_v59 = vsub.f32 %v1150_v56, %v4521_v11  ;;  %3789 = vpow2.f32 %v1347_v51  ;;  %v1303_v60 = vmul.f32 -10.0, %v1271_v54 }
 0x11a   : > { %v3780_v62 = vpop.eup %3779  ;;  %v1353_v63 = vmul.f32 1.442695, %v1304_v57  ;;  %v1274_v0 = vmul.f32 %v1242_v58, %v1242_v58  ;;  %3418 = vmatprep.mubr.bf16.mxu1 %v1387_v61 }
 0x11b   : > { %v1273_v1 = vmul.f32 %v1241_v59, %v1241_v59  ;;  %v3782_v2 = vpop.eup %3781  ;;  %v1351_v3 = vmul.f32 1.442695, %v1303_v60  ;;  %v1165_v4 = vpop.permute.xlu1 %1164 }
 0x11c   : > { %v1160_v5 = vpop.permute.xlu0 %1159  ;;  %3791 = vpow2.f32 %v1353_v63  ;;  %v1306_v6 = vmul.f32 -10.0, %v1274_v0  ;;  %v1244_v8 = vsub.f32 %v1165_v4, %v4521_v11  ;;  %v1388_v10 = vpack.c.bf16 %v3780_v62, %v3782_v2 }
 0x11d   : > { %v1305_v7 = vmul.f32 -10.0, %v1273_v1  ;;  %3793 = vpow2.f32 %v1351_v3  ;;  %v1243_v9 = vsub.f32 %v1160_v5, %v4521_v11 }
 0x11e   : > { %v3784_v13 = vpop.eup %3783  ;;  %v1357_v14 = vmul.f32 1.442695, %v1306_v6  ;;  %v1276_v16 = vmul.f32 %v1244_v8, %v1244_v8 }
 0x11f   : > { %v1355_v15 = vmul.f32 1.442695, %v1305_v7  ;;  %v3786_v17 = vpop.eup %3785  ;;  %v1275_v18 = vmul.f32 %v1243_v9, %v1243_v9  ;;  %v1175_v19 = vpop.permute.xlu1 %1174 }
 0x120   : > { %v1170_v20 = vpop.permute.xlu0 %1169  ;;  %3795 = vpow2.f32 %v1357_v14  ;;  %v1308_v21 = vmul.f32 -10.0, %v1276_v16  ;;  %3419 = vmatmul.mubr.bf16.gmra.mrb[8].mxu1 %v1388_v10  ;;  %v1246_v22 = vsub.f32 %v1175_v19, %v4521_v11  ;;  %v1389_v25 = vpack.c.bf16 %v3784_v13, %v3786_v17 }
 0x121   : > { %v1245_v23 = vsub.f32 %v1170_v20, %v4521_v11  ;;  %3797 = vpow2.f32 %v1355_v15  ;;  %v1307_v24 = vmul.f32 -10.0, %v1275_v18 }
 0x122   : > { %v3788_v26 = vpop.eup %3787  ;;  %v1361_v27 = vmul.f32 1.442695, %v1308_v21  ;;  %v1278_v28 = vmul.f32 %v1246_v22, %v1246_v22  ;;  %3422 = vmatprep.mubr.bf16.mxu1 %v1389_v25 }
 0x123   : > { %v1277_v29 = vmul.f32 %v1245_v23, %v1245_v23  ;;  %v3790_v30 = vpop.eup %3789  ;;  %v1359_v31 = vmul.f32 1.442695, %v1307_v24  ;;  %v1185_v32 = vpop.permute.xlu1 %1184 }
 0x124   : > { %v1180_v33 = vpop.permute.xlu0 %1179  ;;  %3799 = vpow2.f32 %v1361_v27  ;;  %v1310_v34 = vmul.f32 -10.0, %v1278_v28  ;;  %v1248_v36 = vsub.f32 %v1185_v32, %v4521_v11  ;;  %v1390_v38 = vpack.c.bf16 %v3788_v26, %v3790_v30 }
 0x125   : > { %v1309_v35 = vmul.f32 -10.0, %v1277_v29  ;;  %3801 = vpow2.f32 %v1359_v31  ;;  %v1247_v37 = vsub.f32 %v1180_v33, %v4521_v11 }
 0x126   : > { %v3792_v39 = vpop.eup %3791  ;;  %v1365_v40 = vmul.f32 1.442695, %v1310_v34  ;;  %v1280_v42 = vmul.f32 %v1248_v36, %v1248_v36 }
 0x127   : > { %v1363_v41 = vmul.f32 1.442695, %v1309_v35  ;;  %v3794_v43 = vpop.eup %3793  ;;  %v1279_v44 = vmul.f32 %v1247_v37, %v1247_v37  ;;  %v1195_v45 = vpop.permute.xlu1 %1194 }
 0x128   : > { %v1190_v46 = vpop.permute.xlu0 %1189  ;;  %3803 = vpow2.f32 %v1365_v40  ;;  %v1312_v47 = vmul.f32 -10.0, %v1280_v42  ;;  %3423 = vmatmul.mubr.bf16.gmra.mrb[12].mxu1 %v1390_v38  ;;  %v1250_v48 = vsub.f32 %v1195_v45, %v4521_v11  ;;  %v1391_v51 = vpack.c.bf16 %v3792_v39, %v3794_v43  ;;  %v3748_v38 = vld [vmem:[%s5587_s5 + $0x28] sm:$0xff]   ;;  %v3749_v39 = vld [vmem:[%s5587_s5 + $0x30] sm:$0xff]   ;;  %v3750_v40 = vld [vmem:[%s5587_s5 + $0x38] sm:$0xff]  }
 0x129   : > { %v1249_v49 = vsub.f32 %v1190_v46, %v4521_v11  ;;  %3805 = vpow2.f32 %v1363_v41  ;;  %v1311_v50 = vmul.f32 -10.0, %v1279_v44  ;;  %3385 = vmatpush3.bf16.msra.mxu0 %v3748_v38  ;;  %v3751_v41 = vld [vmem:[%s5591_s9] sm:$0xff]   ;;  %v910_v43 = vld [vmem:[%s4418_s21 + $0x8] sm:$0xff]  ;;  %v3753_v46 = vld [vmem:[%s5591_s9 + $0x10] sm:$0xff]  }
 0x12a   : > { %v3796_v52 = vpop.eup %3795  ;;  %v1369_v53 = vmul.f32 1.442695, %v1312_v47  ;;  %v1282_v54 = vmul.f32 %v1250_v48, %v1250_v48  ;;  %3426 = vmatprep.mubr.bf16.mxu1 %v1391_v51  ;;  %3386 = vmatprep.subr.bf16.mxu0 %v4074_v12  ;;  %v909_v42 = vld [vmem:[%s4418_s21] sm:$0xff]  ;;  %v3752_v45 = vld [vmem:[%s5591_s9 + $0x8] sm:$0xff]   ;;  %s5696_s21 = sld [smem:[#allocation19_spill]] (!%p3268_p6) }
 0x12b   : > { %v1281_v55 = vmul.f32 %v1249_v49, %v1249_v49  ;;  %v3798_v56 = vpop.eup %3797  ;;  %v1367_v57 = vmul.f32 1.442695, %v1311_v50  ;;  %v1205_v58 = vpop.permute.xlu1 %1204  ;;  %v911_v44 = vpack.c.bf16 %v910_v43, %v909_v42  ;;  %3624 = vmatprep.subr.bf16.mxu1 %v3751_v41  ;;  %v3755_v47 = vld [vmem:[%s5591_s9 + $0x20] sm:$0xff]   ;;  %v3756_v48 = vld [vmem:[%s5591_s9 + $0x28] sm:$0xff]   ;;  %v3757_v49 = vld [vmem:[%s5591_s9 + $0x30] sm:$0xff]  }
 0x12c   : > { %v1200_v59 = vpop.permute.xlu0 %1199  ;;  %3807 = vpow2.f32 %v1369_v53  ;;  %v1314_v60 = vmul.f32 -10.0, %v1282_v54  ;;  %v1252_v62 = vsub.f32 %v1205_v58, %v4521_v11  ;;  %v1392_v0 = vpack.c.bf16 %v3796_v52, %v3798_v56  ;;  %3632 = vmatpush3.bf16.msra.mxu1 %v3751_v41  ;;  %v3758_v50 = vld [vmem:[%s5591_s9 + $0x38] sm:$0xff]   ;;  %v4614_v51 = vld [vmem:[%s5590_s8] ss:$0 sm:$0xff] }
 0x12d   : > { %v1313_v61 = vmul.f32 -10.0, %v1281_v55  ;;  %3809 = vpow2.f32 %v1367_v57  ;;  %v1251_v63 = vsub.f32 %v1200_v59, %v4521_v11  ;;  %3387 = vmatpush3.bf16.msra.mxu0 %v3749_v39  ;;  %3625 = vmatprep.subr.bf16.mxu1 %v3752_v45 }
 0x12e   : > { %v3800_v1 = vpop.eup %3799  ;;  %v1373_v2 = vmul.f32 1.442695, %v1314_v60  ;;  %v1284_v4 = vmul.f32 %v1252_v62, %v1252_v62  ;;  %3388 = vmatprep.subr.bf16.mxu0 %v4074_v12  ;;  %v3754_v12 = vld [vmem:[%s5591_s9 + $0x18] sm:$0xff]  }
 0x12f   : > { %v1371_v3 = vmul.f32 1.442695, %v1313_v61  ;;  %v3802_v5 = vpop.eup %3801  ;;  %v1283_v6 = vmul.f32 %v1251_v63, %v1251_v63  ;;  %v1215_v7 = vpop.permute.xlu1 %1214 }
 0x130   : > { %v1210_v8 = vpop.permute.xlu0 %1209  ;;  %3811 = vpow2.f32 %v1373_v2  ;;  %v1316_v9 = vmul.f32 -10.0, %v1284_v4  ;;  %3427 = vmatmul.mubr.bf16.gmra.mrb[16].mxu1 %v1392_v0  ;;  %v1254_v10 = vsub.f32 %v1215_v7, %v4521_v11  ;;  %v1393_v15 = vpack.c.bf16 %v3800_v1, %v3802_v5 }
 0x131   : > { %v1253_v13 = vsub.f32 %v1210_v8, %v4521_v11  ;;  %3813 = vpow2.f32 %v1371_v3  ;;  %v1315_v14 = vmul.f32 -10.0, %v1283_v6  ;;  %3389 = vmatpush3.bf16.msra.mxu0 %v3750_v40  ;;  %3633 = vmatpush3.bf16.msra.mxu1 %v3752_v45 }
 0x132   : > { %v3804_v16 = vpop.eup %3803  ;;  %v1377_v17 = vmul.f32 1.442695, %v1316_v9  ;;  %v1286_v18 = vmul.f32 %v1254_v10, %v1254_v10  ;;  %3430 = vmatprep.mubr.bf16.mxu1 %v1393_v15  ;;  %3442 = vmatprep.subr.bf16.mxu0 %v3751_v41 }
 0x133   : > { %v1285_v19 = vmul.f32 %v1253_v13, %v1253_v13  ;;  %v3806_v20 = vpop.eup %3805  ;;  %v1375_v21 = vmul.f32 1.442695, %v1315_v14  ;;  %3626 = vmatprep.subr.bf16.mxu1 %v3753_v46 }
 0x134   : > { %3815 = vpow2.f32 %v1377_v17  ;;  %v1318_v22 = vmul.f32 -10.0, %v1286_v18  ;;  %v1394_v24 = vpack.c.bf16 %v3804_v16, %v3806_v20  ;;  %3391 = vmatmul.mubr.bf16.vlgmr.msra.gmra.mrb[0].mxu0 %v911_v44 }
 0x135   : > { %v1317_v23 = vmul.f32 -10.0, %v1285_v19  ;;  %3817 = vpow2.f32 %v1375_v21  ;;  %3443 = vmatpush3.bf16.msra.mxu0 %v3751_v41  ;;  %3634 = vmatpush3.bf16.msra.mxu1 %v3753_v46 }
 0x136   : > { %v3808_v25 = vpop.eup %3807  ;;  %v1381_v26 = vmul.f32 1.442695, %v1318_v22  ;;  %3444 = vmatprep.subr.bf16.mxu0 %v3752_v45  ;;  %3627 = vmatprep.subr.bf16.mxu1 %v3754_v12 }
 0x137   : > { %v1379_v27 = vmul.f32 1.442695, %v1317_v23  ;;  %v3810_v28 = vpop.eup %3809 }
 0x138   : > { %3819 = vpow2.f32 %v1381_v26  ;;  %3431 = vmatmul.mubr.bf16.gmra.mrb[20].mxu1 %v1394_v24  ;;  %v1395_v11 = vpack.c.bf16 %v3808_v25, %v3810_v28 }
 0x139   : > { %3821 = vpow2.f32 %v1379_v27  ;;  %3445 = vmatpush3.bf16.msra.mxu0 %v3752_v45  ;;  %3635 = vmatpush3.bf16.msra.mxu1 %v3754_v12 }
 0x13a   : > { %v3812_v29 = vpop.eup %3811  ;;  %3434 = vmatprep.mubr.bf16.mxu1 %v1395_v11  ;;  %3446 = vmatprep.subr.bf16.mxu0 %v3753_v46 }
 0x13b   : > { %v3814_v30 = vpop.eup %3813  ;;  %3628 = vmatprep.subr.bf16.mxu1 %v3755_v47 }
 0x13c   : > { %v1396_v31 = vpack.c.bf16 %v3812_v29, %v3814_v30 }
 0x13d   : > { %3447 = vmatpush3.bf16.msra.mxu0 %v3753_v46  ;;  %3636 = vmatpush3.bf16.msra.mxu1 %v3755_v47 }
 0x13e   : > { %v3816_v32 = vpop.eup %3815  ;;  %3448 = vmatprep.subr.bf16.mxu0 %v3754_v12  ;;  %3629 = vmatprep.subr.bf16.mxu1 %v3756_v48 }
 0x13f   : > { %v3818_v33 = vpop.eup %3817 }
 0x140   : > { %3435 = vmatmul.mubr.bf16.gmra.mrb[24].mxu1 %v1396_v31  ;;  %v1397_v34 = vpack.c.bf16 %v3816_v32, %v3818_v33 }
 0x141   : > { %3449 = vmatpush3.bf16.msra.mxu0 %v3754_v12  ;;  %3637 = vmatpush3.bf16.msra.mxu1 %v3756_v48 }
 0x142   : > { %v3820_v35 = vpop.eup %3819  ;;  %3438 = vmatprep.mubr.bf16.mxu1 %v1397_v34  ;;  %3450 = vmatprep.subr.bf16.mxu0 %v3755_v47 }
 0x143   : > { %v3822_v36 = vpop.eup %3821  ;;  %3630 = vmatprep.subr.bf16.mxu1 %v3757_v49 }
 0x144   : > { %v1398_v37 = vpack.c.bf16 %v3820_v35, %v3822_v36 }
 0x145   : > { %3451 = vmatpush3.bf16.msra.mxu0 %v3755_v47  ;;  %3638 = vmatpush3.bf16.msra.mxu1 %v3757_v49 }
 0x146   : > { %3452 = vmatprep.subr.bf16.mxu0 %v3756_v48  ;;  %3631 = vmatprep.subr.bf16.mxu1 %v3758_v50 }
 0x148   : > { %3439 = vmatmul.mubr.bf16.gmra.mrb[28].mxu1 %v1398_v37 }
 0x149   : > { %3453 = vmatpush3.bf16.msra.mxu0 %v3756_v48  ;;  %3639 = vmatpush3.bf16.msra.mxu1 %v3758_v50 }
 0x14a   : > { %3454 = vmatprep.subr.bf16.mxu0 %v3757_v49 }
 0x14d   : > { %3455 = vmatpush3.bf16.msra.mxu0 %v3757_v49 }
 0x14e   : > { %3456 = vmatprep.subr.bf16.mxu0 %v3758_v50 }
 0x151   : > { %3457 = vmatpush3.bf16.msra.mxu0 %v3758_v50 }
 0x1e3   : > { %v3412_v52 = vpop.f32.mrb[0].mxu1 }
 0x1e4   : > { %v4617_v53 = vadd.f32 %v3412_v52, %v4614_v51  ;;  %v1504_v54 = vpop.f32.mrb[1].mxu1 }
 0x1e5   : > { %v4620_v55 = vadd.f32 %v4614_v51, %v1504_v54  ;;  %v3413_v56 = vpop.f32.mrb[2].mxu1 }
 0x1e6   : > { %v1665_v57 = vand.u32 2147483647, %v4617_v53  ;;  %v4624_v58 = vadd.f32 %v3413_v56, %v4614_v51  ;;  %v1507_v59 = vpop.f32.mrb[3].mxu1  ;;  %v1633_v46 = vmax.f32 %v4617_v53, 0.0 }
 0x1e7   : > { %v1663_v60 = vand.u32 2147483647, %v4620_v55  ;;  %v4628_v61 = vadd.f32 %v4614_v51, %v1507_v59  ;;  %v1631_v12 = vmax.f32 %v4620_v55, 0.0 }
 0x1e8   : > { %v1697_v62 = vsub.f32 0.0, %v1665_v57  ;;  %v1666_v63 = vand.u32 2147483647, %v4624_v58  ;;  %v1634_v49 = vmax.f32 %v4624_v58, 0.0 }
 0x1e9   : > { %v1695_v0 = vsub.f32 0.0, %v1663_v60  ;;  %v1664_v1 = vand.u32 2147483647, %v4628_v61  ;;  %v1632_v59 = vmax.f32 %v4628_v61, 0.0 }
 0x1ea   : > { %v1731_v2 = vmul.f32 1.442695, %v1697_v62  ;;  %v1698_v3 = vsub.f32 0.0, %v1666_v63 }
 0x1eb   : > { %v1727_v4 = vmul.f32 1.442695, %v1695_v0  ;;  %v1696_v5 = vsub.f32 0.0, %v1664_v1  ;;  %v3416_v6 = vpop.f32.mrb[4].mxu1 }
 0x1ec   : > { %3823 = vpow2.f32 %v1731_v2  ;;  %v1733_v7 = vmul.f32 1.442695, %v1698_v3  ;;  %v4633_v8 = vadd.f32 %v3416_v6, %v4614_v51  ;;  %v1520_v9 = vpop.f32.mrb[5].mxu1 }
 0x1ed   : > { %3825 = vpow2.f32 %v1727_v4  ;;  %v1729_v10 = vmul.f32 1.442695, %v1696_v5  ;;  %v4636_v13 = vadd.f32 %v4614_v51, %v1520_v9  ;;  %v3417_v14 = vpop.f32.mrb[6].mxu1 }
 0x1ee   : > { %3827 = vpow2.f32 %v1733_v7  ;;  %v1669_v15 = vand.u32 2147483647, %v4633_v8  ;;  %v4640_v16 = vadd.f32 %v3417_v14, %v4614_v51  ;;  %v1523_v17 = vpop.f32.mrb[7].mxu1  ;;  %v1637_v60 = vmax.f32 %v4633_v8, 0.0 }
 0x1ef   : > { %3829 = vpow2.f32 %v1729_v10  ;;  %v1667_v18 = vand.u32 2147483647, %v4636_v13  ;;  %v4644_v19 = vadd.f32 %v4614_v51, %v1523_v17  ;;  %v1635_v6 = vmax.f32 %v4636_v13, 0.0 }
 0x1f0   : > { %v1701_v20 = vsub.f32 0.0, %v1669_v15  ;;  %v1670_v21 = vand.u32 2147483647, %v4640_v16  ;;  %v1638_v7 = vmax.f32 %v4640_v16, 0.0 }
 0x1f1   : > { %v1699_v22 = vsub.f32 0.0, %v1667_v18  ;;  %v1668_v23 = vand.u32 2147483647, %v4644_v19  ;;  %v1636_v15 = vmax.f32 %v4644_v19, 0.0 }
 0x1f2   : > { %v1739_v24 = vmul.f32 1.442695, %v1701_v20  ;;  %v1702_v25 = vsub.f32 0.0, %v1670_v21 }
 0x1f3   : > { %v1735_v26 = vmul.f32 1.442695, %v1699_v22  ;;  %v1700_v27 = vsub.f32 0.0, %v1668_v23  ;;  %v3420_v28 = vpop.f32.mrb[8].mxu1 }
 0x1f4   : > { %3831 = vpow2.f32 %v1739_v24  ;;  %v1741_v11 = vmul.f32 1.442695, %v1702_v25  ;;  %v4649_v29 = vadd.f32 %v3420_v28, %v4614_v51  ;;  %v1536_v30 = vpop.f32.mrb[9].mxu1 }
 0x1f5   : > { %3833 = vpow2.f32 %v1735_v26  ;;  %v1737_v31 = vmul.f32 1.442695, %v1700_v27  ;;  %v3421_v32 = vpop.f32.mrb[10].mxu1  ;;  %v4671_v53 = vadd.f32 %v4614_v51, %v1536_v30 }
 0x1f6   : > { %v3824_v33 = vpop.eup %3823  ;;  %3835 = vpow2.f32 %v1741_v11  ;;  %v1673_v34 = vand.u32 2147483647, %v4649_v29  ;;  %v4652_v35 = vpop.f32.mrb[11].mxu1  ;;  %v1641_v20 = vmax.f32 %v4649_v29, 0.0  ;;  %v4693_v21 = vadd.f32 %v3421_v32, %v4614_v51 }
 0x1f7   : > { %v3826_v36 = vpop.eup %3825  ;;  %v1809_v37 = vadd.f32 1.0, %v3824_v33  ;;  %3837 = vpow2.f32 %v1737_v31  ;;  %v1812_v43 = vmul.f32 -0.5, %v3824_v33  ;;  %v1815_v57 = vand.u32 2147483647, %v3824_v33 }
 0x1f8   : > { %v3828_v38 = vpop.eup %3827  ;;  %v1791_v39 = vadd.f32 1.0, %v3826_v36  ;;  %v1705_v42 = vsub.f32 0.0, %v1673_v34  ;;  %v1794_v47 = vmul.f32 -0.5, %v3826_v36  ;;  %v1797_v1 = vand.u32 2147483647, %v3826_v36 }
 0x1f9   : > { %v4654_v40 = vpop.eup %3829  ;;  %3839 = vlog2.f32 %v1809_v37  ;;  %v1818_v41 = vadd.f32 1.0, %v3828_v38  ;;  %v1821_v50 = vmul.f32 -0.5, %v3828_v38  ;;  %v1813_v0 = vadd.f32 1.0, %v1812_v43 }
 0x1fa   : > { %3841 = vlog2.f32 %v1791_v39  ;;  %v1800_v44 = vadd.f32 1.0, %v4654_v40  ;;  %v1747_v52 = vmul.f32 1.442695, %v1705_v42  ;;  %v1795_v4 = vadd.f32 1.0, %v1794_v47 }
 0x1fb   : > { %3843 = vlog2.f32 %v1818_v41  ;;  %v4657_v45 = vpop.f32.mrb[12].mxu1  ;;  %v1824_v5 = vand.u32 2147483647, %v3828_v38  ;;  %v1822_v9 = vadd.f32 1.0, %v1821_v50  ;;  %v1803_v10 = vmul.f32 -0.5, %v4654_v40 }
 0x1fc   : > { %v4661_v48 = vpop.f32.mrb[13].mxu1  ;;  %3845 = vlog2.f32 %v1800_v44  ;;  %vm4687_vm1 = vcmp.lt.f32.partialorder %v1815_v57, 0.0004427343  ;;  %v1814_v23 = vmul.f32 %v3824_v33, %v1813_v0  ;;  %vm4695_vm2 = vcmp.lt.f32.partialorder %v1797_v1, 0.0004427343 }
 0x1fd   : > { %v4664_v54 = vpop.f32.mrb[14].mxu1  ;;  %3847 = vpow2.f32 %v1747_v52  ;;  %v1806_v25 = vand.u32 2147483647, %v4654_v40  ;;  %v1671_v27 = vand.u32 2147483647, %v4671_v53  ;;  %v1796_v31 = vmul.f32 %v3826_v36, %v1795_v4 }
 0x1fe   : > { %v4666_v56 = vpop.eup %3831  ;;  %v4673_v62 = vpop.f32.mrb[15].mxu1  ;;  %vm4704_vm3 = vcmp.lt.f32.partialorder %v1824_v5, 0.0004427343  ;;  %v1639_v33 = vmax.f32 %v4671_v53, 0.0  ;;  %v1823_v39 = vmul.f32 %v3828_v38, %v1822_v9  ;;  %v1804_v41 = vadd.f32 1.0, %v1803_v10 }
 0x1ff   : > { %v4675_v63 = vpop.eup %3833  ;;  %v1845_v2 = vadd.f32 1.0, %v4666_v56  ;;  %v1848_v42 = vmul.f32 -0.5, %v4666_v56  ;;  %v1851_v36 = vand.u32 2147483647, %v4666_v56  ;;  %vm4718_vm4 = vcmp.lt.f32.partialorder %v1806_v25, 0.0004427343 }
 0x200   : > { %v4678_v3 = vpop.eup %3835  ;;  %v1827_v14 = vadd.f32 1.0, %v4675_v63  ;;  %v1703_v38 = vsub.f32 0.0, %v1671_v27  ;;  %v1830_v5 = vmul.f32 -0.5, %v4675_v63  ;;  %v1833_v9 = vand.u32 2147483647, %v4675_v63 }
 0x201   : > { %v4685_v17 = vpop.eup %3837  ;;  %3849 = vlog2.f32 %v1845_v2  ;;  %v1854_v26 = vadd.f32 1.0, %v4678_v3  ;;  %v1857_v18 = vmul.f32 -0.5, %v4678_v3  ;;  %vm4733_vm5 = vcmp.lt.f32.partialorder %v1851_v36, 0.0004427343 }
 0x202   : > { %3851 = vlog2.f32 %v1827_v14  ;;  %v1836_v47 = vadd.f32 1.0, %v4685_v17  ;;  %v1849_v14 = vadd.f32 1.0, %v1848_v42  ;;  %v1674_v42 = vand.u32 2147483647, %v4693_v21 }
 0x203   : > { %v3840_v22 = vpop.eup %3839  ;;  %v4702_v28 = vpop.f32.mrb[16].mxu1  ;;  %3853 = vlog2.f32 %v1854_v26  ;;  %v1839_v26 = vmul.f32 -0.5, %v4685_v17  ;;  %vm4754_vm6 = vcmp.lt.f32.partialorder %v1833_v9, 0.0004427343  ;;  %v1860_v24 = vand.u32 2147483647, %v4678_v3 }
 0x204   : > { %v3842_v11 = vpop.eup %3841  ;;  %v1811_v30 = vmul.f32 0.6931472, %v3840_v22  ;;  %v4709_v34 = vpop.f32.mrb[17].mxu1  ;;  %v1743_v22 = vmul.f32 1.442695, %v1703_v38  ;;  %3855 = vlog2.f32 %v1836_v47  ;;  %v1850_v36 = vmul.f32 %v4666_v56, %v1849_v14 }
 0x205   : > { %v3844_v37 = vpop.eup %3843  ;;  %v4716_v50 = vpop.f32.mrb[18].mxu1  ;;  %v1793_v2 = vmul.f32 0.6931472, %v3842_v11  ;;  %v1840_v47 = vadd.f32 1.0, %v1839_v26  ;;  %v4772_v9 = vadd.f32 %v4657_v45, %v4614_v51  ;;  %vm4781_vm7 = vcmp.lt.f32.partialorder %v1860_v24, 0.0004427343 }
 0x206   : > { %v1817_v43 = vsel %vm4687_vm1, %v1814_v23, %v1811_v30  ;;  %v1820_v44 = vmul.f32 0.6931472, %v3844_v37  ;;  %v3846_v52 = vpop.eup %3845  ;;  %v4722_v1 = vpop.f32.mrb[19].mxu1  ;;  %v1805_v30 = vmul.f32 %v4654_v40, %v1804_v41  ;;  %3857 = vpow2.f32 %v1743_v22 }
 0x207   : > { %v2081_v57 = vadd.f32 %v1817_v43, %v1633_v46  ;;  %v4728_v10 = vpop.eup %3847  ;;  %v1802_v23 = vmul.f32 0.6931472, %v3846_v52  ;;  %v1799_v32 = vsel %vm4695_vm2, %v1796_v31, %v1793_v2  ;;  %v1831_v37 = vadd.f32 1.0, %v1830_v5 }
 0x208   : > { %v1826_v4 = vsel %vm4704_vm3, %v1823_v39, %v1820_v44  ;;  %v1881_v39 = vadd.f32 1.0, %v4728_v10  ;;  %v1858_v41 = vadd.f32 1.0, %v1857_v18  ;;  %v1842_v52 = vand.u32 2147483647, %v4685_v17 }
 0x209   : > { %v2082_v46 = vadd.f32 %v1826_v4, %v1634_v49  ;;  %v4738_v27 = vadd.f32 -0.6931472, %v2081_v57  ;;  %v1808_v31 = vsel %vm4718_vm4, %v1805_v30, %v1802_v23  ;;  %v1706_v57 = vsub.f32 0.0, %v1674_v42 }
 0x20a   : > { %v2079_v56 = vadd.f32 %v1799_v32, %v1631_v12  ;;  %v4768_v5 = vadd.f32 %v4614_v51, %v4652_v35  ;;  %3859 = vlog2.f32 %v1881_v39  ;;  %v1884_v14 = vmul.f32 -0.5, %v4728_v10 }
 0x20b   : > { %v4740_v11 = vadd.f32 -0.6931472, %v2082_v46  ;;  %v4743_v58 = vpop.f32.mrb[20].mxu1  ;;  %v3850_v49 = vpop.eup %3849  ;;  %v1832_v46 = vmul.f32 %v4675_v63, %v1831_v37  ;;  %v1749_v18 = vmul.f32 1.442695, %v1706_v57  ;;  %v2080_v55 = vadd.f32 %v1808_v31, %v1632_v59 }
 0x20c   : > { %v4749_v43 = vpop.f32.mrb[21].mxu1  ;;  %v3852_v2 = vpop.eup %3851  ;;  %v1847_v4 = vmul.f32 0.6931472, %v3850_v49  ;;  %v1859_v12 = vmul.f32 %v4678_v3, %v1858_v41  ;;  %v1672_v45 = vand.u32 2147483647, %v4768_v5  ;;  %v1841_v26 = vmul.f32 %v4685_v17, %v1840_v47 }
 0x20d   : > { %v4762_v38 = vpop.f32.mrb[22].mxu1  ;;  %v3854_v22 = vpop.eup %3853  ;;  %v1829_v23 = vmul.f32 0.6931472, %v3852_v2  ;;  %v1642_v63 = vmax.f32 %v4693_v21, 0.0  ;;  %3861 = vpow2.f32 %v1749_v18  ;;  %v4788_v30 = vadd.f32 -0.6931472, %v2079_v56 }
 0x20e   : > { %v4774_v0 = vpop.f32.mrb[23].mxu1  ;;  %v1853_v61 = vsel %vm4733_vm5, %v1850_v36, %v1847_v4  ;;  %vm4792_vm8 = vcmp.lt.f32.partialorder %v1842_v52, 0.0004427343  ;;  %v1704_v3 = vsub.f32 0.0, %v1672_v45  ;;  %v1677_v49 = vand.u32 2147483647, %v4772_v9  ;;  %v3856_v37 = vpop.eup %3855 }
 0x20f   : > { %v1856_v39 = vmul.f32 0.6931472, %v3854_v22  ;;  %v1885_v17 = vadd.f32 1.0, %v1884_v14  ;;  %v1887_v42 = vand.u32 2147483647, %v4728_v10  ;;  %v4802_v41 = vadd.f32 %v4614_v51, %v4661_v48 }
 0x210   : > { %v4806_v36 = vpop.eup %3857  ;;  %v4808_v24 = vadd.f32 -0.6931472, %v2080_v55  ;;  %v1745_v31 = vmul.f32 1.442695, %v1704_v3  ;;  %v1709_v47 = vsub.f32 0.0, %v1677_v49  ;;  %v4812_v52 = vadd.f32 %v4664_v54, %v4614_v51 }
 0x211   : > { %v2085_v2 = vadd.f32 %v1853_v61, %v1637_v60  ;;  %v1835_v48 = vsel %vm4754_vm6, %v1832_v46, %v1829_v23  ;;  %v1863_v56 = vadd.f32 1.0, %v4806_v36  ;;  %v4823_v4 = vadd.f32 %v4614_v51, %v4673_v62 }
 0x212   : > { %3863 = vpow2.f32 %v1745_v31  ;;  %v1755_v18 = vmul.f32 1.442695, %v1709_v47  ;;  %v1675_v54 = vand.u32 2147483647, %v4802_v41  ;;  %v4830_v22 = vadd.f32 %v4702_v28, %v4614_v51 }
 0x213   : > { %v4797_v32 = vpop.f32.mrb[24].mxu1  ;;  %v1862_v8 = vsel %vm4781_vm7, %v1859_v12, %v1856_v39  ;;  %v1838_v60 = vmul.f32 0.6931472, %v3856_v37  ;;  %3865 = vlog2.f32 %v1863_v56  ;;  %v4836_v40 = vadd.f32 %v4614_v51, %v4709_v34 }
 0x214   : > { %v4804_v25 = vpop.f32.mrb[25].mxu1  ;;  %v2083_v62 = vadd.f32 %v1835_v48, %v1635_v6  ;;  %3867 = vpow2.f32 %v1755_v18  ;;  %v1707_v46 = vsub.f32 0.0, %v1675_v54  ;;  %v1678_v55 = vand.u32 2147483647, %v4812_v52  ;;  %v3860_v45 = vpop.eup %3859 }
 0x215   : > { %v4814_v57 = vpop.f32.mrb[26].mxu1  ;;  %v4841_v23 = vadd.f32 -0.6931472, %v2085_v2  ;;  %v1886_v28 = vmul.f32 %v4728_v10, %v1885_v17  ;;  %vm4844_vm9 = vcmp.lt.f32.partialorder %v1887_v42, 0.0004427343  ;;  %v2086_v34 = vadd.f32 %v1862_v8, %v1638_v7 }
 0x216   : > { %v4825_v14 = vpop.f32.mrb[27].mxu1  ;;  %v1676_v35 = vand.u32 2147483647, %v4823_v4  ;;  %v1751_v13 = vmul.f32 1.442695, %v1707_v46  ;;  %v1710_v6 = vsub.f32 0.0, %v1678_v55  ;;  %v1844_v49 = vsel %vm4792_vm8, %v1841_v26, %v1838_v60 }
 0x217   : > { %v1681_v61 = vand.u32 2147483647, %v4830_v22  ;;  %v4852_v3 = vpop.eup %3861  ;;  %v1640_v10 = vmax.f32 %v4768_v5, 0.0  ;;  %v1679_v39 = vand.u32 2147483647, %v4836_v40  ;;  %v2084_v26 = vadd.f32 %v1844_v49, %v1636_v15 }
 0x218   : > { %v1708_v37 = vsub.f32 0.0, %v1676_v35  ;;  %v4858_v17 = vadd.f32 -0.6931472, %v2083_v62  ;;  %v1883_v42 = vmul.f32 0.6931472, %v3860_v45  ;;  %v1890_v16 = vadd.f32 1.0, %v4852_v3 }
 0x219   : > { %3869 = vpow2.f32 %v1751_v13  ;;  %v1757_v31 = vmul.f32 1.442695, %v1710_v6  ;;  %v1713_v2 = vsub.f32 0.0, %v1681_v61  ;;  %v1711_v48 = vsub.f32 0.0, %v1679_v39 }
 0x21a   : > { %v1753_v47 = vmul.f32 1.442695, %v1708_v37  ;;  %v1866_v59 = vmul.f32 -0.5, %v4806_v36  ;;  %3871 = vlog2.f32 %v1890_v16  ;;  %v4868_v56 = vadd.f32 %v4716_v50, %v4614_v51 }
 0x21b   : > { %v4861_v7 = vpop.f32.mrb[28].mxu1  ;;  %3873 = vpow2.f32 %v1757_v31  ;;  %v1763_v8 = vmul.f32 1.442695, %v1713_v2  ;;  %v1759_v60 = vmul.f32 1.442695, %v1711_v48  ;;  %v1889_v19 = vsel %vm4844_vm9, %v1886_v28, %v1883_v42 }
 0x21c   : > { %v4870_v18 = vpop.f32.mrb[29].mxu1  ;;  %v3864_v46 = vpop.eup %3863  ;;  %v1869_v15 = vand.u32 2147483647, %v4806_v36  ;;  %3875 = vpow2.f32 %v1753_v47  ;;  %v1682_v55 = vand.u32 2147483647, %v4868_v56  ;;  %v1893_v13 = vmul.f32 -0.5, %v4852_v3 }
 0x21d   : > { %v4873_v62 = vpop.f32.mrb[30].mxu1  ;;  %v3866_v45 = vpop.eup %3865  ;;  %v4881_v35 = vadd.f32 -0.6931472, %v2086_v34  ;;  %v1872_v6 = vadd.f32 1.0, %v3864_v46  ;;  %3877 = vpow2.f32 %v1763_v8  ;;  %v4886_v49 = vadd.f32 -0.6931472, %v2084_v26 }
 0x21e   : > { %v4879_v50 = vpop.f32.mrb[31].mxu1  ;;  %v4884_v61 = vpop.eup %3867  ;;  %v1867_v12 = vadd.f32 1.0, %v1866_v59  ;;  %3879 = vpow2.f32 %v1759_v60  ;;  %v1714_v28 = vsub.f32 0.0, %v1682_v55  ;;  %v2089_v37 = vadd.f32 %v1889_v19, %v1641_v20 }
 0x21f   : > { %v1896_v39 = vand.u32 2147483647, %v4852_v3  ;;  %3881 = vlog2.f32 %v1872_v6  ;;  %v1917_v34 = vadd.f32 1.0, %v4884_v61  ;;  %v1865_v42 = vmul.f32 0.6931472, %v3866_v45 }
 0x220   : > { %vm4892_vm10 = vcmp.lt.f32.partialorder %v1869_v15, 0.0004427343  ;;  %v1875_v31 = vmul.f32 -0.5, %v3864_v46  ;;  %v1894_v2 = vadd.f32 1.0, %v1893_v13  ;;  %v1765_v26 = vmul.f32 1.442695, %v1714_v28 }
 0x221   : > { %v4900_v29 = vadd.f32 %v4614_v51, %v4722_v1  ;;  %v1868_v59 = vmul.f32 %v4806_v36, %v1867_v12  ;;  %3883 = vlog2.f32 %v1917_v34  ;;  %v4907_v19 = vadd.f32 -0.6931472, %v2089_v37 }
 0x222   : > { %vm4909_vm11 = vcmp.lt.f32.partialorder %v1896_v39, 0.0004427343  ;;  %v1876_v36 = vadd.f32 1.0, %v1875_v31  ;;  %v1878_v6 = vand.u32 2147483647, %v3864_v46  ;;  %v1920_v12 = vmul.f32 -0.5, %v4884_v61 }
 0x223   : > { %v4902_v20 = vpop.eup %3869  ;;  %v1871_v13 = vsel %vm4892_vm10, %v1868_v59, %v1865_v42  ;;  %v1895_v37 = vmul.f32 %v4852_v3, %v1894_v2  ;;  %3885 = vpow2.f32 %v1765_v26  ;;  %v1680_v39 = vand.u32 2147483647, %v4900_v29 }
 0x224   : > { %v1899_v55 = vadd.f32 1.0, %v4902_v20  ;;  %v3872_v45 = vpop.eup %3871  ;;  %v1923_v8 = vand.u32 2147483647, %v4884_v61  ;;  %v2087_v31 = vadd.f32 %v1871_v13, %v1639_v33  ;;  %v1902_v3 = vmul.f32 -0.5, %v4902_v20 }
 0x225   : > { %v3874_v28 = vpop.eup %3873  ;;  %v1892_v34 = vmul.f32 0.6931472, %v3872_v45  ;;  %v1877_v59 = vmul.f32 %v3864_v46, %v1876_v36  ;;  %vm4933_vm12 = vcmp.lt.f32.partialorder %v1878_v6, 0.0004427343  ;;  %v1921_v48 = vadd.f32 1.0, %v1920_v12 }
 0x226   : > { %v4920_v60 = vpop.eup %3875  ;;  %v1926_v1 = vadd.f32 1.0, %v3874_v28  ;;  %3887 = vlog2.f32 %v1899_v55  ;;  %v1712_v33 = vsub.f32 0.0, %v1680_v39  ;;  %v4942_v55 = vadd.f32 %v4743_v58, %v4614_v51 }
 0x227   : > { %v4925_v16 = vpop.eup %3877  ;;  %v1908_v2 = vadd.f32 1.0, %v4920_v60  ;;  %v1898_v47 = vsel %vm4909_vm11, %v1895_v37, %v1892_v34  ;;  %vm4944_vm13 = vcmp.lt.f32.partialorder %v1923_v8, 0.0004427343  ;;  %v1929_v36 = vmul.f32 -0.5, %v3874_v28 }
 0x228   : > { %v4931_v26 = vpop.eup %3879  ;;  %3889 = vlog2.f32 %v1926_v1  ;;  %v1953_v53 = vadd.f32 1.0, %v4925_v16  ;;  %v4948_v6 = vadd.f32 -0.6931472, %v2087_v31  ;;  %v1903_v1 = vadd.f32 1.0, %v1902_v3 }
 0x229   : > { %v3882_v42 = vpop.eup %3881  ;;  %3891 = vlog2.f32 %v1908_v2  ;;  %v1905_v15 = vand.u32 2147483647, %v4902_v20  ;;  %v2090_v34 = vadd.f32 %v1898_v47, %v1642_v63  ;;  %v1932_v37 = vand.u32 2147483647, %v3874_v28 }
 0x22a   : > { %v1874_v13 = vmul.f32 0.6931472, %v3882_v42  ;;  %3893 = vlog2.f32 %v1953_v53  ;;  %v1911_v58 = vmul.f32 -0.5, %v4920_v60  ;;  %v1935_v8 = vadd.f32 1.0, %v4931_v26 }
 0x22b   : > { %v3884_v12 = vpop.eup %3883  ;;  %v1922_v39 = vmul.f32 %v4884_v61, %v1921_v48  ;;  %v1956_v42 = vmul.f32 -0.5, %v4925_v16  ;;  %v1761_v2 = vmul.f32 1.442695, %v1712_v33  ;;  %v1685_v31 = vand.u32 2147483647, %v4942_v55 }
 0x22c   : > { %v1880_v3 = vsel %vm4933_vm12, %v1877_v59, %v1874_v13  ;;  %v1930_v53 = vadd.f32 1.0, %v1929_v36  ;;  %v1914_v44 = vand.u32 2147483647, %v4920_v60  ;;  %v1919_v47 = vmul.f32 0.6931472, %v3884_v12 }
 0x22d   : > { %v4962_v63 = vpop.eup %3885  ;;  %v1904_v54 = vmul.f32 %v4902_v20, %v1903_v1  ;;  %vm4965_vm14 = vcmp.lt.f32.partialorder %v1905_v15, 0.0004427343  ;;  %v1959_v48 = vand.u32 2147483647, %v4925_v16  ;;  %v4970_v33 = vadd.f32 -0.6931472, %v2090_v34 }
 0x22e   : > { %vm4972_vm15 = vcmp.lt.f32.partialorder %v1932_v37, 0.0004427343  ;;  %v1912_v45 = vadd.f32 1.0, %v1911_v58  ;;  %3895 = vlog2.f32 %v1935_v8  ;;  %v2088_v36 = vadd.f32 %v1880_v3, %v1640_v10 }
 0x22f   : > { %v1957_v12 = vadd.f32 1.0, %v1956_v42  ;;  %3897 = vpow2.f32 %v1761_v2  ;;  %v1717_v20 = vsub.f32 0.0, %v1685_v31  ;;  %v1931_v15 = vmul.f32 %v3874_v28, %v1930_v53 }
 0x230   : > { %v3888_v13 = vpop.eup %3887  ;;  %vm4978_vm0 = vcmp.lt.f32.partialorder %v1914_v44, 0.0004427343  ;;  %v1962_v34 = vadd.f32 1.0, %v4962_v63  ;;  %v4985_v37 = vadd.f32 %v4614_v51, %v4749_v43  ;;  %v1925_v58 = vsel %vm4944_vm13, %v1922_v39, %v1919_v47 }
 0x231   : > { %vm4989_vm1 = vcmp.lt.f32.partialorder %v1959_v48, 0.0004427343  ;;  %v1938_v10 = vmul.f32 -0.5, %v4931_v26  ;;  %v1771_v28 = vmul.f32 1.442695, %v1717_v20  ;;  %v4996_v44 = vadd.f32 %v4762_v38, %v4614_v51 }
 0x232   : > { %v3890_v1 = vpop.eup %3889  ;;  %v1901_v42 = vmul.f32 0.6931472, %v3888_v13  ;;  %v1913_v2 = vmul.f32 %v4920_v60, %v1912_v45  ;;  %v1941_v43 = vand.u32 2147483647, %v4931_v26  ;;  %v1683_v46 = vand.u32 2147483647, %v4985_v37 }
 0x233   : > { %v3892_v8 = vpop.eup %3891  ;;  %v5001_v31 = vadd.f32 -0.6931472, %v2088_v36  ;;  %v1928_v3 = vmul.f32 0.6931472, %v3890_v1  ;;  %v1958_v53 = vmul.f32 %v4925_v16, %v1957_v12  ;;  %3899 = vpow2.f32 %v1771_v28 }
 0x234   : > { %v3894_v39 = vpop.eup %3893  ;;  %v5661_v47 = vmax.f32 %v4772_v9, 0.0  ;;  %3901 = vlog2.f32 %v1962_v34  ;;  %v1965_v38 = vmul.f32 -0.5, %v4962_v63  ;;  %v1715_v13 = vsub.f32 0.0, %v1683_v46 }
 0x235   : > { %v1910_v20 = vmul.f32 0.6931472, %v3892_v8  ;;  %v1686_v60 = vand.u32 2147483647, %v4996_v44  ;;  %v5010_v45 = vadd.f32 %v4614_v51, %v4774_v0  ;;  %v2143_v36 = vpack.c.bf16 %v4808_v24, %v4788_v30 }
 0x236   : > { %v2093_v48 = vadd.f32 %v1925_v58, %v5661_v47  ;;  %v1907_v16 = vsel %vm4965_vm14, %v1904_v54, %v1901_v42  ;;  %v1955_v12 = vmul.f32 0.6931472, %v3894_v39  ;;  %v1939_v9 = vadd.f32 1.0, %v1938_v10 }
 0x237   : > { %v1767_v1 = vmul.f32 1.442695, %v1715_v13  ;;  %v1934_v34 = vsel %vm4972_vm15, %v1931_v15, %v1928_v3  ;;  %vm5018_vm2 = vcmp.lt.f32.partialorder %v1941_v43, 0.0004427343  ;;  %v1718_v28 = vsub.f32 0.0, %v1686_v60  ;;  %3458 = vmatprep.mubr.bf16.mxu0 %v2143_v36 }
 0x238   : > { %v5024_v0 = vadd.f32 %v4797_v32, %v4614_v51  ;;  %v3896_v30 = vpop.eup %3895  ;;  %v1966_v24 = vadd.f32 1.0, %v1965_v38  ;;  %v1968_v54 = vand.u32 2147483647, %v4962_v63  ;;  %v1684_v61 = vand.u32 2147483647, %v5010_v45 }
 0x239   : > { %3903 = vpow2.f32 %v1767_v1  ;;  %v5664_v59 = vpack.c.bf16 %v4740_v11, %v4738_v27  ;;  %v5031_v15 = vpop.eup %3897  ;;  %v5033_v10 = vadd.f32 -0.6931472, %v2093_v48  ;;  %v5665_v8 = vmax.f32 %v4802_v41, 0.0 }
 0x23a   : > { %v1916_v32 = vsel %vm4978_vm0, %v1913_v2, %v1910_v20  ;;  %v1773_v43 = vmul.f32 1.442695, %v1718_v28  ;;  %v5666_v46 = vmax.f32 %v4812_v52, 0.0  ;;  %v1961_v3 = vsel %vm4989_vm1, %v1958_v53, %v1955_v12 }
 0x23b   : > { %3459 = vmatmul.mubr.bf16.vlgmr.msra.gmra.mrb[4].mxu0 %v5664_v59  ;;  %v2091_v42 = vadd.f32 %v1907_v16, %v5665_v8  ;;  %v1940_v27 = vmul.f32 %v4931_v26, %v1939_v9  ;;  %v1944_v11 = vadd.f32 1.0, %v5031_v15  ;;  %v1937_v47 = vmul.f32 0.6931472, %v3896_v30 }
 0x23c   : > { %v2094_v39 = vadd.f32 %v1934_v34, %v5666_v46  ;;  %3905 = vpow2.f32 %v1773_v43  ;;  %v1716_v48 = vsub.f32 0.0, %v1684_v61  ;;  %v1689_v41 = vand.u32 2147483647, %v5024_v0  ;;  %v5084_v61 = vpop.f32.mrb[0].mxu0 }
 0x23d   : > { %v5667_v38 = vmax.f32 %v4823_v4, 0.0  ;;  %v1967_v2 = vmul.f32 %v4962_v63, %v1966_v24  ;;  %vm5049_vm3 = vcmp.lt.f32.partialorder %v1968_v54, 0.0004427343  ;;  %3907 = vlog2.f32 %v1944_v11  ;;  %v5054_v26 = vpop.eup %3899  ;;  %v3392_v46 = vpop.f32.mrb[1].mxu0 }
 0x23e   : > { %v1651_v5 = vmax.f32 %v4985_v37, 0.0  ;;  %v5056_v53 = vadd.f32 -0.6931472, %v2091_v42  ;;  %v1769_v13 = vmul.f32 1.442695, %v1716_v48  ;;  %v1721_v20 = vsub.f32 0.0, %v1689_v41  ;;  %v3902_v4 = vpop.eup %3901 }
 0x23f   : > { %v2092_v21 = vadd.f32 %v1916_v32, %v5667_v38  ;;  %v5060_v60 = vadd.f32 %v4614_v51, %v4804_v25  ;;  %v5062_v36 = vadd.f32 -0.6931472, %v2094_v39  ;;  %v5670_v63 = vmax.f32 %v4830_v22, 0.0 }
 0x240   : > { %v1989_v12 = vadd.f32 1.0, %v5054_v26  ;;  %v1654_v9 = vmax.f32 %v4996_v44, 0.0  ;;  %v1943_v1 = vsel %vm5018_vm2, %v1940_v27, %v1937_v47  ;;  %v1947_v34 = vmul.f32 -0.5, %v5031_v15 }
 0x241   : > { %v2097_v16 = vadd.f32 %v1961_v3, %v5670_v63  ;;  %3909 = vpow2.f32 %v1769_v13  ;;  %v1779_v28 = vmul.f32 1.442695, %v1721_v20  ;;  %v5071_v30 = vadd.f32 -0.6931472, %v2092_v21 }
 0x242   : > { %3911 = vlog2.f32 %v1989_v12  ;;  %v1687_v25 = vand.u32 2147483647, %v5060_v60  ;;  %v5076_v22 = vadd.f32 %v4814_v57, %v4614_v51  ;;  %v1964_v24 = vmul.f32 0.6931472, %v3902_v4 }
 0x243   : > { %3913 = vpow2.f32 %v1779_v28  ;;  %v5080_v54 = vadd.f32 %v4614_v51, %v4825_v14  ;;  %v2145_v58 = vpack.c.bf16 %v4886_v49, %v4858_v17  ;;  %v5086_v59 = vpop.eup %3903  ;;  %v5671_v8 = vmax.f32 %v4836_v40, 0.0  ;;  %v5096_v49 = vpop.f32.mrb[2].mxu0 }
 0x244   : > { %v1652_v32 = vmax.f32 %v5010_v45, 0.0  ;;  %v1719_v57 = vsub.f32 0.0, %v1687_v25  ;;  %v1690_v43 = vand.u32 2147483647, %v5076_v22  ;;  %v5092_v39 = vadd.f32 -0.6931472, %v2097_v16 }
 0x245   : > { %v2095_v42 = vadd.f32 %v1943_v1, %v5671_v8  ;;  %v1948_v14 = vadd.f32 1.0, %v1947_v34  ;;  %v1971_v3 = vadd.f32 1.0, %v5086_v59  ;;  %v1657_v17 = vmax.f32 %v5024_v0, 0.0  ;;  %3462 = vmatprep.mubr.bf16.mxu0 %v2145_v58  ;;  %v3393_v48 = vpop.f32.mrb[3].mxu0 }
 0x246   : > { %v1775_v27 = vmul.f32 1.442695, %v1719_v57  ;;  %v1722_v11 = vsub.f32 0.0, %v1690_v43  ;;  %v1688_v40 = vand.u32 2147483647, %v5080_v54  ;;  %v2146_v47 = vpack.c.bf16 %v4881_v35, %v4841_v23  ;;  %v5101_v41 = vpop.eup %3905 }
 0x247   : > { %v1970_v38 = vsel %vm5049_vm3, %v1967_v2, %v1964_v24  ;;  %v1992_v21 = vmul.f32 -0.5, %v5054_v26  ;;  %3915 = vlog2.f32 %v1971_v3  ;;  %v5108_v13 = vadd.f32 %v4861_v7, %v4614_v51  ;;  %v3908_v20 = vpop.eup %3907 }
 0x248   : > { %v5110_v4 = vadd.f32 -0.6931472, %v2095_v42  ;;  %v1950_v63 = vand.u32 2147483647, %v5031_v15  ;;  %v1998_v23 = vadd.f32 1.0, %v5101_v41  ;;  %3917 = vpow2.f32 %v1775_v27  ;;  %3463 = vmatmul.mubr.bf16.gmra.mrb[8].mxu0 %v2146_v47 }
 0x249   : > { %v1946_v35 = vmul.f32 0.6931472, %v3908_v20  ;;  %v1974_v52 = vmul.f32 -0.5, %v5086_v59  ;;  %v1781_v2 = vmul.f32 1.442695, %v1722_v11  ;;  %v1720_v16 = vsub.f32 0.0, %v1688_v40 }
 0x24a   : > { %v5672_v12 = vmax.f32 %v4868_v56, 0.0  ;;  %v1949_v7 = vmul.f32 %v5031_v15, %v1948_v14  ;;  %v1995_v34 = vand.u32 2147483647, %v5054_v26  ;;  %3919 = vlog2.f32 %v1998_v23 }
 0x24b   : > { %v3910_v28 = vpop.eup %3909  ;;  %v1993_v25 = vadd.f32 1.0, %v1992_v21  ;;  %3921 = vpow2.f32 %v1781_v2  ;;  %v1777_v24 = vmul.f32 1.442695, %v1720_v16  ;;  %v1693_v58 = vand.u32 2147483647, %v5108_v13 }
 0x24c   : > { %v2098_v1 = vadd.f32 %v1970_v38, %v5672_v12  ;;  %v3912_v8 = vpop.eup %3911  ;;  %vm5120_vm4 = vcmp.lt.f32.partialorder %v1950_v63, 0.0004427343  ;;  %v1977_v57 = vand.u32 2147483647, %v5086_v59  ;;  %v2001_v56 = vmul.f32 -0.5, %v5101_v41 }
 0x24d   : > { %v1980_v43 = vadd.f32 1.0, %v3910_v28  ;;  %v5126_v15 = vpop.eup %3913  ;;  %v1952_v46 = vsel %vm5120_vm4, %v1949_v7, %v1946_v35  ;;  %v1975_v14 = vadd.f32 1.0, %v1974_v52  ;;  %3923 = vpow2.f32 %v1777_v24 }
 0x24e   : > { %v1725_v3 = vsub.f32 0.0, %v1693_v58  ;;  %v1991_v27 = vmul.f32 0.6931472, %v3912_v8  ;;  %v1983_v11 = vmul.f32 -0.5, %v3910_v28  ;;  %v2025_v40 = vadd.f32 1.0, %v5126_v15 }
 0x24f   : > { %3925 = vlog2.f32 %v1980_v43  ;;  %v5131_v47 = vadd.f32 -0.6931472, %v2098_v1  ;;  %v1994_v48 = vmul.f32 %v5054_v26, %v1993_v25  ;;  %vm5134_vm5 = vcmp.lt.f32.partialorder %v1995_v34, 0.0004427343 }
 0x250   : > { %v2004_v21 = vand.u32 2147483647, %v5101_v41  ;;  %v5677_v20 = vmax.f32 %v4900_v29, 0.0  ;;  %v2002_v23 = vadd.f32 1.0, %v2001_v56  ;;  %3927 = vlog2.f32 %v2025_v40  ;;  %v3951_v40 = vld [vmem:[%s5590_s8] ss:$0 sm:$0xff] }
 0x251   : > { %v1787_v35 = vmul.f32 1.442695, %v1725_v3  ;;  %v3916_v52 = vpop.eup %3915  ;;  %v1976_v2 = vmul.f32 %v5086_v59, %v1975_v14  ;;  %vm5142_vm6 = vcmp.lt.f32.partialorder %v1977_v57, 0.0004427343  ;;  %v1658_v26 = vmax.f32 %v5076_v22, 0.0 }
 0x252   : > { %v2096_v63 = vadd.f32 %v1952_v46, %v5677_v20  ;;  %v5149_v12 = vadd.f32 %v4614_v51, %v4870_v18  ;;  %v3918_v1 = vpop.eup %3917  ;;  %v1997_v29 = vsel %vm5134_vm5, %v1994_v48, %v1991_v27  ;;  %v1973_v7 = vmul.f32 0.6931472, %v3916_v52 }
 0x253   : > { %v1984_v34 = vadd.f32 1.0, %v1983_v11  ;;  %v1986_v25 = vand.u32 2147483647, %v3910_v28  ;;  %v2028_v24 = vmul.f32 -0.5, %v5126_v15  ;;  %v2031_v59 = vand.u32 2147483647, %v5126_v15 }
 0x254   : > { %v2007_v58 = vadd.f32 1.0, %v3918_v1  ;;  %3929 = vpow2.f32 %v1787_v35  ;;  %v3920_v8 = vpop.eup %3919  ;;  %v5155_v42 = vadd.f32 -0.6931472, %v2096_v63  ;;  %v2003_v57 = vmul.f32 %v5101_v41, %v2002_v23 }
 0x255   : > { %vm5158_vm7 = vcmp.lt.f32.partialorder %v2004_v21, 0.0004427343  ;;  %v1691_v18 = vand.u32 2147483647, %v5149_v12  ;;  %v3922_v56 = vpop.eup %3921  ;;  %v1979_v43 = vsel %vm5142_vm6, %v1976_v2, %v1973_v7  ;;  %v2000_v46 = vmul.f32 0.6931472, %v3920_v8 }
 0x256   : > { %3931 = vlog2.f32 %v2007_v58  ;;  %v2010_v14 = vmul.f32 -0.5, %v3918_v1  ;;  %v5682_v3 = vmax.f32 %v4942_v55, 0.0  ;;  %vm5167_vm8 = vcmp.lt.f32.partialorder %v1986_v25, 0.0004427343 }
 0x257   : > { %v2034_v41 = vadd.f32 1.0, %v3922_v56  ;;  %v5175_v48 = vadd.f32 %v3951_v40, %v4873_v62  ;;  %v5177_v38 = vpop.eup %3923  ;;  %v1985_v21 = vmul.f32 %v3910_v28, %v1984_v34  ;;  %v2029_v20 = vadd.f32 1.0, %v2028_v24 }
 0x258   : > { %v2101_v27 = vadd.f32 %v1997_v29, %v5682_v3  ;;  %vm5179_vm9 = vcmp.lt.f32.partialorder %v2031_v59, 0.0004427343  ;;  %v1723_v55 = vsub.f32 0.0, %v1691_v18  ;;  %v2099_v35 = vadd.f32 %v1979_v43, %v1651_v5 }
 0x259   : > { %v3926_v23 = vpop.eup %3925  ;;  %v2006_v52 = vsel %vm5158_vm7, %v2003_v57, %v2000_v46  ;;  %v2013_v2 = vand.u32 2147483647, %v3918_v1  ;;  %3933 = vlog2.f32 %v2034_v41  ;;  %v2011_v16 = vadd.f32 1.0, %v2010_v14 }
 0x25a   : > { %v1982_v62 = vmul.f32 0.6931472, %v3926_v23  ;;  %v2037_v29 = vmul.f32 -0.5, %v3922_v56  ;;  %v2016_v28 = vadd.f32 1.0, %v5177_v38  ;;  %v3928_v7 = vpop.eup %3927  ;;  %v2040_v34 = vand.u32 2147483647, %v3922_v56 }
 0x25b   : > { %v1783_v25 = vmul.f32 1.442695, %v1723_v55  ;;  %v1694_v24 = vand.u32 2147483647, %v5175_v48  ;;  %v5190_v59 = vadd.f32 %v3951_v40, %v4879_v50  ;;  %v2102_v37 = vadd.f32 %v2006_v52, %v1654_v9 }
 0x25c   : > { %v1988_v5 = vsel %vm5167_vm8, %v1985_v21, %v1982_v62  ;;  %v2027_v58 = vmul.f32 0.6931472, %v3928_v7  ;;  %3935 = vlog2.f32 %v2016_v28  ;;  %v5196_v8 = vadd.f32 -0.6931472, %v2101_v27 }
 0x25d   : > { %v2100_v57 = vadd.f32 %v1988_v5, %v1652_v32  ;;  %3937 = vpow2.f32 %v1783_v25  ;;  %v1726_v51 = vsub.f32 0.0, %v1694_v24  ;;  %v5202_v43 = vadd.f32 -0.6931472, %v2099_v35 }
 0x25e   : > { %v5200_v18 = vpop.eup %3929  ;;  %v2030_v50 = vmul.f32 %v5126_v15, %v2029_v20  ;;  %vm5205_vm10 = vcmp.lt.f32.partialorder %v2013_v2, 0.0004427343  ;;  %v2038_v9 = vadd.f32 1.0, %v2037_v29  ;;  %v2012_v46 = vmul.f32 %v3918_v1, %v2011_v16 }
 0x25f   : > { %vm5209_vm11 = vcmp.lt.f32.partialorder %v2040_v34, 0.0004427343  ;;  %v2019_v45 = vmul.f32 -0.5, %v5177_v38  ;;  %v1789_v32 = vmul.f32 1.442695, %v1726_v51  ;;  %v2061_v21 = vadd.f32 1.0, %v5200_v18 }
 0x260   : > { %v3932_v3 = vpop.eup %3931  ;;  %v5214_v27 = vadd.f32 -0.6931472, %v2102_v37  ;;  %v2033_v11 = vsel %vm5179_vm9, %v2030_v50, %v2027_v58  ;;  %v2022_v15 = vand.u32 2147483647, %v5177_v38  ;;  %v1692_v41 = vand.u32 2147483647, %v5190_v59 }
 0x261   : > { %v5220_v40 = vadd.f32 -0.6931472, %v2100_v57  ;;  %v2009_v1 = vmul.f32 0.6931472, %v3932_v3  ;;  %3939 = vpow2.f32 %v1789_v32  ;;  %v2039_v20 = vmul.f32 %v3922_v56, %v2038_v9 }
 0x262   : > { %v1724_v55 = vsub.f32 0.0, %v1692_v41  ;;  %v2147_v23 = vpack.c.bf16 %v5001_v31, %v4948_v6  ;;  %v2148_v35 = vpack.c.bf16 %v4970_v33, %v4907_v19  ;;  %v2020_v52 = vadd.f32 1.0, %v2019_v45 }
 0x263   : > { %v3934_v63 = vpop.eup %3933  ;;  %v2149_v2 = vpack.c.bf16 %v5071_v30, %v5056_v53  ;;  %v2150_v62 = vpack.c.bf16 %v5062_v36, %v5033_v10  ;;  %v2151_v16 = vpack.c.bf16 %v5155_v42, %v5110_v4  ;;  %v2105_v56 = vadd.f32 %v2033_v11, %v1657_v17 }
 0x264   : > { %v2036_v29 = vmul.f32 0.6931472, %v3934_v63  ;;  %v1785_v28 = vmul.f32 1.442695, %v1724_v55  ;;  %3466 = vmatprep.mubr.bf16.mxu0 %v2147_v23  ;;  %v2152_v19 = vpack.c.bf16 %v5131_v47, %v5092_v39  ;;  %v2015_v6 = vsel %vm5205_vm10, %v2012_v46, %v2009_v1 }
 0x265   : > { %3941 = vlog2.f32 %v2061_v21  ;;  %3467 = vmatmul.mubr.bf16.gmra.mrb[12].mxu0 %v2148_v35  ;;  %v2153_v33 = vpack.c.bf16 %v5220_v40, %v5202_v43  ;;  %v2154_v31 = vpack.c.bf16 %v5214_v27, %v5196_v8  ;;  %v1655_v0 = vmax.f32 %v5060_v60, 0.0 }
 0x266   : > { %v3936_v10 = vpop.eup %3935  ;;  %v2042_v53 = vsel %vm5209_vm11, %v2039_v20, %v2036_v29  ;;  %3943 = vpow2.f32 %v1785_v28  ;;  %3470 = vmatprep.mubr.bf16.mxu0 %v2149_v2  ;;  %v2021_v17 = vmul.f32 %v5177_v38, %v2020_v52  ;;  %v1656_v47 = vmax.f32 %v5080_v54, 0.0 }
 0x267   : > { %v3938_v36 = vpop.eup %3937  ;;  %v2106_v30 = vadd.f32 %v2042_v53, %v1658_v26  ;;  %v2018_v39 = vmul.f32 0.6931472, %v3936_v10  ;;  %v2103_v4 = vadd.f32 %v2015_v6, %v1655_v0  ;;  %vm2023_vm12 = vcmp.lt.f32.partialorder %v2022_v15, 0.0004427343 }
 0x268   : > { %v2043_v42 = vadd.f32 1.0, %v3938_v36  ;;  %v3253_v7 = vadd.f32 -0.6931472, %v2105_v56  ;;  %v2064_v22 = vmul.f32 -0.5, %v5200_v18  ;;  %v2067_v44 = vand.u32 2147483647, %v5200_v18 }
 0x269   : > { %v3254_v34 = vadd.f32 -0.6931472, %v2106_v30  ;;  %v2024_v60 = vsel %vm2023_vm12, %v2021_v17, %v2018_v39  ;;  %v3251_v5 = vadd.f32 -0.6931472, %v2103_v4  ;;  %v2046_v9 = vmul.f32 -0.5, %v3938_v36  ;;  %v2458_v4 = vpop.permute.xlu0 %2457 }
 0x26a   : > { %v2104_v25 = vadd.f32 %v2024_v60, %v1656_v47  ;;  %3945 = vlog2.f32 %v2043_v42  ;;  %v2065_v51 = vadd.f32 1.0, %v2064_v22  ;;  %vm2068_vm13 = vcmp.lt.f32.partialorder %v2067_v44, 0.0004427343  ;;  %v3208_v60 = vld [vmem:[%s5691_s29] ss:$0 sm:$0xff]  ;;  %s5695_s29 = smov (!%p3268_p6), %s5694_s23 }
 0x26b   : > { %v3940_v24 = vpop.eup %3939  ;;  %v2156_v37 = vpack.c.bf16 %v3254_v34, %v3253_v7  ;;  %v2047_v3 = vadd.f32 1.0, %v2046_v9  ;;  %v2049_v40 = vand.u32 2147483647, %v3938_v36  ;;  %v1661_v21 = vmax.f32 %v5108_v13, 0.0 }
 0x26c   : > { %v3252_v58 = vadd.f32 -0.6931472, %v2104_v25  ;;  %v2070_v57 = vadd.f32 1.0, %v3940_v24  ;;  %v2073_v43 = vmul.f32 -0.5, %v3940_v24  ;;  %v2066_v45 = vmul.f32 %v5200_v18, %v2065_v51  ;;  %v5272_v25 = vld [vmem:[%s5692_s3] ss:$0 sm:$0xff] }
 0x26d   : > { %3471 = vmatmul.mubr.bf16.gmra.mrb[16].mxu0 %v2150_v62  ;;  %v2076_v11 = vand.u32 2147483647, %v3940_v24  ;;  %v1662_v55 = vmax.f32 %v5175_v48, 0.0  ;;  %v2048_v52 = vmul.f32 %v3938_v36, %v2047_v3  ;;  %vm2050_vm15 = vcmp.lt.f32.partialorder %v2049_v40, 0.0004427343  ;;  %v2468_v27 = vpop.permute.xlu0 %2467 }
 0x26e   : > { %3947 = vlog2.f32 %v2070_v57  ;;  %3474 = vmatprep.mubr.bf16.mxu0 %v2151_v16  ;;  %v2155_v26 = vpack.c.bf16 %v3252_v58, %v3251_v5  ;;  %v2074_v32 = vadd.f32 1.0, %v2073_v43  ;;  %v1659_v28 = vmax.f32 %v5149_v12, 0.0  ;;  %v2463_v12 = vpop.permute.xlu1 %2462 }
 0x26f   : > { %v3942_v38 = vpop.eup %3941  ;;  %vm2077_vm14 = vcmp.lt.f32.partialorder %v2076_v11, 0.0004427343  ;;  %v1660_v10 = vmax.f32 %v5190_v59, 0.0  ;;  %v5277_v5 = vadd.f32 %v3208_v60, %v5084_v61  ;;  %vm2777_vm1 = vcmask 1041409  }
 0x270   : > { %v3944_v54 = vpop.eup %3943  ;;  %3482 = vmatprep.mubr.bf16.mxu1 %v2155_v26  ;;  %v2063_v46 = vmul.f32 0.6931472, %v3942_v38  ;;  %v2075_v35 = vmul.f32 %v3940_v24, %v2074_v32  ;;  %vm2779_vm2 = vcmask 1042434   ;;  %vm2781_vm3 = vcmask 1043459  }
 0x271   : > { %v2052_v50 = vadd.f32 1.0, %v3944_v54  ;;  %3483 = vmatmul.mubr.bf16.vlgmr.msra.gmra.mrb[32].mxu1 %v2156_v37  ;;  %v2055_v15 = vmul.f32 -0.5, %v3944_v54  ;;  %v2058_v62 = vand.u32 2147483647, %v3944_v54  ;;  %v2478_v47 = vpop.permute.xlu0 %2477  ;;  %vm2783_vm4 = vcmask 1044484  }
 0x272   : > { %v2069_v41 = vsel %vm2068_vm13, %v2066_v45, %v2063_v46  ;;  %v2473_v8 = vpop.permute.xlu1 %2472  ;;  %vm2785_vm5 = vcmask 1045509   ;;  %vm2787_vm6 = vcmask 1046534   ;;  %vm2789_vm7 = vcmask 1047559  }
 0x273   : > { %3949 = vlog2.f32 %v2052_v50  ;;  %v2109_v63 = vadd.f32 %v2069_v41, %v1661_v21  ;;  %v2056_v18 = vadd.f32 1.0, %v2055_v15  ;;  %vm2059_vm0 = vcmp.lt.f32.partialorder %v2058_v62, 0.0004427343 }
 0x274   : > { %v3946_v14 = vpop.eup %3945 }
 0x275   : > { %3475 = vmatmul.mubr.bf16.gmra.mrb[20].mxu0 %v2152_v19  ;;  %v2045_v20 = vmul.f32 0.6931472, %v3946_v14  ;;  %v3257_v13 = vadd.f32 -0.6931472, %v2109_v63  ;;  %v2057_v6 = vmul.f32 %v3944_v54, %v2056_v18  ;;  %v2488_v7 = vpop.permute.xlu0 %2487  ;;  %v5284_v54 = vadd.f32 %v3208_v60, %v5096_v49 }
 0x276   : > { %3478 = vmatprep.mubr.bf16.mxu0 %v2153_v33 }
 0x277   : > { %v2051_v16 = vsel %vm2050_vm15, %v2048_v52, %v2045_v20 }
 0x278   : > { %v3948_v1 = vpop.eup %3947  ;;  %v2107_v33 = vadd.f32 %v2051_v16, %v1659_v28 }
 0x279   : > { %v2072_v23 = vmul.f32 0.6931472, %v3948_v1  ;;  %v5264_v59 = vpop.permute.xlu0 %2497 }
 0x27a   : > { %v3255_v30 = vadd.f32 -0.6931472, %v2107_v33 }
 0x27b   : > { %v2078_v2 = vsel %vm2077_vm14, %v2075_v35, %v2072_v23 }
 0x27c   : > { %v2110_v56 = vadd.f32 %v2078_v2, %v1662_v55 }
 0x27d   : > { %v3950_v29 = vpop.eup %3949  ;;  %3479 = vmatmul.mubr.bf16.gmra.mrb[24].mxu0 %v2154_v31  ;;  %v5260_v31 = vpop.permute.xlu1 %2482 }
 0x27e   : > { %v3258_v48 = vadd.f32 -0.6931472, %v2110_v56  ;;  %v2054_v19 = vmul.f32 0.6931472, %v3950_v29  ;;  %v5280_v22 = vpop.permute.xlu0 %2537 }
 0x280   : > { %v2060_v0 = vsel %vm2059_vm0, %v2057_v6, %v2054_v19  ;;  %v2158_v53 = vpack.c.bf16 %v3258_v48, %v3257_v13 }
 0x281   : > { %v2108_v36 = vadd.f32 %v2060_v0, %v1660_v10  ;;  %v2493_v42 = vpop.permute.xlu1 %2492 }
 0x282   : > { %v5294_v3 = vpop.permute.xlu0 %2547 }
 0x283   : > { %v3256_v39 = vadd.f32 -0.6931472, %v2108_v36 }
 0x285   : > { %v2157_v17 = vpack.c.bf16 %v3256_v39, %v3255_v30  ;;  %v5262_v34 = vpop.permute.xlu1 %2502 }
 0x286   : > { %v5298_v55 = vpop.permute.xlu0 %2557 }
 0x287   : > { %3486 = vmatprep.mubr.bf16.mxu1 %v2157_v17 }
 0x288   : > { %3487 = vmatmul.mubr.bf16.gmra.mrb[36].mxu1 %v2158_v53 }
 0x289   : > { %v5274_v37 = vpop.permute.xlu1 %2542 }
 0x28a   : > { %v5309_v53 = vpop.permute.xlu0 %2567 }
 0x28d   : > { %v5292_v14 = vpop.permute.xlu1 %2552 }
 0x291   : > { %v5296_v21 = vpop.permute.xlu1 %2562 }
 0x295   : > { %v5306_v33 = vpop.permute.xlu1 %2572 }
 0x30e   : > { %v3460_v24 = vpop.f32.mrb[4].mxu0 }
 0x30f   : > { %v2273_v58 = vadd.f32 %v3460_v24, %v5272_v25  ;;  %v2264_v57 = vpop.f32.mrb[5].mxu0 }
 0x310   : > { %v2265_v26 = vadd.f32 %v5272_v25, %v2264_v57  ;;  %v3461_v38 = vpop.f32.mrb[6].mxu0  ;;  %v5314_v57 = vpop.permute.xlu1 %2582 }
 0x311   : > { %v2393_v51 = vmul.f32 %v2273_v58, %v5277_v5  ;;  %v2276_v43 = vadd.f32 %v3461_v38, %v5272_v25  ;;  %v2267_v50 = vpop.f32.mrb[7].mxu0  ;;  %v5316_v38 = vpop.permute.xlu0 %2577 }
 0x312   : > { %v2391_v44 = vmul.f32 %v2265_v26, %v5277_v5  ;;  %v2268_v61 = vadd.f32 %v5272_v25, %v2267_v50 }
 0x313   : > { %v2394_v9 = vmul.f32 %v2276_v43, %v5284_v54  ;;  %v2617_v45 = vmul.f32 %v2468_v27, %v2393_v51 }
 0x314   : > { %v2392_v46 = vmul.f32 %v2268_v61, %v5284_v54  ;;  %v2615_v49 = vmul.f32 %v2458_v4, %v2391_v44 }
 0x315   : > { %v2618_v32 = vmul.f32 %v2473_v8, %v2394_v9  ;;  %v2508_v9 = vpop.permute.xlu0 %2507 }
 0x316   : > { %v2616_v11 = vmul.f32 %v2463_v12, %v2392_v46 }
 0x317   : > { %v2656_v15 = vadd.f32 %v2618_v32, %v2617_v45 }
 0x318   : > { %v2649_v41 = vadd.f32 %v2616_v11, %v2615_v49 }
 0x319   : > { %v2657_v40 = vrot.slane %v2656_v15, 4  ;;  %v5320_v11 = vpop.permute.xlu0 %2587 }
 0x31a   : > { %v2650_v1 = vrot.slane %v2649_v41, 4 }
 0x31b   : > { %v2658_v20 = vadd.f32 %v2657_v40, %v2656_v15  ;;  %v3464_v35 = vpop.f32.mrb[8].mxu0 }
 0x31c   : > { %v2651_v23 = vadd.f32 %v2650_v1, %v2649_v41  ;;  %v2289_v52 = vadd.f32 %v3464_v35, %v5272_v25  ;;  %v2280_v18 = vpop.f32.mrb[9].mxu0 }
 0x31d   : > { %v2659_v63 = vrot.slane %v2658_v20, 2  ;;  %v2281_v62 = vadd.f32 %v5272_v25, %v2280_v18  ;;  %v3465_v16 = vpop.f32.mrb[10].mxu0  ;;  %v2518_v35 = vpop.permute.xlu0 %2517 }
 0x31e   : > { %v2652_v2 = vrot.slane %v2651_v23, 2  ;;  %v2397_v29 = vmul.f32 %v2289_v52, %v5277_v5  ;;  %v2292_v28 = vadd.f32 %v3465_v16, %v5272_v25  ;;  %v2283_v13 = vpop.f32.mrb[11].mxu0 }
 0x31f   : > { %v2660_v56 = vadd.f32 %v2659_v63, %v2658_v20  ;;  %v2395_v19 = vmul.f32 %v2281_v62, %v5277_v5  ;;  %v2284_v6 = vadd.f32 %v5272_v25, %v2283_v13 }
 0x320   : > { %v2653_v48 = vadd.f32 %v2652_v2, %v2651_v23  ;;  %v2398_v0 = vmul.f32 %v2292_v28, %v5284_v54  ;;  %v2621_v17 = vmul.f32 %v2488_v7, %v2397_v29  ;;  %v2513_v7 = vpop.permute.xlu1 %2512 }
 0x321   : > { %v2661_v10 = vrot.slane %v2660_v56, 1  ;;  %v2396_v30 = vmul.f32 %v2284_v6, %v5284_v54  ;;  %v2619_v8 = vmul.f32 %v2478_v47, %v2395_v19  ;;  %v5336_v6 = vpop.permute.xlu0 %2597 }
 0x322   : > { %v2654_v36 = vrot.slane %v2653_v48, 1  ;;  %v2622_v12 = vmul.f32 %v2493_v42, %v2398_v0 }
 0x323   : > { %v2662_v39 = vadd.f32 %v2661_v10, %v2660_v56  ;;  %v2620_v27 = vmul.f32 %v5260_v31, %v2396_v30 }
 0x324   : > { %v2655_v4 = vadd.f32 %v2654_v36, %v2653_v48  ;;  %v2670_v60 = vadd.f32 %v2622_v12, %v2621_v17  ;;  %v5318_v32 = vpop.permute.xlu1 %2592 }
 0x325   : > { %v2663_v58 = vadd.f32 %v2620_v27, %v2619_v8 }
 0x326   : > { %v2778_v24 = vsel %vm2777_vm1, %v2662_v39, %v2655_v4  ;;  %v2671_v26 = vrot.slane %v2670_v60, 4 }
 0x327   : > { %v2664_v51 = vrot.slane %v2663_v58, 4 }
 0x328   : > { %v2672_v43 = vadd.f32 %v2671_v26, %v2670_v60  ;;  %v2523_v1 = vpop.permute.xlu1 %2522 }
 0x329   : > { %v2665_v50 = vadd.f32 %v2664_v51, %v2663_v58 }
 0x32a   : > { %v2673_v44 = vrot.slane %v2672_v43, 2 }
 0x32b   : > { %v2666_v61 = vrot.slane %v2665_v50, 2 }
 0x32c   : > { %v2674_v42 = vadd.f32 %v2673_v44, %v2672_v43  ;;  %v5334_v13 = vpop.permute.xlu1 %2602 }
 0x32d   : > { %v2667_v47 = vadd.f32 %v2666_v61, %v2665_v50 }
 0x32e   : > { %v2675_v46 = vrot.slane %v2674_v42, 1 }
 0x32f   : > { %v2668_v31 = vrot.slane %v2667_v47, 1 }
 0x330   : > { %v2676_v49 = vadd.f32 %v2675_v46, %v2674_v42  ;;  %v2533_v43 = vpop.permute.xlu1 %2532  ;;  %v2528_v42 = vpop.permute.xlu0 %2527 }
 0x331   : > { %v2669_v45 = vadd.f32 %v2668_v31, %v2667_v47 }
 0x333   : > { %v2780_v15 = vsel %vm2779_vm2, %v2669_v45, %v2778_v24 }
 0x334   : > { %v5324_v41 = vsel %vm2781_vm3, %v2676_v49, %v2780_v15 }
 0x338   : > { %v3468_v40 = vpop.f32.mrb[12].mxu0 }
 0x339   : > { %v2305_v20 = vadd.f32 %v3468_v40, %v5272_v25  ;;  %v2296_v23 = vpop.f32.mrb[13].mxu0 }
 0x33a   : > { %v2297_v63 = vadd.f32 %v5272_v25, %v2296_v23  ;;  %v3469_v52 = vpop.f32.mrb[14].mxu0 }
 0x33b   : > { %v2401_v18 = vmul.f32 %v2305_v20, %v5277_v5  ;;  %v2308_v2 = vadd.f32 %v3469_v52, %v5272_v25  ;;  %v2299_v62 = vpop.f32.mrb[15].mxu0 }
 0x33c   : > { %v2399_v16 = vmul.f32 %v2297_v63, %v5277_v5  ;;  %v2300_v56 = vadd.f32 %v5272_v25, %v2299_v62 }
 0x33d   : > { %v2402_v29 = vmul.f32 %v2308_v2, %v5284_v54  ;;  %v2625_v48 = vmul.f32 %v2508_v9, %v2401_v18 }
 0x33e   : > { %v2400_v28 = vmul.f32 %v2300_v56, %v5284_v54  ;;  %v2623_v10 = vmul.f32 %v5264_v59, %v2399_v16 }
 0x33f   : > { %v2626_v19 = vmul.f32 %v2513_v7, %v2402_v29 }
 0x340   : > { %v2624_v0 = vmul.f32 %v5262_v34, %v2400_v28  ;;  %v3472_v36 = vpop.f32.mrb[16].mxu0 }
 0x341   : > { %v2684_v30 = vadd.f32 %v2626_v19, %v2625_v48  ;;  %v2321_v39 = vadd.f32 %v3472_v36, %v5272_v25  ;;  %v2312_v17 = vpop.f32.mrb[17].mxu0 }
 0x342   : > { %v2677_v12 = vadd.f32 %v2624_v0, %v2623_v10  ;;  %v2313_v4 = vadd.f32 %v5272_v25, %v2312_v17  ;;  %v3473_v8 = vpop.f32.mrb[18].mxu0 }
 0x343   : > { %v2685_v27 = vrot.slane %v2684_v30, 4  ;;  %v2405_v60 = vmul.f32 %v2321_v39, %v5277_v5  ;;  %v2324_v24 = vadd.f32 %v3473_v8, %v5272_v25  ;;  %v2315_v58 = vpop.f32.mrb[19].mxu0 }
 0x344   : > { %v2678_v26 = vrot.slane %v2677_v12, 4  ;;  %v2403_v59 = vmul.f32 %v2313_v4, %v5277_v5  ;;  %v2316_v34 = vadd.f32 %v5272_v25, %v2315_v58  ;;  %v3484_v51 = vpop.f32.mrb[32].mxu1 }
 0x345   : > { %v2686_v50 = vadd.f32 %v2685_v27, %v2684_v30  ;;  %v2406_v44 = vmul.f32 %v2324_v24, %v5284_v54  ;;  %v2369_v61 = vadd.f32 %v3484_v51, %v5272_v25  ;;  %v2360_v7 = vpop.f32.mrb[33].mxu1  ;;  %v2629_v49 = vmul.f32 %v2528_v42, %v2405_v60 }
 0x346   : > { %v2679_v9 = vadd.f32 %v2678_v26, %v2677_v12  ;;  %v2404_v47 = vmul.f32 %v2316_v34, %v5284_v54  ;;  %v2361_v46 = vadd.f32 %v5272_v25, %v2360_v7  ;;  %v3485_v31 = vpop.f32.mrb[34].mxu1  ;;  %v2627_v63 = vmul.f32 %v2518_v35, %v2403_v59 }
 0x347   : > { %v2687_v45 = vrot.slane %v2686_v50, 2  ;;  %v2630_v15 = vmul.f32 %v2533_v43, %v2406_v44  ;;  %v2417_v40 = vmul.f32 %v2369_v61, %v5277_v5  ;;  %v2363_v20 = vpop.f32.mrb[35].mxu1  ;;  %v2372_v28 = vadd.f32 %v3485_v31, %v5272_v25 }
 0x348   : > { %v2680_v23 = vrot.slane %v2679_v9, 2  ;;  %v2628_v52 = vmul.f32 %v2523_v1, %v2404_v47  ;;  %v3476_v18 = vpop.f32.mrb[20].mxu0  ;;  %v2415_v2 = vmul.f32 %v2361_v46, %v5277_v5  ;;  %v2364_v36 = vadd.f32 %v5272_v25, %v2363_v20 }
 0x349   : > { %v2688_v62 = vadd.f32 %v2687_v45, %v2686_v50  ;;  %v2698_v16 = vadd.f32 %v2630_v15, %v2629_v49  ;;  %v2337_v56 = vadd.f32 %v3476_v18, %v5272_v25  ;;  %v2328_v29 = vpop.f32.mrb[21].mxu0  ;;  %v2641_v26 = vmul.f32 %v5320_v11, %v2417_v40 }
 0x34a   : > { %v2681_v48 = vadd.f32 %v2680_v23, %v2679_v9  ;;  %v2691_v19 = vadd.f32 %v2628_v52, %v2627_v63  ;;  %v2329_v10 = vadd.f32 %v5272_v25, %v2328_v29  ;;  %v3477_v0 = vpop.f32.mrb[22].mxu0  ;;  %v2418_v61 = vmul.f32 %v2372_v28, %v5284_v54 }
 0x34b   : > { %v2689_v30 = vrot.slane %v2688_v62, 1  ;;  %v2699_v35 = vrot.slane %v2698_v16, 4  ;;  %v2409_v1 = vmul.f32 %v2337_v56, %v5277_v5  ;;  %v2340_v39 = vadd.f32 %v3477_v0, %v5272_v25  ;;  %v2331_v17 = vpop.f32.mrb[23].mxu0 }
 0x34c   : > { %v2682_v12 = vrot.slane %v2681_v48, 1  ;;  %v2692_v4 = vrot.slane %v2691_v19, 4  ;;  %v2407_v8 = vmul.f32 %v2329_v10, %v5277_v5  ;;  %v2332_v27 = vadd.f32 %v5272_v25, %v2331_v17 }
 0x34d   : > { %v2690_v60 = vadd.f32 %v2689_v30, %v2688_v62  ;;  %v2700_v24 = vadd.f32 %v2699_v35, %v2698_v16  ;;  %v2410_v58 = vmul.f32 %v2340_v39, %v5284_v54  ;;  %v2633_v51 = vmul.f32 %v5294_v3, %v2409_v1  ;;  %v2647_v35 = vld [vmem:[#allocation2] sm:$0xff] }
 0x34e   : > { %v2683_v59 = vadd.f32 %v2682_v12, %v2681_v48  ;;  %v2693_v34 = vadd.f32 %v2692_v4, %v2691_v19  ;;  %v2408_v43 = vmul.f32 %v2332_v27, %v5284_v54  ;;  %v2416_v7 = vmul.f32 %v2364_v36, %v5284_v54 }
 0x34f   : > { %v2701_v50 = vrot.slane %v2700_v24, 2  ;;  %v2634_v44 = vmul.f32 %v5292_v14, %v2410_v58  ;;  %v2631_v11 = vmul.f32 %v5280_v22, %v2407_v8  ;;  %v2639_v10 = vmul.f32 %v5316_v38, %v2415_v2 }
 0x350   : > { %v2784_v42 = vsel %vm2783_vm4, %v2683_v59, %v5324_v41  ;;  %v2694_v9 = vrot.slane %v2693_v34, 2  ;;  %v2632_v47 = vmul.f32 %v5274_v37, %v2408_v43  ;;  %v3480_v46 = vpop.f32.mrb[24].mxu0  ;;  %v2642_v41 = vmul.f32 %v5318_v32, %v2418_v61 }
 0x351   : > { %v2702_v31 = vadd.f32 %v2701_v50, %v2700_v24  ;;  %v2786_v3 = vsel %vm2785_vm5, %v2690_v60, %v2784_v42  ;;  %v2712_v45 = vadd.f32 %v2634_v44, %v2633_v51  ;;  %v2353_v49 = vadd.f32 %v3480_v46, %v5272_v25  ;;  %v2344_v14 = vpop.f32.mrb[25].mxu0 }
 0x352   : > { %v2695_v15 = vadd.f32 %v2694_v9, %v2693_v34  ;;  %v2705_v40 = vadd.f32 %v2632_v47, %v2631_v11  ;;  %v2345_v20 = vadd.f32 %v5272_v25, %v2344_v14  ;;  %v3481_v23 = vpop.f32.mrb[26].mxu0  ;;  %v2740_v17 = vadd.f32 %v2642_v41, %v2641_v26 }
 0x353   : > { %v2703_v63 = vrot.slane %v2702_v31, 1  ;;  %v2713_v52 = vrot.slane %v2712_v45, 4  ;;  %v2413_v22 = vmul.f32 %v2353_v49, %v5277_v5  ;;  %v2356_v37 = vadd.f32 %v3481_v23, %v5272_v25  ;;  %v2347_v18 = vpop.f32.mrb[27].mxu0 }
 0x354   : > { %v2696_v62 = vrot.slane %v2695_v15, 1  ;;  %v2706_v16 = vrot.slane %v2705_v40, 4  ;;  %v2411_v56 = vmul.f32 %v2345_v20, %v5277_v5  ;;  %v2348_v29 = vadd.f32 %v5272_v25, %v2347_v18  ;;  %v2608_v18 = vpop.permute.xlu0 %2607 }
 0x355   : > { %v2704_v28 = vadd.f32 %v2703_v63, %v2702_v31  ;;  %v2714_v48 = vadd.f32 %v2713_v52, %v2712_v45  ;;  %v2414_v19 = vmul.f32 %v2356_v37, %v5284_v54  ;;  %v2637_v36 = vmul.f32 %v5309_v53, %v2413_v22  ;;  %v2613_v37 = vpop.permute.xlu1 %2612 }
 0x356   : > { %v2697_v32 = vadd.f32 %v2696_v62, %v2695_v15  ;;  %v2707_v0 = vadd.f32 %v2706_v16, %v2705_v40  ;;  %v2412_v30 = vmul.f32 %v2348_v29, %v5284_v54  ;;  %v2640_v12 = vmul.f32 %v5314_v57, %v2416_v7 }
 0x357   : > { %v2715_v1 = vrot.slane %v2714_v48, 2  ;;  %v2638_v39 = vmul.f32 %v5306_v33, %v2414_v19  ;;  %v2635_v27 = vmul.f32 %v5298_v55, %v2411_v56  ;;  %v2741_v24 = vrot.slane %v2740_v17, 4 }
 0x358   : > { %v2788_v4 = vsel %vm2787_vm6, %v2697_v32, %v2786_v3  ;;  %v2708_v8 = vrot.slane %v2707_v0, 2  ;;  %v2636_v38 = vmul.f32 %v5296_v21, %v2412_v30  ;;  %v2733_v51 = vadd.f32 %v2640_v12, %v2639_v10 }
 0x359   : > { %v2790_v2 = vsel %vm2789_vm7, %v2704_v28, %v2788_v4  ;;  %v2716_v60 = vadd.f32 %v2715_v1, %v2714_v48  ;;  %v2726_v53 = vadd.f32 %v2638_v39, %v2637_v36  ;;  %v2742_v43 = vadd.f32 %v2741_v24, %v2740_v17 }
 0x35a   : > { %v2800_v58 = vadd.f32 %v2790_v2, %v2647_v35  ;;  %v2709_v59 = vadd.f32 %v2708_v8, %v2707_v0  ;;  %v2719_v34 = vadd.f32 %v2636_v38, %v2635_v27  ;;  %v2734_v61 = vrot.slane %v2733_v51, 4 }
 0x35b   : > { %v2717_v33 = vrot.slane %v2716_v60, 1  ;;  %v2727_v26 = vrot.slane %v2726_v53, 4  ;;  %v3488_v57 = vpop.f32.mrb[36].mxu1  ;;  %v2743_v9 = vrot.slane %v2742_v43, 2 }
 0x35c   : > { %2802 = vst [vmem:[#allocation2] sm:$0xff] %v2800_v58  ;;  %v2710_v50 = vrot.slane %v2709_v59, 1  ;;  %v2720_v44 = vrot.slane %v2719_v34, 4  ;;  %v2385_v55 = vadd.f32 %v3488_v57, %v5272_v25  ;;  %v2376_v21 = vpop.f32.mrb[37].mxu1  ;;  %v2735_v3 = vadd.f32 %v2734_v61, %v2733_v51  ;;  %v2812_v61 = vld [vmem:[%s5693_s28 + $0x10] sm:$0xff] (!%p3268_p6) }
 0x35d   : > { %v2718_v7 = vadd.f32 %v2717_v33, %v2716_v60  ;;  %v2728_v42 = vadd.f32 %v2727_v26, %v2726_v53  ;;  %v2377_v11 = vadd.f32 %v5272_v25, %v2376_v21  ;;  %v3489_v47 = vpop.f32.mrb[38].mxu1  ;;  %v2744_v52 = vadd.f32 %v2743_v9, %v2742_v43  ;;  %v2648_v33 = vld [vmem:[#allocation2 + $0x8] sm:$0xff]  ;;  %v2813_v21 = vld [vmem:[%s5693_s28 + $0x18] sm:$0xff] (!%p3268_p6) }
 0x35e   : > { %v2711_v46 = vadd.f32 %v2710_v50, %v2709_v59  ;;  %v2721_v31 = vadd.f32 %v2720_v44, %v2719_v34  ;;  %v2421_v45 = vmul.f32 %v2385_v55, %v5277_v5  ;;  %v2379_v49 = vpop.f32.mrb[39].mxu1  ;;  %v2388_v40 = vadd.f32 %v3489_v47, %v5272_v25  ;;  %v2810_v50 = vld [vmem:[%s5693_s28] sm:$0xff] (!%p3268_p6)  ;;  %v2811_v44 = vld [vmem:[%s5693_s28 + $0x8] sm:$0xff] (!%p3268_p6) }
 0x35f   : > { %v2729_v14 = vrot.slane %v2728_v42, 2  ;;  %v2419_v15 = vmul.f32 %v2377_v11, %v5277_v5  ;;  %v2736_v41 = vrot.slane %v2735_v3, 2  ;;  %v2380_v56 = vadd.f32 %v5272_v25, %v2379_v49  ;;  %v2815_v9 = vld [vmem:[%s5693_s28 + $0x28] sm:$0xff] (!%p3268_p6) }
 0x360   : > { %v2791_v20 = vsel %vm2777_vm1, %v2718_v7, %v2711_v46  ;;  %v2722_v23 = vrot.slane %v2721_v31, 2  ;;  %v2422_v22 = vmul.f32 %v2388_v40, %v5284_v54  ;;  %v2645_v28 = vmul.f32 %v2608_v18, %v2421_v45  ;;  %v2816_v46 = vld [vmem:[%s5693_s28 + $0x30] sm:$0xff] (!%p3268_p6)  ;;  %v2818_v45 = vld [vmem:[%s5693_s28 + $0x40] sm:$0xff] (!%p3268_p6)  ;;  %v2819_v49 = vld [vmem:[%s5693_s28 + $0x48] sm:$0xff] (!%p3268_p6) }
 0x361   : > { %v2730_v63 = vadd.f32 %v2729_v14, %v2728_v42  ;;  %v2737_v16 = vadd.f32 %v2736_v41, %v2735_v3  ;;  %v2420_v10 = vmul.f32 %v2380_v56, %v5284_v54  ;;  %v2745_v32 = vrot.slane %v2744_v52, 1  ;;  %v2814_v42 = vld [vmem:[%s5693_s28 + $0x20] sm:$0xff] (!%p3268_p6)  ;;  %v2821_v40 = vld [vmem:[%s5693_s28 + $0x58] sm:$0xff] (!%p3268_p6)  ;;  %v2823_v41 = vld [vmem:[%s5693_s28 + $0x68] sm:$0xff] (!%p3268_p6) }
 0x362   : > { %v2723_v62 = vadd.f32 %v2722_v23, %v2721_v31  ;;  %v2646_v48 = vmul.f32 %v2613_v37, %v2422_v22  ;;  %v2643_v35 = vmul.f32 %v5336_v6, %v2419_v15  ;;  %v3560_v55 = vpack.c.bf16 (!%p3268_p6), %v2811_v44, %v2810_v50  ;;  %v2817_v31 = vld [vmem:[%s5693_s28 + $0x38] sm:$0xff] (!%p3268_p6)  ;;  %v2820_v15 = vld [vmem:[%s5693_s28 + $0x50] sm:$0xff] (!%p3268_p6)  ;;  %v2822_v23 = vld [vmem:[%s5693_s28 + $0x60] sm:$0xff] (!%p3268_p6) }
 0x363   : > { %v2731_v29 = vrot.slane %v2730_v63, 1  ;;  %v2738_v19 = vrot.slane %v2737_v16, 1  ;;  %v2644_v1 = vmul.f32 %v5334_v13, %v2420_v10  ;;  %v2746_v4 = vadd.f32 %v2745_v32, %v2744_v52  ;;  %v2808_v47 = vld [vmem:[#allocation2] sm:$0xff] (!%p3268_p6)  ;;  %v2824_v52 = vld [vmem:[%s5693_s28 + $0x70] sm:$0xff] (!%p3268_p6)  ;;  %v2825_v22 = vld [vmem:[%s5693_s28 + $0x78] sm:$0xff] (!%p3268_p6) }
 0x364   : > { %v2724_v5 = vrot.slane %v2723_v62, 1  ;;  %v2754_v0 = vadd.f32 %v2646_v48, %v2645_v28  ;;  %v3564_v7 = vpack.c.bf16 (!%p3268_p6), %v2813_v21, %v2812_v61  ;;  %3561 = vmatprep.subr.bf16.mxu0 (!%p3268_p6), %v3560_v55  ;;  %v3568_v11 = vpack.c.bf16 (!%p3268_p6), %v2815_v9, %v2814_v42  ;;  %3522 = vmatprep.mubr.f32.mxu0 (!%p3268_p6), %v2808_v47  ;;  %v2943_v28 = vld [vmem:[%s5695_s29 + $0x18] sm:$0xff] (!%p3268_p6)  ;;  %v2944_v48 = vld [vmem:[%s5695_s29 + $0x20] sm:$0xff] (!%p3268_p6)  ;;  %v2946_v32 = vld [vmem:[%s5695_s29 + $0x30] sm:$0xff] (!%p3268_p6) }
 0x365   : > { %v2739_v30 = vadd.f32 %v2738_v19, %v2737_v16  ;;  %v2732_v39 = vadd.f32 %v2731_v29, %v2730_v63  ;;  %v2747_v25 = vadd.f32 %v2644_v1, %v2643_v35  ;;  %3563 = vmatpush3.bf16.msra.mxu0 (!%p3268_p6), %v3560_v55  ;;  %v3572_v3 = vpack.c.bf16 (!%p3268_p6), %v2817_v31, %v2816_v46  ;;  %v2941_v16 = vld [vmem:[%s5695_s29 + $0x8] sm:$0xff] (!%p3268_p6)  ;;  %v2942_v29 = vld [vmem:[%s5695_s29 + $0x10] sm:$0xff] (!%p3268_p6) }
 0x366   : > { %v2725_v36 = vadd.f32 %v2724_v5, %v2723_v62  ;;  %v2755_v17 = vrot.slane %v2754_v0, 4  ;;  %3565 = vmatprep.subr.bf16.mxu0 (!%p3268_p6), %v3564_v7  ;;  %v3576_v14 = vpack.c.bf16 (!%p3268_p6), %v2819_v49, %v2818_v45  ;;  %v3584_v63 = vpack.c.bf16 (!%p3268_p6), %v2823_v41, %v2822_v23  ;;  %v2940_v62 = vld [vmem:[%s5694_s23] sm:$0xff] (!%p3268_p6)  ;;  %v2945_v19 = vld [vmem:[%s5695_s29 + $0x28] sm:$0xff] (!%p3268_p6)  ;;  %s5697_s23 = sld [smem:[#allocation21_spill]] (!%p3268_p6) }
 0x367   : > { %v2748_v54 = vrot.slane %v2747_v25, 4  ;;  %v3588_v37 = vpack.c.bf16 (!%p3268_p6), %v2825_v22, %v2824_v52  ;;  %v3592_v56 = vpack.c.bf16 (!%p3268_p6), %v2941_v16, %v2940_v62  ;;  %v3596_v5 = vpack.c.bf16 (!%p3268_p6), %v2943_v28, %v2942_v29  ;;  %v2949_v35 = vld [vmem:[%s5695_s29 + $0x48] sm:$0xff] (!%p3268_p6)  ;;  %v3038_v62 = vld [vmem:[%s4413_s30] sm:$0xff] (!%p3268_p6) }
 0x368   : > { %v2792_v12 = vsel %vm2779_vm2, %v2725_v36, %v2791_v20  ;;  %v2756_v27 = vadd.f32 %v2755_v17, %v2754_v0  ;;  %v3580_v20 = vpack.c.bf16 (!%p3268_p6), %v2821_v40, %v2820_v15  ;;  %v3600_v10 = vpack.c.bf16 (!%p3268_p6), %v2945_v19, %v2944_v48  ;;  %v2947_v0 = vld [vmem:[%s5695_s29 + $0x38] sm:$0xff] (!%p3268_p6)  ;;  %v3039_v22 = vld [vmem:[%s4413_s30 + $0x8] sm:$0xff] (!%p3268_p6) }
 0x369   : > { %v2793_v8 = vsel %vm2781_vm3, %v2732_v39, %v2792_v12  ;;  %v2749_v53 = vadd.f32 %v2748_v54, %v2747_v25  ;;  %3567 = vmatpush3.bf16.msra.mxu0 (!%p3268_p6), %v3564_v7  ;;  %3593 = vmatprep.subr.bf16.mxu1 (!%p3268_p6), %v3592_v56  ;;  %v3604_v36 = vpack.c.bf16 (!%p3268_p6), %v2947_v0, %v2946_v32  ;;  %v2950_v39 = vld [vmem:[%s5695_s29 + $0x50] sm:$0xff] (!%p3268_p6)  ;;  %v2951_v17 = vld [vmem:[%s5695_s29 + $0x58] sm:$0xff] (!%p3268_p6)  ;;  %v2952_v25 = vld [vmem:[%s5695_s29 + $0x60] sm:$0xff] (!%p3268_p6) }
 0x36a   : > { %v2794_v38 = vsel %vm2783_vm4, %v2739_v30, %v2793_v8  ;;  %v2757_v2 = vrot.slane %v2756_v27, 2  ;;  %3569 = vmatprep.subr.bf16.mxu0 (!%p3268_p6), %v3568_v11  ;;  %3595 = vmatpush3.bf16.msra.mxu1 (!%p3268_p6), %v3592_v56  ;;  %v2948_v30 = vld [vmem:[%s5695_s29 + $0x40] sm:$0xff] (!%p3268_p6)  ;;  %v3612_v12 = vpack.c.bf16 (!%p3268_p6), %v2951_v17, %v2950_v39 }
 0x36b   : > { %v2795_v60 = vsel %vm2785_vm5, %v2746_v4, %v2794_v38  ;;  %v2750_v6 = vrot.slane %v2749_v53, 2  ;;  %3597 = vmatprep.subr.bf16.mxu1 (!%p3268_p6), %v3596_v5  ;;  %v3608_v1 = vpack.c.bf16 (!%p3268_p6), %v2949_v35, %v2948_v30  ;;  %v2953_v4 = vld [vmem:[%s5695_s29 + $0x68] sm:$0xff] (!%p3268_p6)  ;;  %v2955_v38 = vld [vmem:[%s5695_s29 + $0x78] sm:$0xff] (!%p3268_p6) }
 0x36c   : > { %v2758_v24 = vadd.f32 %v2757_v2, %v2756_v27  ;;  %v3616_v8 = vpack.c.bf16 (!%p3268_p6), %v2953_v4, %v2952_v25  ;;  %v2954_v27 = vld [vmem:[%s5695_s29 + $0x70] sm:$0xff] (!%p3268_p6)  ;;  %v3269_v2 = vld [vmem:[%s5696_s21] ss:$0 sm:$0xff] (!%p3268_p6) }
 0x36d   : > { %v2751_v58 = vadd.f32 %v2750_v6, %v2749_v53  ;;  %3571 = vmatpush3.bf16.msra.mxu0 (!%p3268_p6), %v3568_v11  ;;  %v3620_v54 = vpack.c.bf16 (!%p3268_p6), %v2955_v38, %v2954_v27 }
 0x36e   : > { %v2759_v13 = vrot.slane %v2758_v24, 1  ;;  %3573 = vmatprep.subr.bf16.mxu0 (!%p3268_p6), %v3572_v3  ;;  %3599 = vmatpush3.bf16.msra.mxu1 (!%p3268_p6), %v3596_v5 }
 0x36f   : > { %v2752_v59 = vrot.slane %v2751_v58, 1  ;;  %3601 = vmatprep.subr.bf16.mxu1 (!%p3268_p6), %v3600_v10 }
 0x370   : > { %v2760_v51 = vadd.f32 %v2759_v13, %v2758_v24 }
 0x371   : > { %v2753_v34 = vadd.f32 %v2752_v59, %v2751_v58  ;;  %2807 = sbr.rel (%p3268_p6) target bundleno = 1371 (0x55b), region = 164  ;;  %3575 = vmatpush3.bf16.msra.mxu0 (!%p3268_p6), %v3572_v3 }
 0x372   : > { %3577 = vmatprep.subr.bf16.mxu0 (!%p3268_p6), %v3576_v14  ;;  %3603 = vmatpush3.bf16.msra.mxu1 (!%p3268_p6), %v3600_v10 }
 0x373   : > { %v2796_v26 = vsel %vm2787_vm6, %v2753_v34, %v2795_v60  ;;  %3605 = vmatprep.subr.bf16.mxu1 (!%p3268_p6), %v3604_v36 }
 0x374   : > { %v2797_v43 = vsel %vm2789_vm7, %v2760_v51, %v2796_v26 }
 0x375   : > { %v2801_v57 = vadd.f32 %v2797_v43, %v2648_v33  ;;  %3579 = vmatpush3.bf16.msra.mxu0 (!%p3268_p6), %v3576_v14 }
 0x376   : > { %3581 = vmatprep.subr.bf16.mxu0 (!%p3268_p6), %v3580_v20  ;;  %3607 = vmatpush3.bf16.msra.mxu1 (!%p3268_p6), %v3604_v36 }
 0x377   : > { %2803 = vst [vmem:[#allocation2 + $0x8] sm:$0xff] %v2801_v57  ;;  %3609 = vmatprep.subr.bf16.mxu1 (!%p3268_p6), %v3608_v1 }
 0x379   : > { %3583 = vmatpush3.bf16.msra.mxu0 %v3580_v20 }
 0x37a   : > { %3585 = vmatprep.subr.bf16.mxu0 %v3584_v63  ;;  %3611 = vmatpush3.bf16.msra.mxu1 %v3608_v1 }
 0x37b   : > { %3613 = vmatprep.subr.bf16.mxu1 %v3612_v12 }
 0x37d   : > { %3587 = vmatpush3.bf16.msra.mxu0 %v3584_v63  ;;  %v3272_v63 = vld [vmem:[%s5697_s23] ss:$0 sm:$0xff] }
 0x37e   : > { %3589 = vmatprep.subr.bf16.mxu0 %v3588_v37  ;;  %v2809_v18 = vld [vmem:[#allocation2 + $0x8] sm:$0xff]  ;;  %3615 = vmatpush3.bf16.msra.mxu1 %v3612_v12 }
 0x37f   : > { %3617 = vmatprep.subr.bf16.mxu1 %v3616_v8 }
 0x381   : > { %3591 = vmatpush3.bf16.msra.mxu0 %v3588_v37 }
 0x382   : > { %3619 = vmatpush3.bf16.msra.mxu1 %v3616_v8 }
 0x383   : > { %3621 = vmatprep.subr.bf16.mxu1 %v3620_v54 }
 0x384   : > { %3523 = vmatmul.mubr.f32.vlgmr.msra.gmra.mrb[0].mxu0 %v2809_v18 }
 0x386   : > { %3623 = vmatpush3.bf16.msra.mxu1 %v3620_v54 }
 0x457   : > { %v3524_v60 = vpop.f32.mrb[0].mxu0 }
 0x458   : > { %v2905_v53 = vadd.f32 %v3524_v60, %v3269_v2  ;;  %v2899_v24 = vpop.f32.mrb[1].mxu0 }
 0x459   : > { %v2900_v6 = vadd.f32 %v3269_v2, %v2899_v24 }
 0x45a   : > { %v2911_v58 = vand.u32 2147483647, %v2905_v53  ;;  %v2909_v31 = vmax.f32 %v2905_v53, 0.0 }
 0x45b   : > { %v2910_v13 = vand.u32 2147483647, %v2900_v6  ;;  %v2908_v49 = vmax.f32 %v2900_v6, 0.0 }
 0x45c   : > { %v2913_v59 = vsub.f32 0.0, %v2911_v58 }
 0x45d   : > { %v2912_v34 = vsub.f32 0.0, %v2910_v13 }
 0x45e   : > { %v2916_v51 = vmul.f32 1.442695, %v2913_v59 }
 0x45f   : > { %v2914_v33 = vmul.f32 1.442695, %v2912_v34 }
 0x460   : > { %3952 = vpow2.f32 %v2916_v51 }
 0x461   : > { %3954 = vpow2.f32 %v2914_v33 }
 0x46a   : > { %v3953_v26 = vpop.eup %3952 }
 0x46b   : > { %v3955_v43 = vpop.eup %3954  ;;  %v2927_v57 = vadd.f32 1.0, %v3953_v26  ;;  %v2930_v44 = vmul.f32 -0.5, %v3953_v26  ;;  %v2933_v7 = vand.u32 2147483647, %v3953_v26 }
 0x46c   : > { %v2918_v50 = vadd.f32 1.0, %v3955_v43  ;;  %v2921_v61 = vmul.f32 -0.5, %v3955_v43  ;;  %v2924_v42 = vand.u32 2147483647, %v3955_v43 }
 0x46d   : > { %3956 = vlog2.f32 %v2927_v57  ;;  %v2931_v55 = vadd.f32 1.0, %v2930_v44  ;;  %vm2934_vm8 = vcmp.lt.f32.partialorder %v2933_v7, 0.0004427343 }
 0x46e   : > { %3958 = vlog2.f32 %v2918_v50  ;;  %v2922_v21 = vadd.f32 1.0, %v2921_v61  ;;  %vm2925_vm9 = vcmp.lt.f32.partialorder %v2924_v42, 0.0004427343 }
 0x46f   : > { %v2932_v46 = vmul.f32 %v3953_v26, %v2931_v55 }
 0x470   : > { %v2923_v45 = vmul.f32 %v3955_v43, %v2922_v21 }
 0x477   : > { %v3957_v9 = vpop.eup %3956 }
 0x478   : > { %v3959_v11 = vpop.eup %3958  ;;  %v2929_v47 = vmul.f32 0.6931472, %v3957_v9 }
 0x479   : > { %v2920_v3 = vmul.f32 0.6931472, %v3959_v11 }
 0x47a   : > { %v2935_v14 = vsel %vm2934_vm8, %v2932_v46, %v2929_v47 }
 0x47b   : > { %v2926_v15 = vsel %vm2925_vm9, %v2923_v45, %v2920_v3  ;;  %v2937_v40 = vadd.f32 %v2935_v14, %v2909_v31 }
 0x47c   : > { %v2936_v20 = vadd.f32 %v2926_v15, %v2908_v49 }
 0x47d   : > { %v3271_v41 = vadd.f32 -0.6931472, %v2937_v40 }
 0x47e   : > { %v3270_v23 = vadd.f32 -0.6931472, %v2936_v20 }
 0x480   : > { %3557 = vmatprep.mubr.f32.mxu1 %v3270_v23 }
 0x481   : > { %3558 = vmatmul.mubr.f32.vlgmr.msra.gmra.mrb[0].mxu1 %v3271_v41 }
 0x554   : > { %v3559_v52 = vpop.f32.mrb[0].mxu1 }
 0x555   : > { %v3035_v37 = vadd.f32 %v3559_v52, %v3272_v63  ;;  %v3029_v18 = vpop.f32.mrb[1].mxu1 }
 0x556   : > { %v3030_v16 = vadd.f32 %v3272_v63, %v3029_v18 }
 0x557   : > { %v3041_v56 = vadd.f32 %v3039_v22, %v3035_v37 }
 0x558   : > { %v3040_v29 = vadd.f32 %v3038_v62, %v3030_v16 }
 0x559   : > { %3043 = vst [vmem:[%s4424_s26 + $0x8] sm:$0xff] %v3041_v56 }
 0x55a   : > { %3042 = vst [vmem:[%s4424_s26] sm:$0xff] %v3040_v29 }
 0x55b PF: > { %s3280_s12 = sshll.u32 %s4058_s24, 8  ;;  %s5698_s17 = sld [smem:[#allocation22_spill]] }
 0x55c   : > { %s3058_s10 = sshll.u32 %s4424_s26, 4  ;;  %s5699_s30 = sand.u32 1, %s4038_s19   ;;  %s5520_s10 = int_to_ptr.vmem [resolvable:$true] %s3058_s10 }
 0x55d   : > { %s5524_s18 = scalar_lea.sflag [#allocation6], %s5699_s30  ;;  %s3960_s16 = scalar_lea.vmem %s5520_s10, 256 }
 0x55e   : > { %p3961_p8 = scmp.ne.s32.totalorder %s5520_s10, %s3960_s16  ;;  %s4076_s24 = smov [#allocation5]  }
 0x55f   : > { %s3964_s21 = sshll.u32 %s4076_s24, 4  ;;  %s3965_s21 = int_to_ptr.vmem [resolvable:$false] %s3964_s21 }
 0x560   : > { %p3962_p9 = pnand %p3961_p8, %p4231_p7  ;;  %s3966_s2 = scalar_lea.vmem %s3965_s21, 512 }
 0x561   : > { %s5517_s15 = scalar_lea.hbm %s5698_s17, %s3280_s12  ;;  %p3967_p11 = scmp.lt.s32.totalorder %s5520_s10, %s3965_s21 }
 0x562   : > { %p3963_p10 = pneg %p3962_p9  ;;  %p3968_p13 = scmp.lt.s32.totalorder %s3966_s2, %s3960_s16 }
 0x564   : > { %p3969_p0 = por %p3968_p13, %p3967_p11 }
 0x566   : > { %p3970_p1 = pnand %p3969_p0, %p3963_p10 }
 0x568   : > { %3973 = shalt.err (!%p3970_p1)
}
 0x569   : > { %s3974_s26 = scalar_lea.hbm %s5517_s15, 256  ;;  %s3978_s12 = scalar_lea.hbm %s5698_s17, 512 }
 0x56a   : > { %p3975_p2 = scmp.ne.s32.totalorder %s5517_s15, %s3974_s26  ;;  %p3979_p5 = scmp.lt.u32.totalorder %s5517_s15, %s5698_s17 }
 0x56b   : > { %p3980_p6 = scmp.lt.u32.totalorder %s3978_s12, %s3974_s26  ;;  %p3982_p9 = scmp.lt.u32.totalorder %s3974_s26, %s5517_s15 }
 0x56c   : > { %p3976_p3 = pnand %p3975_p2, %p4231_p7 }
 0x56d   : > { %p3981_p8 = por %p3980_p6, %p3979_p5 }
 0x56e   : > { %p3977_p4 = pneg %p3976_p3 }
 0x56f   : > { %p3983_p10 = por %p3982_p9, %p3981_p8 }
 0x571   : > { %p3984_p11 = pnand %p3983_p10, %p3977_p4 }
 0x573   : > { %3987 = shalt.err (!%p3984_p11)
}
 0x574   : > { %s4077_s30 = smov 128   ;;  %s4078_s16 = smov 8  }
 0x575   : > { %3640 = dma.vmem_to_hbm [thread:$0]  (%p4231_p7), %s5520_s10, 256, %s5517_s15, %s5524_s18, %s4077_s30, %s4077_s30, %s4078_s16  }
 0x576 PF: > { %s5700_s24 = sld [smem:[#allocation8_spill]]  ;;  %p3646_p13 = scmp.ge.s32.totalorder %s4070_s27, 2 }
 0x578   : > { %p3643_p0 = pnand %p3646_p13, %p4239_p12 }
 0x57c   : > { %s3073_s2 = sand.u32 1, %s5700_s24  }
 0x57d   : > { %s3074_s26 = scalar_lea.sflag [#allocation6], %s3073_s2 }
 0x57e   : > { %4029 = dma.done.wait (!%p3643_p0), %s3074_s26, 256  }
 0x57f   : > { %4031 = vsyncadd (!%p3643_p0), %s3074_s26, 4294967040  ;;  %s28_s27 = sadd.s32 1, %s4070_s27   ;;  %s5702_s13 = sld [smem:[#allocation13_spill]] }
 0x580   : > { %p25_p1 = scmp.ge.s32.totalorder %s28_s27, 6   ;;  %s5703_s24 = sld [smem:[#allocation9_spill]] }
 0x581   : > { %s5704_s15 = sld [smem:[#allocation10_spill]]  ;;  %s5705_s26 = sld [smem:[#allocation11_spill]] }
 0x582   : > { %s5706_s18 = smov %s4038_s19  ;;  %s5707_s19 = smov %s4042_s20 }
 0x583   : > { %s5708_s20 = smov %s4244_s6  ;;  %s5709_s21 = smov %s4050_s22 }
 0x584   : > { %s5711_s23 = smov %s4062_s25  ;;  %27 = sbr.rel (!%p25_p1) target bundleno = 16 (0x10), region = 218 }
 0x585   : > { %s5710_s22 = smov %s5702_s13 }
 0x587   : > { %s5712_s25 = smov %s5704_s15 }
 0x58b   :  { %3079 = vsyncpa [#allocation6], 1 }
 0x58c   :  { %3081 = vsyncpa [#allocation6 + $0x1], 1 }

</bundles_post_ra>
